<compile_context>
chip_gen: v7x
topology: tpu7x:2x2x1
jax: 0.10.0
libtpu: 0.0.40
codegen_flags: <defaults>
</compile_context>

<pallas_src>
import functools
import math

import jax
import jax.numpy as jnp
from jax.experimental import pallas as pl
from jax.experimental.pallas import tpu as pltpu


# ----------------------------------------------------------------------------
# Kernel 1: fused DyConv1..4 + BatchNorm1d(100) + ReLU.  grid = (T,)
# ----------------------------------------------------------------------------
def fused_dyconv_kernel(xT_ref, adj_ref, *refs):
    # xT_ref : (B, 1, Fin0, N)   features on sublanes, nodes on lanes
    # adj_ref: (B, 1, N, N)
    # refs   : 4 params per layer (wt, b, gamma, beta) ... , then o_ref
    # o_ref  : (1, B, N)         lane-dense output (nodes on lanes)
    o_ref = refs[-1]
    prefs = refs[:-1]
    n_layers = len(prefs) // 4
    B = xT_ref.shape[0]

    adj = [adj_ref[b, 0] for b in range(B)]           # (N, N) per batch elem
    h = [xT_ref[b, 0] for b in range(B)]              # (Fin, N) per batch elem

    for l in range(n_layers):
        wt = prefs[4 * l][...]                        # (Fout, Fin)  == W.T
        bias = prefs[4 * l + 1][...]                  # (Fout, 1)
        gamma = prefs[4 * l + 2][...]                 # (1, N)
        beta = prefs[4 * l + 3][...]                  # (1, N)
        fout = wt.shape[0]

        ys = []
        for b in range(B):
            # support^T = W^T @ x^T                    -> (Fout, N)
            sT = jnp.dot(wt, h[b], preferred_element_type=jnp.float32)
            # (adj @ support)^T : contract node dim j of adj with lanes of sT
            yT = jax.lax.dot_general(
                sT, adj[b], (((1,), (1,)), ((), ())),
                preferred_element_type=jnp.float32) + bias
            ys.append(yT)                             # (Fout, N)

        # BatchNorm1d(100), training statistics: per node over (batch, Fout),
        # computed as sublane reductions on a lane-dense (B*Fout, N) slab.
        Y = jnp.concatenate(ys, axis=0)               # (B*Fout, N)
        mean = jnp.mean(Y, axis=0, keepdims=True)     # (1, N)
        var = jnp.mean((Y - mean) ** 2, axis=0, keepdims=True)
        Yn = (Y - mean) * jax.lax.rsqrt(var + 1e-5) * gamma + beta
        Yn = jnp.maximum(Yn, 0.0)                     # ReLU
        h = [Yn[b * fout:(b + 1) * fout, :] for b in range(B)]

    # last layer has Fout == 1 -> (1, N) per batch elem; emit (B, N) lane-dense
    o_ref[0] = jnp.concatenate(h, axis=0)


def fused_dyconv(xT, adj, dy_params):
    # xT: (B, T, Fin0, N), adj: (B, T, N, N)  ->  (T, B, N)
    B, T, fin0, N = xT.shape
    flat = []
    in_specs = [
        pl.BlockSpec((B, 1, fin0, N), lambda t: (0, t, 0, 0)),
        pl.BlockSpec((B, 1, N, N), lambda t: (0, t, 0, 0)),
    ]
    for p in dy_params:
        for name in ("wt", "b", "gamma", "beta"):
            a = p[name]
            flat.append(a)
            in_specs.append(pl.BlockSpec(a.shape,
                                         lambda t, nd=a.ndim: (0,) * nd))
    return pl.pallas_call(
        fused_dyconv_kernel,
        out_shape=jax.ShapeDtypeStruct((T, B, N), jnp.float32),
        grid=(T,),
        in_specs=in_specs,
        out_specs=pl.BlockSpec((1, B, N), lambda t: (t, 0, 0)),
        compiler_params=pltpu.CompilerParams(
            dimension_semantics=("parallel",)),   # time-steps are independent
    )(xT, adj, *flat)


# ----------------------------------------------------------------------------
# Kernel 2: all Building_Blocks + final Norm -> Linear(1,Ff) -> tanh, one step
# ----------------------------------------------------------------------------
def transformer_tail_kernel(seq_ref, *refs, num_heads, num_blocks,
                            final_features):
    # seq_ref: (B, T, D=100); per block 16 param refs; then alpha, beta,
    # lin_w (SMEM), lin_b (SMEM); o_ref: (Ff, B, T, D) lane-dense.
    o_ref = refs[-1]
    prefs = refs[:-1]
    B, T, D = seq_ref.shape
    dk = D // num_heads
    scale = 1.0 / math.sqrt(dk)

    def row_norm(v, a, b):
        # Curb-GAN Norm: unbiased std over the last dim, eps added to std.
        mean = jnp.mean(v, axis=-1, keepdims=True)
        std = jnp.sqrt(jnp.sum((v - mean) ** 2, axis=-1, keepdims=True)
                       / float(D - 1))
        return a * (v - mean) / (std + 1e-6) + b

    x = seq_ref[...].reshape(B * T, D)                # rows = (b, t), lanes = D

    for blk in range(num_blocks):
        (n1a, n1b, wq, bq, wk, bk, wv, bv, wo, bo,
         n2a, n2b, w1, b1, w2, b2) = [r[...] for r in
                                      prefs[16 * blk:16 * blk + 16]]

        # --- multi-head self attention on norm_1(x) ---
        x2 = row_norm(x, n1a, n1b)                    # (B*T, D)
        qh, kh, vh = [], [], []
        for h in range(num_heads):                    # per-head, lane-aligned
            qh.append((jnp.dot(x2, wq[h], preferred_element_type=jnp.float32)
                       + bq[h]).reshape(B, T, dk))
            kh.append((jnp.dot(x2, wk[h], preferred_element_type=jnp.float32)
                       + bk[h]).reshape(B, T, dk))
            vh.append((jnp.dot(x2, wv[h], preferred_element_type=jnp.float32)
                       + bv[h]).reshape(B, T, dk))
        outs = []
        for b in range(B):
            o_b = None
            for h in range(num_heads):
                s = jax.lax.dot_general(
                    qh[h][b], kh[h][b], (((1,), (1,)), ((), ())),
                    preferred_element_type=jnp.float32) * scale   # (T, T)
                p = jax.nn.softmax(s, axis=-1)        # dropout == identity
                head = jnp.dot(p, vh[h][b],
                               preferred_element_type=jnp.float32)  # (T, dk)
                # concat(heads) @ Wo  ==  sum_h head_h @ Wo_rows[h]
                contrib = jnp.dot(head, wo[h],
                                  preferred_element_type=jnp.float32)
                o_b = contrib if o_b is None else o_b + contrib
            outs.append(o_b + bo)                     # (T, D)
        x = x + jnp.concatenate(outs, axis=0)         # residual

        # --- feed forward on norm_2(x) ---
        x2 = row_norm(x, n2a, n2b)
        hdn = jnp.maximum(
            jnp.dot(x2, w1, preferred_element_type=jnp.float32) + b1, 0.0)
        x = x + jnp.dot(hdn, w2, preferred_element_type=jnp.float32) + b2

    # --- final Norm(100) -> Linear(1, Ff) -> tanh ---
    base = 16 * num_blocks
    alpha = prefs[base][...]
    beta = prefs[base + 1][...]
    lw = prefs[base + 2]                              # SMEM (Ff,)
    lb = prefs[base + 3]                              # SMEM (Ff,)
    xn = row_norm(x, alpha, beta).reshape(B, T, D)
    for f in range(final_features):
        o_ref[f] = jnp.tanh(xn * lw[f] + lb[f])       # lane-dense store


def transformer_tail(seq, block_params, final_params, num_heads):
    # seq: (B, T, D)  ->  (Ff, B, T, D)
    B, T, D = seq.shape
    Ff = final_params["lin_w"].shape[0]
    flat = [seq]
    in_specs = [pl.BlockSpec((B, T, D), lambda i: (0, 0, 0))]
    order = ("n1a", "n1b", "wq", "bq", "wk", "bk", "wv", "bv", "wo", "bo",
             "n2a", "n2b", "w1", "b1", "w2", "b2")
    for p in block_params:
        for name in order:
            a = p[name]
            flat.append(a)
            in_specs.append(pl.BlockSpec(a.shape,
                                         lambda i, nd=a.ndim: (0,) * nd))
    for name in ("alpha", "beta"):
        a = final_params[name]
        flat.append(a)
        in_specs.append(pl.BlockSpec(a.shape, lambda i: (0, 0)))
    for name in ("lin_w", "lin_b"):
        flat.append(final_params[name])
        in_specs.append(pl.BlockSpec(memory_space=pltpu.MemorySpace.SMEM))

    kernel = functools.partial(transformer_tail_kernel, num_heads=num_heads,
                               num_blocks=len(block_params), final_features=Ff)
    return pl.pallas_call(
        kernel,
        out_shape=jax.ShapeDtypeStruct((Ff, B, T, D), jnp.float32),
        grid=(1,),
        in_specs=in_specs,
        out_specs=pl.BlockSpec((Ff, B, T, D), lambda i: (0, 0, 0, 0)),
        compiler_params=pltpu.CompilerParams(
            dimension_semantics=("arbitrary",)),
    )(*flat)


# ----------------------------------------------------------------------------
# Full forward (glue = two tiny transposes, < 40 KB total)
# ----------------------------------------------------------------------------
def generator_forward(x, adj, c, params, num_heads):
    # cat(x, c) on features, then lay out as (B, T, Fin, N) so the 100 nodes
    # live on the lane dim inside the kernels (~38 KB, done once).
    xT = jnp.transpose(jnp.concatenate([x, c], axis=3),
                       (0, 1, 3, 2)).astype(jnp.float32)
    seq_tbn = fused_dyconv(xT, adj.astype(jnp.float32), params["dy"])  # (T,B,N)
    seq = jnp.transpose(seq_tbn, (1, 0, 2))       # (B,T,N) == x.view(B,12,100)
    out = transformer_tail(seq, params["blocks"], params["final"], num_heads)
    return jnp.transpose(out, (1, 2, 3, 0))       # (Ff,B,T,N) -> (B,T,N,Ff)


# ----------------------------------------------------------------------------
# Pure-JAX reference (same math, PyTorch semantics) for a numeric self-check
# ----------------------------------------------------------------------------
def reference_forward(x, adj, c, params, num_heads):
    hi = jax.lax.Precision.HIGHEST
    B, T, Nn, _ = x.shape
    h = jnp.concatenate([x, c], axis=3)
    for p in params["dy"]:
        w = p["wt"].T                                      # (Fin, Fout)
        support = jnp.einsum("btnf,fo->btno", h, w, precision=hi)
        y = jnp.einsum("btij,btjo->btio", adj, support,
                       precision=hi) + p["b"][:, 0]
        mean = jnp.mean(y, axis=(0, 3), keepdims=True)     # per-t, per-node
        var = jnp.mean((y - mean) ** 2, axis=(0, 3), keepdims=True)
        yn = (y - mean) * jax.lax.rsqrt(var + 1e-5)
        yn = yn * p["gamma"][0][None, None, :, None] \
             + p["beta"][0][None, None, :, None]
        h = jnp.maximum(yn, 0.0)
    seq = h[..., 0]                                        # (B, T, 100)
    D = Nn
    dk = D // num_heads

    def norm(v, a, b):
        m = jnp.mean(v, axis=-1, keepdims=True)
        s = jnp.sqrt(jnp.sum((v - m) ** 2, axis=-1, keepdims=True) / (D - 1))
        return a * (v - m) / (s + 1e-6) + b

    xx = seq
    for p in params["blocks"]:
        x2 = norm(xx, p["n1a"][0], p["n1b"][0])
        attn = jnp.zeros_like(xx)
        for hh in range(num_heads):
            q = jnp.einsum("btd,dk->btk", x2, p["wq"][hh],
                           precision=hi) + p["bq"][hh, 0]
            k = jnp.einsum("btd,dk->btk", x2, p["wk"][hh],
                           precision=hi) + p["bk"][hh, 0]
            v = jnp.einsum("btd,dk->btk", x2, p["wv"][hh],
                           precision=hi) + p["bv"][hh, 0]
            s = jnp.einsum("bqk,bjk->bqj", q, k, precision=hi) / math.sqrt(dk)
            pr = jax.nn.softmax(s, axis=-1)
            head = jnp.einsum("bqj,bjk->bqk", pr, v, precision=hi)
            attn = attn + jnp.einsum("btk,kd->btd", head, p["wo"][hh],
                                     precision=hi)
        xx = xx + attn + p["bo"][0]
        x2 = norm(xx, p["n2a"][0], p["n2b"][0])
        hdn = jnp.maximum(jnp.einsum("btd,de->bte", x2, p["w1"],
                                     precision=hi) + p["b1"][0], 0.0)
        xx = xx + jnp.einsum("bte,ed->btd", hdn, p["w2"],
                             precision=hi) + p["b2"][0]
    xn = norm(xx, params["final"]["alpha"][0], params["final"]["beta"][0])
    out = jnp.tanh(xn[..., None] * params["final"]["lin_w"]
                   + params["final"]["lin_b"])
    return out


# ----------------------------------------------------------------------------
# Deterministic synthetic parameters, stored directly in kernel-friendly
# layouts (wt = W.T ; BN affine as (1, N) rows ; per-head attention weights).
# ----------------------------------------------------------------------------
def init_params(key, input_features, hidden_features, final_features,
                num_heads, N, n_nodes=100):
    D = n_nodes * 1
    H = num_heads
    dk = D // H
    keys = iter(jax.random.split(key, 512))

    def nrm(shape, scale=0.1):
        return scale * jax.random.normal(next(keys), shape, jnp.float32)

    dims = [(input_features, hidden_features),
            (hidden_features, hidden_features // 2),
            (hidden_features // 2, hidden_features // 4),
            (hidden_features // 4, 1)]
    dy = []
    for fi, fo in dims:
        dy.append(dict(
            wt=nrm((fo, fi), 0.5),                 # DyConv weight, (out, in)
            b=nrm((fo, 1), 0.1),                   # DyConv bias
            gamma=1.0 + nrm((1, n_nodes), 0.1),    # BatchNorm1d(100) affine
            beta=nrm((1, n_nodes), 0.1),
        ))

    def split_cols(w):                             # (D,D) -> (H, D, dk)
        return jnp.transpose(w.reshape(D, H, dk), (1, 0, 2))

    def split_bias(b):                             # (1,D) -> (H, 1, dk)
        return jnp.transpose(b.reshape(1, H, dk), (1, 0, 2))

    blocks = []
    for _ in range(N):
        wq, wk, wv, wo = nrm((D, D)), nrm((D, D)), nrm((D, D)), nrm((D, D))
        bq, bk, bv, bo = nrm((1, D)), nrm((1, D)), nrm((1, D)), nrm((1, D))
        blocks.append(dict(
            n1a=1.0 + nrm((1, D), 0.05), n1b=nrm((1, D), 0.05),
            wq=split_cols(wq), bq=split_bias(bq),
            wk=split_cols(wk), bk=split_bias(bk),
            wv=split_cols(wv), bv=split_bias(bv),
            wo=wo.reshape(H, dk, D), bo=bo,
            n2a=1.0 + nrm((1, D), 0.05), n2b=nrm((1, D), 0.05),
            w1=nrm((D, D)), b1=nrm((1, D)),
            w2=nrm((D, D)), b2=nrm((1, D)),
        ))

    final = dict(
        alpha=1.0 + nrm((1, D), 0.05),
        beta=nrm((1, D), 0.05),
        lin_w=nrm((final_features,), 0.5),   # nn.Linear(1, Ff): weight[:, 0]
        lin_b=nrm((final_features,), 0.1),
    )
    return dict(dy=dy, blocks=blocks, final=final)


if __name__ == "__main__":
    B, T, Nn = 2, 12, 100          # 12 time-steps / 100 nodes are hardwired
    fx, fc = 2, 2
    input_features = fx + fc       # 4
    hidden_features = 8
    final_features = 2
    num_heads = 2                  # must divide d_model = 100
    N_blocks = 1

    key = jax.random.PRNGKey(0)
    k1, k2, k3, kp = jax.random.split(key, 4)
    x = jax.random.normal(k1, (B, T, Nn, fx), jnp.float32)
    c = jax.random.normal(k2, (B, T, Nn, fc), jnp.float32)
    adj = jax.random.uniform(k3, (B, T, Nn, Nn), jnp.float32)
    adj = adj / jnp.sum(adj, axis=-1, keepdims=True)   # row-stochastic

    params = init_params(kp, input_features, hidden_features, final_features,
                         num_heads, N_blocks, n_nodes=Nn)

    fwd = jax.jit(lambda x_, a_, c_, p_: generator_forward(x_, a_, c_, p_,
                                                           num_heads))
    out = jax.block_until_ready(fwd(x, adj, c, params))

    assert out.shape == (B, T, Nn, final_features), out.shape
    assert bool(jnp.all(jnp.isfinite(out)))
    assert bool(jnp.all(jnp.abs(out) <= 1.0))          # tanh range

    ref = reference_forward(x, adj, c, params, num_heads)
    max_err = float(jnp.max(jnp.abs(out - ref)))
    assert max_err < 5e-2, max_err                     # numeric self-check

    print("KERNEL_OK")
</pallas_src>

<mosaic_0001>
module attributes {stable_mosaic.version = 11 : i64} {
  func.func @fused_dyconv_kernel(%arg0: i32, %arg1: memref<2x1x4x100xf32, #tpu.memory_space<vmem>>, %arg2: memref<2x1x100x100xf32, #tpu.memory_space<vmem>>, %arg3: memref<8x4xf32, #tpu.memory_space<vmem>>, %arg4: memref<8x1xf32, #tpu.memory_space<vmem>>, %arg5: memref<1x100xf32, #tpu.memory_space<vmem>>, %arg6: memref<1x100xf32, #tpu.memory_space<vmem>>, %arg7: memref<4x8xf32, #tpu.memory_space<vmem>>, %arg8: memref<4x1xf32, #tpu.memory_space<vmem>>, %arg9: memref<1x100xf32, #tpu.memory_space<vmem>>, %arg10: memref<1x100xf32, #tpu.memory_space<vmem>>, %arg11: memref<2x4xf32, #tpu.memory_space<vmem>>, %arg12: memref<2x1xf32, #tpu.memory_space<vmem>>, %arg13: memref<1x100xf32, #tpu.memory_space<vmem>>, %arg14: memref<1x100xf32, #tpu.memory_space<vmem>>, %arg15: memref<1x2xf32, #tpu.memory_space<vmem>>, %arg16: memref<1x1xf32, #tpu.memory_space<vmem>>, %arg17: memref<1x100xf32, #tpu.memory_space<vmem>>, %arg18: memref<1x100xf32, #tpu.memory_space<vmem>>, %arg19: memref<1x2x100xf32, #tpu.memory_space<vmem>>) attributes {dimension_semantics = [#tpu.dimension_semantics<parallel>], iteration_bounds = array<i64: 12>, scalar_prefetch = 0 : i64, scratch_operands = 0 : i64, tpu.core_type = #tpu.core_type<tc>, window_params = [{transform_indices = @transform_0, window_bounds = array<i64: 2, 1, 4, 100>}, {transform_indices = @transform_1, window_bounds = array<i64: 2, 1, 100, 100>}, {pipeline_mode = #tpu.pipeline_mode<synchronous>, transform_indices = @transform_2, window_bounds = array<i64: 8, 4>}, {pipeline_mode = #tpu.pipeline_mode<synchronous>, transform_indices = @transform_3, window_bounds = array<i64: 8, 1>}, {pipeline_mode = #tpu.pipeline_mode<synchronous>, transform_indices = @transform_4, window_bounds = array<i64: 1, 100>}, {pipeline_mode = #tpu.pipeline_mode<synchronous>, transform_indices = @transform_5, window_bounds = array<i64: 1, 100>}, {pipeline_mode = #tpu.pipeline_mode<synchronous>, transform_indices = @transform_6, window_bounds = array<i64: 4, 8>}, {pipeline_mode = #tpu.pipeline_mode<synchronous>, transform_indices = @transform_7, window_bounds = array<i64: 4, 1>}, {pipeline_mode = #tpu.pipeline_mode<synchronous>, transform_indices = @transform_8, window_bounds = array<i64: 1, 100>}, {pipeline_mode = #tpu.pipeline_mode<synchronous>, transform_indices = @transform_9, window_bounds = array<i64: 1, 100>}, {pipeline_mode = #tpu.pipeline_mode<synchronous>, transform_indices = @transform_10, window_bounds = array<i64: 2, 4>}, {pipeline_mode = #tpu.pipeline_mode<synchronous>, transform_indices = @transform_11, window_bounds = array<i64: 2, 1>}, {pipeline_mode = #tpu.pipeline_mode<synchronous>, transform_indices = @transform_12, window_bounds = array<i64: 1, 100>}, {pipeline_mode = #tpu.pipeline_mode<synchronous>, transform_indices = @transform_13, window_bounds = array<i64: 1, 100>}, {pipeline_mode = #tpu.pipeline_mode<synchronous>, transform_indices = @transform_14, window_bounds = array<i64: 1, 2>}, {pipeline_mode = #tpu.pipeline_mode<synchronous>, transform_indices = @transform_15, window_bounds = array<i64: 1, 1>}, {pipeline_mode = #tpu.pipeline_mode<synchronous>, transform_indices = @transform_16, window_bounds = array<i64: 1, 100>}, {pipeline_mode = #tpu.pipeline_mode<synchronous>, transform_indices = @transform_17, window_bounds = array<i64: 1, 100>}, {transform_indices = @transform_18, window_bounds = array<i64: 1, 2, 100>}]} {
    %c0 = arith.constant 0 : index
    %c0_0 = arith.constant 0 : index
    %c0_1 = arith.constant 0 : index
    %c0_2 = arith.constant 0 : index
    %0 = vector.load %arg2[%c0, %c0_0, %c0_1, %c0_2] : memref<2x1x100x100xf32, #tpu.memory_space<vmem>>, vector<1x1x100x100xf32>
    %1 = vector.shape_cast %0 : vector<1x1x100x100xf32> to vector<100x100xf32>
    %c1 = arith.constant 1 : index
    %c0_3 = arith.constant 0 : index
    %c0_4 = arith.constant 0 : index
    %c0_5 = arith.constant 0 : index
    %2 = vector.load %arg2[%c1, %c0_3, %c0_4, %c0_5] : memref<2x1x100x100xf32, #tpu.memory_space<vmem>>, vector<1x1x100x100xf32>
    %3 = vector.shape_cast %2 : vector<1x1x100x100xf32> to vector<100x100xf32>
    %c0_6 = arith.constant 0 : index
    %c0_7 = arith.constant 0 : index
    %c0_8 = arith.constant 0 : index
    %c0_9 = arith.constant 0 : index
    %4 = vector.load %arg1[%c0_6, %c0_7, %c0_8, %c0_9] : memref<2x1x4x100xf32, #tpu.memory_space<vmem>>, vector<1x1x4x100xf32>
    %5 = vector.shape_cast %4 : vector<1x1x4x100xf32> to vector<4x100xf32>
    %c1_10 = arith.constant 1 : index
    %c0_11 = arith.constant 0 : index
    %c0_12 = arith.constant 0 : index
    %c0_13 = arith.constant 0 : index
    %6 = vector.load %arg1[%c1_10, %c0_11, %c0_12, %c0_13] : memref<2x1x4x100xf32, #tpu.memory_space<vmem>>, vector<1x1x4x100xf32>
    %7 = vector.shape_cast %6 : vector<1x1x4x100xf32> to vector<4x100xf32>
    %c0_14 = arith.constant 0 : index
    %c0_15 = arith.constant 0 : index
    %8 = vector.load %arg3[%c0_14, %c0_15] : memref<8x4xf32, #tpu.memory_space<vmem>>, vector<8x4xf32>
    %c0_16 = arith.constant 0 : index
    %c0_17 = arith.constant 0 : index
    %9 = vector.load %arg4[%c0_16, %c0_17] : memref<8x1xf32, #tpu.memory_space<vmem>>, vector<8x1xf32>
    %c0_18 = arith.constant 0 : index
    %c0_19 = arith.constant 0 : index
    %10 = vector.load %arg5[%c0_18, %c0_19] : memref<1x100xf32, #tpu.memory_space<vmem>>, vector<1x100xf32>
    %c0_20 = arith.constant 0 : index
    %c0_21 = arith.constant 0 : index
    %11 = vector.load %arg6[%c0_20, %c0_21] : memref<1x100xf32, #tpu.memory_space<vmem>>, vector<1x100xf32>
    %cst = arith.constant dense<0.000000e+00> : vector<8x100xf32>
    %12 = tpu.matmul %8, %5, %cst {dimension_numbers = #tpu.dot_dimension_numbers<[1], [0], [0], [1], [0, 0, 1, 1], [], []>} : vector<8x4xf32>, vector<4x100xf32>, vector<8x100xf32> -> vector<8x100xf32>
    %cst_22 = arith.constant dense<0.000000e+00> : vector<8x100xf32>
    %13 = tpu.matmul %12, %1, %cst_22 {dimension_numbers = #tpu.dot_dimension_numbers<[1], [1], [0], [0], [0, 0, 1, 0], [], []>} : vector<8x100xf32>, vector<100x100xf32>, vector<8x100xf32> -> vector<8x100xf32>
    %14 = vector.broadcast %9 : vector<8x1xf32> to vector<8x100xf32>
    %15 = arith.addf %13, %14 : vector<8x100xf32>
    %cst_23 = arith.constant dense<0.000000e+00> : vector<8x100xf32>
    %16 = tpu.matmul %8, %7, %cst_23 {dimension_numbers = #tpu.dot_dimension_numbers<[1], [0], [0], [1], [0, 0, 1, 1], [], []>} : vector<8x4xf32>, vector<4x100xf32>, vector<8x100xf32> -> vector<8x100xf32>
    %cst_24 = arith.constant dense<0.000000e+00> : vector<8x100xf32>
    %17 = tpu.matmul %16, %3, %cst_24 {dimension_numbers = #tpu.dot_dimension_numbers<[1], [1], [0], [0], [0, 0, 1, 0], [], []>} : vector<8x100xf32>, vector<100x100xf32>, vector<8x100xf32> -> vector<8x100xf32>
    %18 = vector.broadcast %9 : vector<8x1xf32> to vector<8x100xf32>
    %19 = arith.addf %17, %18 : vector<8x100xf32>
    %20 = tpu.concatenate %15, %19 in 0 : vector<8x100xf32>, vector<8x100xf32> -> vector<16x100xf32>
    %cst_25 = arith.constant dense<0.000000e+00> : vector<100xf32>
    %21 = vector.multi_reduction <add>, %20, %cst_25 [0] : vector<16x100xf32> to vector<100xf32>
    %22 = vector.shape_cast %21 : vector<100xf32> to vector<1x100xf32>
    %cst_26 = arith.constant 1.600000e+01 : f32
    %23 = vector.broadcast %cst_26 : f32 to vector<1x100xf32>
    %24 = arith.divf %22, %23 : vector<1x100xf32>
    %25 = vector.broadcast %24 : vector<1x100xf32> to vector<16x100xf32>
    %26 = arith.subf %20, %25 : vector<16x100xf32>
    %27 = arith.mulf %26, %26 : vector<16x100xf32>
    %cst_27 = arith.constant dense<0.000000e+00> : vector<100xf32>
    %28 = vector.multi_reduction <add>, %27, %cst_27 [0] : vector<16x100xf32> to vector<100xf32>
    %29 = vector.shape_cast %28 : vector<100xf32> to vector<1x100xf32>
    %cst_28 = arith.constant 1.600000e+01 : f32
    %30 = vector.broadcast %cst_28 : f32 to vector<1x100xf32>
    %31 = arith.divf %29, %30 : vector<1x100xf32>
    %32 = vector.broadcast %24 : vector<1x100xf32> to vector<16x100xf32>
    %33 = arith.subf %20, %32 : vector<16x100xf32>
    %cst_29 = arith.constant 9.99999974E-6 : f32
    %34 = vector.broadcast %cst_29 : f32 to vector<1x100xf32>
    %35 = arith.addf %31, %34 : vector<1x100xf32>
    %36 = math.rsqrt %35 : vector<1x100xf32>
    %37 = vector.broadcast %36 : vector<1x100xf32> to vector<16x100xf32>
    %38 = arith.mulf %33, %37 : vector<16x100xf32>
    %39 = vector.broadcast %10 : vector<1x100xf32> to vector<16x100xf32>
    %40 = arith.mulf %38, %39 : vector<16x100xf32>
    %41 = vector.broadcast %11 : vector<1x100xf32> to vector<16x100xf32>
    %42 = arith.addf %40, %41 : vector<16x100xf32>
    %cst_30 = arith.constant 0.000000e+00 : f32
    %43 = vector.broadcast %cst_30 : f32 to vector<16x100xf32>
    %44 = arith.maximumf %42, %43 : vector<16x100xf32>
    %45 = vector.extract_strided_slice %44 {offsets = [0, 0], sizes = [8, 100], strides = [1, 1]} : vector<16x100xf32> to vector<8x100xf32>
    %46 = vector.extract_strided_slice %44 {offsets = [8, 0], sizes = [8, 100], strides = [1, 1]} : vector<16x100xf32> to vector<8x100xf32>
    %c0_31 = arith.constant 0 : index
    %c0_32 = arith.constant 0 : index
    %47 = vector.load %arg7[%c0_31, %c0_32] : memref<4x8xf32, #tpu.memory_space<vmem>>, vector<4x8xf32>
    %c0_33 = arith.constant 0 : index
    %c0_34 = arith.constant 0 : index
    %48 = vector.load %arg8[%c0_33, %c0_34] : memref<4x1xf32, #tpu.memory_space<vmem>>, vector<4x1xf32>
    %c0_35 = arith.constant 0 : index
    %c0_36 = arith.constant 0 : index
    %49 = vector.load %arg9[%c0_35, %c0_36] : memref<1x100xf32, #tpu.memory_space<vmem>>, vector<1x100xf32>
    %c0_37 = arith.constant 0 : index
    %c0_38 = arith.constant 0 : index
    %50 = vector.load %arg10[%c0_37, %c0_38] : memref<1x100xf32, #tpu.memory_space<vmem>>, vector<1x100xf32>
    %cst_39 = arith.constant dense<0.000000e+00> : vector<4x100xf32>
    %51 = tpu.matmul %47, %45, %cst_39 {dimension_numbers = #tpu.dot_dimension_numbers<[1], [0], [0], [1], [0, 0, 1, 1], [], []>} : vector<4x8xf32>, vector<8x100xf32>, vector<4x100xf32> -> vector<4x100xf32>
    %cst_40 = arith.constant dense<0.000000e+00> : vector<4x100xf32>
    %52 = tpu.matmul %51, %1, %cst_40 {dimension_numbers = #tpu.dot_dimension_numbers<[1], [1], [0], [0], [0, 0, 1, 0], [], []>} : vector<4x100xf32>, vector<100x100xf32>, vector<4x100xf32> -> vector<4x100xf32>
    %53 = vector.broadcast %48 : vector<4x1xf32> to vector<4x100xf32>
    %54 = arith.addf %52, %53 : vector<4x100xf32>
    %cst_41 = arith.constant dense<0.000000e+00> : vector<4x100xf32>
    %55 = tpu.matmul %47, %46, %cst_41 {dimension_numbers = #tpu.dot_dimension_numbers<[1], [0], [0], [1], [0, 0, 1, 1], [], []>} : vector<4x8xf32>, vector<8x100xf32>, vector<4x100xf32> -> vector<4x100xf32>
    %cst_42 = arith.constant dense<0.000000e+00> : vector<4x100xf32>
    %56 = tpu.matmul %55, %3, %cst_42 {dimension_numbers = #tpu.dot_dimension_numbers<[1], [1], [0], [0], [0, 0, 1, 0], [], []>} : vector<4x100xf32>, vector<100x100xf32>, vector<4x100xf32> -> vector<4x100xf32>
    %57 = vector.broadcast %48 : vector<4x1xf32> to vector<4x100xf32>
    %58 = arith.addf %56, %57 : vector<4x100xf32>
    %59 = tpu.concatenate %54, %58 in 0 : vector<4x100xf32>, vector<4x100xf32> -> vector<8x100xf32>
    %cst_43 = arith.constant dense<0.000000e+00> : vector<100xf32>
    %60 = vector.multi_reduction <add>, %59, %cst_43 [0] : vector<8x100xf32> to vector<100xf32>
    %61 = vector.shape_cast %60 : vector<100xf32> to vector<1x100xf32>
    %cst_44 = arith.constant 8.000000e+00 : f32
    %62 = vector.broadcast %cst_44 : f32 to vector<1x100xf32>
    %63 = arith.divf %61, %62 : vector<1x100xf32>
    %64 = vector.broadcast %63 : vector<1x100xf32> to vector<8x100xf32>
    %65 = arith.subf %59, %64 : vector<8x100xf32>
    %66 = arith.mulf %65, %65 : vector<8x100xf32>
    %cst_45 = arith.constant dense<0.000000e+00> : vector<100xf32>
    %67 = vector.multi_reduction <add>, %66, %cst_45 [0] : vector<8x100xf32> to vector<100xf32>
    %68 = vector.shape_cast %67 : vector<100xf32> to vector<1x100xf32>
    %cst_46 = arith.constant 8.000000e+00 : f32
    %69 = vector.broadcast %cst_46 : f32 to vector<1x100xf32>
    %70 = arith.divf %68, %69 : vector<1x100xf32>
    %71 = vector.broadcast %63 : vector<1x100xf32> to vector<8x100xf32>
    %72 = arith.subf %59, %71 : vector<8x100xf32>
    %cst_47 = arith.constant 9.99999974E-6 : f32
    %73 = vector.broadcast %cst_47 : f32 to vector<1x100xf32>
    %74 = arith.addf %70, %73 : vector<1x100xf32>
    %75 = math.rsqrt %74 : vector<1x100xf32>
    %76 = vector.broadcast %75 : vector<1x100xf32> to vector<8x100xf32>
    %77 = arith.mulf %72, %76 : vector<8x100xf32>
    %78 = vector.broadcast %49 : vector<1x100xf32> to vector<8x100xf32>
    %79 = arith.mulf %77, %78 : vector<8x100xf32>
    %80 = vector.broadcast %50 : vector<1x100xf32> to vector<8x100xf32>
    %81 = arith.addf %79, %80 : vector<8x100xf32>
    %cst_48 = arith.constant 0.000000e+00 : f32
    %82 = vector.broadcast %cst_48 : f32 to vector<8x100xf32>
    %83 = arith.maximumf %81, %82 : vector<8x100xf32>
    %84 = vector.extract_strided_slice %83 {offsets = [0, 0], sizes = [4, 100], strides = [1, 1]} : vector<8x100xf32> to vector<4x100xf32>
    %85 = vector.extract_strided_slice %83 {offsets = [4, 0], sizes = [4, 100], strides = [1, 1]} : vector<8x100xf32> to vector<4x100xf32>
    %c0_49 = arith.constant 0 : index
    %c0_50 = arith.constant 0 : index
    %86 = vector.load %arg11[%c0_49, %c0_50] : memref<2x4xf32, #tpu.memory_space<vmem>>, vector<2x4xf32>
    %c0_51 = arith.constant 0 : index
    %c0_52 = arith.constant 0 : index
    %87 = vector.load %arg12[%c0_51, %c0_52] : memref<2x1xf32, #tpu.memory_space<vmem>>, vector<2x1xf32>
    %c0_53 = arith.constant 0 : index
    %c0_54 = arith.constant 0 : index
    %88 = vector.load %arg13[%c0_53, %c0_54] : memref<1x100xf32, #tpu.memory_space<vmem>>, vector<1x100xf32>
    %c0_55 = arith.constant 0 : index
    %c0_56 = arith.constant 0 : index
    %89 = vector.load %arg14[%c0_55, %c0_56] : memref<1x100xf32, #tpu.memory_space<vmem>>, vector<1x100xf32>
    %cst_57 = arith.constant dense<0.000000e+00> : vector<2x100xf32>
    %90 = tpu.matmul %86, %84, %cst_57 {dimension_numbers = #tpu.dot_dimension_numbers<[1], [0], [0], [1], [0, 0, 1, 1], [], []>} : vector<2x4xf32>, vector<4x100xf32>, vector<2x100xf32> -> vector<2x100xf32>
    %cst_58 = arith.constant dense<0.000000e+00> : vector<2x100xf32>
    %91 = tpu.matmul %90, %1, %cst_58 {dimension_numbers = #tpu.dot_dimension_numbers<[1], [1], [0], [0], [0, 0, 1, 0], [], []>} : vector<2x100xf32>, vector<100x100xf32>, vector<2x100xf32> -> vector<2x100xf32>
    %92 = vector.broadcast %87 : vector<2x1xf32> to vector<2x100xf32>
    %93 = arith.addf %91, %92 : vector<2x100xf32>
    %cst_59 = arith.constant dense<0.000000e+00> : vector<2x100xf32>
    %94 = tpu.matmul %86, %85, %cst_59 {dimension_numbers = #tpu.dot_dimension_numbers<[1], [0], [0], [1], [0, 0, 1, 1], [], []>} : vector<2x4xf32>, vector<4x100xf32>, vector<2x100xf32> -> vector<2x100xf32>
    %cst_60 = arith.constant dense<0.000000e+00> : vector<2x100xf32>
    %95 = tpu.matmul %94, %3, %cst_60 {dimension_numbers = #tpu.dot_dimension_numbers<[1], [1], [0], [0], [0, 0, 1, 0], [], []>} : vector<2x100xf32>, vector<100x100xf32>, vector<2x100xf32> -> vector<2x100xf32>
    %96 = vector.broadcast %87 : vector<2x1xf32> to vector<2x100xf32>
    %97 = arith.addf %95, %96 : vector<2x100xf32>
    %98 = tpu.concatenate %93, %97 in 0 : vector<2x100xf32>, vector<2x100xf32> -> vector<4x100xf32>
    %cst_61 = arith.constant dense<0.000000e+00> : vector<100xf32>
    %99 = vector.multi_reduction <add>, %98, %cst_61 [0] : vector<4x100xf32> to vector<100xf32>
    %100 = vector.shape_cast %99 : vector<100xf32> to vector<1x100xf32>
    %cst_62 = arith.constant 4.000000e+00 : f32
    %101 = vector.broadcast %cst_62 : f32 to vector<1x100xf32>
    %102 = arith.divf %100, %101 : vector<1x100xf32>
    %103 = vector.broadcast %102 : vector<1x100xf32> to vector<4x100xf32>
    %104 = arith.subf %98, %103 : vector<4x100xf32>
    %105 = arith.mulf %104, %104 : vector<4x100xf32>
    %cst_63 = arith.constant dense<0.000000e+00> : vector<100xf32>
    %106 = vector.multi_reduction <add>, %105, %cst_63 [0] : vector<4x100xf32> to vector<100xf32>
    %107 = vector.shape_cast %106 : vector<100xf32> to vector<1x100xf32>
    %cst_64 = arith.constant 4.000000e+00 : f32
    %108 = vector.broadcast %cst_64 : f32 to vector<1x100xf32>
    %109 = arith.divf %107, %108 : vector<1x100xf32>
    %110 = vector.broadcast %102 : vector<1x100xf32> to vector<4x100xf32>
    %111 = arith.subf %98, %110 : vector<4x100xf32>
    %cst_65 = arith.constant 9.99999974E-6 : f32
    %112 = vector.broadcast %cst_65 : f32 to vector<1x100xf32>
    %113 = arith.addf %109, %112 : vector<1x100xf32>
    %114 = math.rsqrt %113 : vector<1x100xf32>
    %115 = vector.broadcast %114 : vector<1x100xf32> to vector<4x100xf32>
    %116 = arith.mulf %111, %115 : vector<4x100xf32>
    %117 = vector.broadcast %88 : vector<1x100xf32> to vector<4x100xf32>
    %118 = arith.mulf %116, %117 : vector<4x100xf32>
    %119 = vector.broadcast %89 : vector<1x100xf32> to vector<4x100xf32>
    %120 = arith.addf %118, %119 : vector<4x100xf32>
    %cst_66 = arith.constant 0.000000e+00 : f32
    %121 = vector.broadcast %cst_66 : f32 to vector<4x100xf32>
    %122 = arith.maximumf %120, %121 : vector<4x100xf32>
    %123 = vector.extract_strided_slice %122 {offsets = [0, 0], sizes = [2, 100], strides = [1, 1]} : vector<4x100xf32> to vector<2x100xf32>
    %124 = vector.extract_strided_slice %122 {offsets = [2, 0], sizes = [2, 100], strides = [1, 1]} : vector<4x100xf32> to vector<2x100xf32>
    %c0_67 = arith.constant 0 : index
    %c0_68 = arith.constant 0 : index
    %125 = vector.load %arg15[%c0_67, %c0_68] : memref<1x2xf32, #tpu.memory_space<vmem>>, vector<1x2xf32>
    %c0_69 = arith.constant 0 : index
    %c0_70 = arith.constant 0 : index
    %126 = vector.load %arg16[%c0_69, %c0_70] : memref<1x1xf32, #tpu.memory_space<vmem>>, vector<1x1xf32>
    %c0_71 = arith.constant 0 : index
    %c0_72 = arith.constant 0 : index
    %127 = vector.load %arg17[%c0_71, %c0_72] : memref<1x100xf32, #tpu.memory_space<vmem>>, vector<1x100xf32>
    %c0_73 = arith.constant 0 : index
    %c0_74 = arith.constant 0 : index
    %128 = vector.load %arg18[%c0_73, %c0_74] : memref<1x100xf32, #tpu.memory_space<vmem>>, vector<1x100xf32>
    %cst_75 = arith.constant dense<0.000000e+00> : vector<1x100xf32>
    %129 = tpu.matmul %125, %123, %cst_75 {dimension_numbers = #tpu.dot_dimension_numbers<[1], [0], [0], [1], [0, 0, 1, 1], [], []>} : vector<1x2xf32>, vector<2x100xf32>, vector<1x100xf32> -> vector<1x100xf32>
    %cst_76 = arith.constant dense<0.000000e+00> : vector<1x100xf32>
    %130 = tpu.matmul %129, %1, %cst_76 {dimension_numbers = #tpu.dot_dimension_numbers<[1], [1], [0], [0], [0, 0, 1, 0], [], []>} : vector<1x100xf32>, vector<100x100xf32>, vector<1x100xf32> -> vector<1x100xf32>
    %131 = vector.broadcast %126 : vector<1x1xf32> to vector<1x100xf32>
    %132 = arith.addf %130, %131 : vector<1x100xf32>
    %cst_77 = arith.constant dense<0.000000e+00> : vector<1x100xf32>
    %133 = tpu.matmul %125, %124, %cst_77 {dimension_numbers = #tpu.dot_dimension_numbers<[1], [0], [0], [1], [0, 0, 1, 1], [], []>} : vector<1x2xf32>, vector<2x100xf32>, vector<1x100xf32> -> vector<1x100xf32>
    %cst_78 = arith.constant dense<0.000000e+00> : vector<1x100xf32>
    %134 = tpu.matmul %133, %3, %cst_78 {dimension_numbers = #tpu.dot_dimension_numbers<[1], [1], [0], [0], [0, 0, 1, 0], [], []>} : vector<1x100xf32>, vector<100x100xf32>, vector<1x100xf32> -> vector<1x100xf32>
    %135 = vector.broadcast %126 : vector<1x1xf32> to vector<1x100xf32>
    %136 = arith.addf %134, %135 : vector<1x100xf32>
    %137 = tpu.concatenate %132, %136 in 0 : vector<1x100xf32>, vector<1x100xf32> -> vector<2x100xf32>
    %cst_79 = arith.constant dense<0.000000e+00> : vector<100xf32>
    %138 = vector.multi_reduction <add>, %137, %cst_79 [0] : vector<2x100xf32> to vector<100xf32>
    %139 = vector.shape_cast %138 : vector<100xf32> to vector<1x100xf32>
    %cst_80 = arith.constant 2.000000e+00 : f32
    %140 = vector.broadcast %cst_80 : f32 to vector<1x100xf32>
    %141 = arith.divf %139, %140 : vector<1x100xf32>
    %142 = vector.broadcast %141 : vector<1x100xf32> to vector<2x100xf32>
    %143 = arith.subf %137, %142 : vector<2x100xf32>
    %144 = arith.mulf %143, %143 : vector<2x100xf32>
    %cst_81 = arith.constant dense<0.000000e+00> : vector<100xf32>
    %145 = vector.multi_reduction <add>, %144, %cst_81 [0] : vector<2x100xf32> to vector<100xf32>
    %146 = vector.shape_cast %145 : vector<100xf32> to vector<1x100xf32>
    %cst_82 = arith.constant 2.000000e+00 : f32
    %147 = vector.broadcast %cst_82 : f32 to vector<1x100xf32>
    %148 = arith.divf %146, %147 : vector<1x100xf32>
    %149 = vector.broadcast %141 : vector<1x100xf32> to vector<2x100xf32>
    %150 = arith.subf %137, %149 : vector<2x100xf32>
    %cst_83 = arith.constant 9.99999974E-6 : f32
    %151 = vector.broadcast %cst_83 : f32 to vector<1x100xf32>
    %152 = arith.addf %148, %151 : vector<1x100xf32>
    %153 = math.rsqrt %152 : vector<1x100xf32>
    %154 = vector.broadcast %153 : vector<1x100xf32> to vector<2x100xf32>
    %155 = arith.mulf %150, %154 : vector<2x100xf32>
    %156 = vector.broadcast %127 : vector<1x100xf32> to vector<2x100xf32>
    %157 = arith.mulf %155, %156 : vector<2x100xf32>
    %158 = vector.broadcast %128 : vector<1x100xf32> to vector<2x100xf32>
    %159 = arith.addf %157, %158 : vector<2x100xf32>
    %cst_84 = arith.constant 0.000000e+00 : f32
    %160 = vector.broadcast %cst_84 : f32 to vector<2x100xf32>
    %161 = arith.maximumf %159, %160 : vector<2x100xf32>
    %162 = vector.extract_strided_slice %161 {offsets = [0, 0], sizes = [1, 100], strides = [1, 1]} : vector<2x100xf32> to vector<1x100xf32>
    %163 = vector.extract_strided_slice %161 {offsets = [1, 0], sizes = [1, 100], strides = [1, 1]} : vector<2x100xf32> to vector<1x100xf32>
    %164 = tpu.concatenate %162, %163 in 0 : vector<1x100xf32>, vector<1x100xf32> -> vector<2x100xf32>
    %c0_85 = arith.constant 0 : index
    %c0_86 = arith.constant 0 : index
    %c0_87 = arith.constant 0 : index
    %165 = vector.load %arg19[%c0_85, %c0_86, %c0_87] : memref<1x2x100xf32, #tpu.memory_space<vmem>>, vector<1x2x100xf32>
    %166 = vector.shape_cast %165 : vector<1x2x100xf32> to vector<2x100xf32>
    %167 = vector.shape_cast %164 : vector<2x100xf32> to vector<1x2x100xf32>
    tpu.vector_store %arg19[%c0_85, %c0_86, %c0_87], %167 {strides = array<i32>} : memref<1x2x100xf32, #tpu.memory_space<vmem>>, vector<1x2x100xf32>,
    return
  }
  func.func @transform_0(%arg0: i32) -> (i32, i32, i32, i32) {
    %c0_i32 = arith.constant 0 : i32
    %c0_i32_0 = arith.constant 0 : i32
    %c0_i32_1 = arith.constant 0 : i32
    %c0_i32_2 = arith.constant 0 : i32
    return %c0_i32, %arg0, %c0_i32_0, %c0_i32_1 : i32, i32, i32, i32
  }
  func.func @transform_1(%arg0: i32) -> (i32, i32, i32, i32) {
    %c0_i32 = arith.constant 0 : i32
    %c0_i32_0 = arith.constant 0 : i32
    %c0_i32_1 = arith.constant 0 : i32
    %c0_i32_2 = arith.constant 0 : i32
    return %c0_i32, %arg0, %c0_i32_0, %c0_i32_1 : i32, i32, i32, i32
  }
  func.func @transform_2(%arg0: i32) -> (i32, i32) {
    %c0_i32 = arith.constant 0 : i32
    %c0_i32_0 = arith.constant 0 : i32
    %c0_i32_1 = arith.constant 0 : i32
    return %c0_i32, %c0_i32_0 : i32, i32
  }
  func.func @transform_3(%arg0: i32) -> (i32, i32) {
    %c0_i32 = arith.constant 0 : i32
    %c0_i32_0 = arith.constant 0 : i32
    %c0_i32_1 = arith.constant 0 : i32
    return %c0_i32, %c0_i32_0 : i32, i32
  }
  func.func @transform_4(%arg0: i32) -> (i32, i32) {
    %c0_i32 = arith.constant 0 : i32
    %c0_i32_0 = arith.constant 0 : i32
    %c0_i32_1 = arith.constant 0 : i32
    return %c0_i32, %c0_i32_0 : i32, i32
  }
  func.func @transform_5(%arg0: i32) -> (i32, i32) {
    %c0_i32 = arith.constant 0 : i32
    %c0_i32_0 = arith.constant 0 : i32
    %c0_i32_1 = arith.constant 0 : i32
    return %c0_i32, %c0_i32_0 : i32, i32
  }
  func.func @transform_6(%arg0: i32) -> (i32, i32) {
    %c0_i32 = arith.constant 0 : i32
    %c0_i32_0 = arith.constant 0 : i32
    %c0_i32_1 = arith.constant 0 : i32
    return %c0_i32, %c0_i32_0 : i32, i32
  }
  func.func @transform_7(%arg0: i32) -> (i32, i32) {
    %c0_i32 = arith.constant 0 : i32
    %c0_i32_0 = arith.constant 0 : i32
    %c0_i32_1 = arith.constant 0 : i32
    return %c0_i32, %c0_i32_0 : i32, i32
  }
  func.func @transform_8(%arg0: i32) -> (i32, i32) {
    %c0_i32 = arith.constant 0 : i32
    %c0_i32_0 = arith.constant 0 : i32
    %c0_i32_1 = arith.constant 0 : i32
    return %c0_i32, %c0_i32_0 : i32, i32
  }
  func.func @transform_9(%arg0: i32) -> (i32, i32) {
    %c0_i32 = arith.constant 0 : i32
    %c0_i32_0 = arith.constant 0 : i32
    %c0_i32_1 = arith.constant 0 : i32
    return %c0_i32, %c0_i32_0 : i32, i32
  }
  func.func @transform_10(%arg0: i32) -> (i32, i32) {
    %c0_i32 = arith.constant 0 : i32
    %c0_i32_0 = arith.constant 0 : i32
    %c0_i32_1 = arith.constant 0 : i32
    return %c0_i32, %c0_i32_0 : i32, i32
  }
  func.func @transform_11(%arg0: i32) -> (i32, i32) {
    %c0_i32 = arith.constant 0 : i32
    %c0_i32_0 = arith.constant 0 : i32
    %c0_i32_1 = arith.constant 0 : i32
    return %c0_i32, %c0_i32_0 : i32, i32
  }
  func.func @transform_12(%arg0: i32) -> (i32, i32) {
    %c0_i32 = arith.constant 0 : i32
    %c0_i32_0 = arith.constant 0 : i32
    %c0_i32_1 = arith.constant 0 : i32
    return %c0_i32, %c0_i32_0 : i32, i32
  }
  func.func @transform_13(%arg0: i32) -> (i32, i32) {
    %c0_i32 = arith.constant 0 : i32
    %c0_i32_0 = arith.constant 0 : i32
    %c0_i32_1 = arith.constant 0 : i32
    return %c0_i32, %c0_i32_0 : i32, i32
  }
  func.func @transform_14(%arg0: i32) -> (i32, i32) {
    %c0_i32 = arith.constant 0 : i32
    %c0_i32_0 = arith.constant 0 : i32
    %c0_i32_1 = arith.constant 0 : i32
    return %c0_i32, %c0_i32_0 : i32, i32
  }
  func.func @transform_15(%arg0: i32) -> (i32, i32) {
    %c0_i32 = arith.constant 0 : i32
    %c0_i32_0 = arith.constant 0 : i32
    %c0_i32_1 = arith.constant 0 : i32
    return %c0_i32, %c0_i32_0 : i32, i32
  }
  func.func @transform_16(%arg0: i32) -> (i32, i32) {
    %c0_i32 = arith.constant 0 : i32
    %c0_i32_0 = arith.constant 0 : i32
    %c0_i32_1 = arith.constant 0 : i32
    return %c0_i32, %c0_i32_0 : i32, i32
  }
  func.func @transform_17(%arg0: i32) -> (i32, i32) {
    %c0_i32 = arith.constant 0 : i32
    %c0_i32_0 = arith.constant 0 : i32
    %c0_i32_1 = arith.constant 0 : i32
    return %c0_i32, %c0_i32_0 : i32, i32
  }
  func.func @transform_18(%arg0: i32) -> (i32, i32, i32) {
    %c0_i32 = arith.constant 0 : i32
    %c0_i32_0 = arith.constant 0 : i32
    %c0_i32_1 = arith.constant 0 : i32
    return %arg0, %c0_i32, %c0_i32_0 : i32, i32, i32
  }
}

module attributes {stable_mosaic.version = 11 : i64} {
  func.func @transformer_tail_kernel(%arg0: i32, %arg1: memref<2x12x100xf32, #tpu.memory_space<vmem>>, %arg2: memref<1x100xf32, #tpu.memory_space<vmem>>, %arg3: memref<1x100xf32, #tpu.memory_space<vmem>>, %arg4: memref<2x100x50xf32, #tpu.memory_space<vmem>>, %arg5: memref<2x1x50xf32, #tpu.memory_space<vmem>>, %arg6: memref<2x100x50xf32, #tpu.memory_space<vmem>>, %arg7: memref<2x1x50xf32, #tpu.memory_space<vmem>>, %arg8: memref<2x100x50xf32, #tpu.memory_space<vmem>>, %arg9: memref<2x1x50xf32, #tpu.memory_space<vmem>>, %arg10: memref<2x50x100xf32, #tpu.memory_space<vmem>>, %arg11: memref<1x100xf32, #tpu.memory_space<vmem>>, %arg12: memref<1x100xf32, #tpu.memory_space<vmem>>, %arg13: memref<1x100xf32, #tpu.memory_space<vmem>>, %arg14: memref<100x100xf32, #tpu.memory_space<vmem>>, %arg15: memref<1x100xf32, #tpu.memory_space<vmem>>, %arg16: memref<100x100xf32, #tpu.memory_space<vmem>>, %arg17: memref<1x100xf32, #tpu.memory_space<vmem>>, %arg18: memref<1x100xf32, #tpu.memory_space<vmem>>, %arg19: memref<1x100xf32, #tpu.memory_space<vmem>>, %arg20: memref<2xf32, #tpu.memory_space<smem>>, %arg21: memref<2xf32, #tpu.memory_space<smem>>, %arg22: memref<2x2x12x100xf32, #tpu.memory_space<vmem>>) attributes {dimension_semantics = [#tpu.dimension_semantics<arbitrary>], iteration_bounds = array<i64: 1>, scalar_prefetch = 0 : i64, scratch_operands = 0 : i64, tpu.core_type = #tpu.core_type<tc>, window_params = [{pipeline_mode = #tpu.pipeline_mode<synchronous>, transform_indices = @transform_0, window_bounds = array<i64: 2, 12, 100>}, {pipeline_mode = #tpu.pipeline_mode<synchronous>, transform_indices = @transform_1, window_bounds = array<i64: 1, 100>}, {pipeline_mode = #tpu.pipeline_mode<synchronous>, transform_indices = @transform_2, window_bounds = array<i64: 1, 100>}, {pipeline_mode = #tpu.pipeline_mode<synchronous>, transform_indices = @transform_3, window_bounds = array<i64: 2, 100, 50>}, {pipeline_mode = #tpu.pipeline_mode<synchronous>, transform_indices = @transform_4, window_bounds = array<i64: 2, 1, 50>}, {pipeline_mode = #tpu.pipeline_mode<synchronous>, transform_indices = @transform_5, window_bounds = array<i64: 2, 100, 50>}, {pipeline_mode = #tpu.pipeline_mode<synchronous>, transform_indices = @transform_6, window_bounds = array<i64: 2, 1, 50>}, {pipeline_mode = #tpu.pipeline_mode<synchronous>, transform_indices = @transform_7, window_bounds = array<i64: 2, 100, 50>}, {pipeline_mode = #tpu.pipeline_mode<synchronous>, transform_indices = @transform_8, window_bounds = array<i64: 2, 1, 50>}, {pipeline_mode = #tpu.pipeline_mode<synchronous>, transform_indices = @transform_9, window_bounds = array<i64: 2, 50, 100>}, {pipeline_mode = #tpu.pipeline_mode<synchronous>, transform_indices = @transform_10, window_bounds = array<i64: 1, 100>}, {pipeline_mode = #tpu.pipeline_mode<synchronous>, transform_indices = @transform_11, window_bounds = array<i64: 1, 100>}, {pipeline_mode = #tpu.pipeline_mode<synchronous>, transform_indices = @transform_12, window_bounds = array<i64: 1, 100>}, {pipeline_mode = #tpu.pipeline_mode<synchronous>, transform_indices = @transform_13, window_bounds = array<i64: 100, 100>}, {pipeline_mode = #tpu.pipeline_mode<synchronous>, transform_indices = @transform_14, window_bounds = array<i64: 1, 100>}, {pipeline_mode = #tpu.pipeline_mode<synchronous>, transform_indices = @transform_15, window_bounds = array<i64: 100, 100>}, {pipeline_mode = #tpu.pipeline_mode<synchronous>, transform_indices = @transform_16, window_bounds = array<i64: 1, 100>}, {pipeline_mode = #tpu.pipeline_mode<synchronous>, transform_indices = @transform_17, window_bounds = array<i64: 1, 100>}, {pipeline_mode = #tpu.pipeline_mode<synchronous>, transform_indices = @transform_18, window_bounds = array<i64: 1, 100>}, {transform_indices = @transform_19, window_bounds = array<i64: 2>}, {transform_indices = @transform_20, window_bounds = array<i64: 2>}, {pipeline_mode = #tpu.pipeline_mode<synchronous>, transform_indices = @transform_21, window_bounds = array<i64: 2, 2, 12, 100>}]} {
    %c0 = arith.constant 0 : index
    %c0_0 = arith.constant 0 : index
    %c0_1 = arith.constant 0 : index
    %0 = vector.load %arg1[%c0, %c0_0, %c0_1] : memref<2x12x100xf32, #tpu.memory_space<vmem>>, vector<2x12x100xf32>
    %1 = vector.shape_cast %0 : vector<2x12x100xf32> to vector<24x100xf32>
    %c0_2 = arith.constant 0 : index
    %c0_3 = arith.constant 0 : index
    %2 = vector.load %arg2[%c0_2, %c0_3] : memref<1x100xf32, #tpu.memory_space<vmem>>, vector<1x100xf32>
    %c0_4 = arith.constant 0 : index
    %c0_5 = arith.constant 0 : index
    %3 = vector.load %arg3[%c0_4, %c0_5] : memref<1x100xf32, #tpu.memory_space<vmem>>, vector<1x100xf32>
    %c0_6 = arith.constant 0 : index
    %c0_7 = arith.constant 0 : index
    %c0_8 = arith.constant 0 : index
    %4 = vector.load %arg4[%c0_6, %c0_7, %c0_8] : memref<2x100x50xf32, #tpu.memory_space<vmem>>, vector<2x100x50xf32>
    %c0_9 = arith.constant 0 : index
    %c0_10 = arith.constant 0 : index
    %c0_11 = arith.constant 0 : index
    %5 = vector.load %arg5[%c0_9, %c0_10, %c0_11] : memref<2x1x50xf32, #tpu.memory_space<vmem>>, vector<2x1x50xf32>
    %c0_12 = arith.constant 0 : index
    %c0_13 = arith.constant 0 : index
    %c0_14 = arith.constant 0 : index
    %6 = vector.load %arg6[%c0_12, %c0_13, %c0_14] : memref<2x100x50xf32, #tpu.memory_space<vmem>>, vector<2x100x50xf32>
    %c0_15 = arith.constant 0 : index
    %c0_16 = arith.constant 0 : index
    %c0_17 = arith.constant 0 : index
    %7 = vector.load %arg7[%c0_15, %c0_16, %c0_17] : memref<2x1x50xf32, #tpu.memory_space<vmem>>, vector<2x1x50xf32>
    %c0_18 = arith.constant 0 : index
    %c0_19 = arith.constant 0 : index
    %c0_20 = arith.constant 0 : index
    %8 = vector.load %arg8[%c0_18, %c0_19, %c0_20] : memref<2x100x50xf32, #tpu.memory_space<vmem>>, vector<2x100x50xf32>
    %c0_21 = arith.constant 0 : index
    %c0_22 = arith.constant 0 : index
    %c0_23 = arith.constant 0 : index
    %9 = vector.load %arg9[%c0_21, %c0_22, %c0_23] : memref<2x1x50xf32, #tpu.memory_space<vmem>>, vector<2x1x50xf32>
    %c0_24 = arith.constant 0 : index
    %c0_25 = arith.constant 0 : index
    %c0_26 = arith.constant 0 : index
    %10 = vector.load %arg10[%c0_24, %c0_25, %c0_26] : memref<2x50x100xf32, #tpu.memory_space<vmem>>, vector<2x50x100xf32>
    %c0_27 = arith.constant 0 : index
    %c0_28 = arith.constant 0 : index
    %11 = vector.load %arg11[%c0_27, %c0_28] : memref<1x100xf32, #tpu.memory_space<vmem>>, vector<1x100xf32>
    %c0_29 = arith.constant 0 : index
    %c0_30 = arith.constant 0 : index
    %12 = vector.load %arg12[%c0_29, %c0_30] : memref<1x100xf32, #tpu.memory_space<vmem>>, vector<1x100xf32>
    %c0_31 = arith.constant 0 : index
    %c0_32 = arith.constant 0 : index
    %13 = vector.load %arg13[%c0_31, %c0_32] : memref<1x100xf32, #tpu.memory_space<vmem>>, vector<1x100xf32>
    %c0_33 = arith.constant 0 : index
    %c0_34 = arith.constant 0 : index
    %14 = vector.load %arg14[%c0_33, %c0_34] : memref<100x100xf32, #tpu.memory_space<vmem>>, vector<100x100xf32>
    %c0_35 = arith.constant 0 : index
    %c0_36 = arith.constant 0 : index
    %15 = vector.load %arg15[%c0_35, %c0_36] : memref<1x100xf32, #tpu.memory_space<vmem>>, vector<1x100xf32>
    %c0_37 = arith.constant 0 : index
    %c0_38 = arith.constant 0 : index
    %16 = vector.load %arg16[%c0_37, %c0_38] : memref<100x100xf32, #tpu.memory_space<vmem>>, vector<100x100xf32>
    %c0_39 = arith.constant 0 : index
    %c0_40 = arith.constant 0 : index
    %17 = vector.load %arg17[%c0_39, %c0_40] : memref<1x100xf32, #tpu.memory_space<vmem>>, vector<1x100xf32>
    %cst = arith.constant dense<0.000000e+00> : vector<24xf32>
    %18 = vector.multi_reduction <add>, %1, %cst [1] : vector<24x100xf32> to vector<24xf32>
    %19 = vector.shape_cast %18 : vector<24xf32> to vector<24x1xf32>
    %cst_41 = arith.constant 1.000000e+02 : f32
    %20 = vector.broadcast %cst_41 : f32 to vector<24x1xf32>
    %21 = arith.divf %19, %20 : vector<24x1xf32>
    %22 = vector.broadcast %21 : vector<24x1xf32> to vector<24x100xf32>
    %23 = arith.subf %1, %22 : vector<24x100xf32>
    %24 = arith.mulf %23, %23 : vector<24x100xf32>
    %cst_42 = arith.constant dense<0.000000e+00> : vector<24xf32>
    %25 = vector.multi_reduction <add>, %24, %cst_42 [1] : vector<24x100xf32> to vector<24xf32>
    %26 = vector.shape_cast %25 : vector<24xf32> to vector<24x1xf32>
    %cst_43 = arith.constant 9.900000e+01 : f32
    %27 = vector.broadcast %cst_43 : f32 to vector<24x1xf32>
    %28 = arith.divf %26, %27 : vector<24x1xf32>
    %29 = math.sqrt %28 : vector<24x1xf32>
    %30 = vector.broadcast %21 : vector<24x1xf32> to vector<24x100xf32>
    %31 = arith.subf %1, %30 : vector<24x100xf32>
    %32 = vector.broadcast %2 : vector<1x100xf32> to vector<24x100xf32>
    %33 = arith.mulf %32, %31 : vector<24x100xf32>
    %cst_44 = arith.constant 9.99999997E-7 : f32
    %34 = vector.broadcast %cst_44 : f32 to vector<24x1xf32>
    %35 = arith.addf %29, %34 : vector<24x1xf32>
    %36 = vector.broadcast %35 : vector<24x1xf32> to vector<24x100xf32>
    %37 = arith.divf %33, %36 : vector<24x100xf32>
    %38 = vector.broadcast %3 : vector<1x100xf32> to vector<24x100xf32>
    %39 = arith.addf %37, %38 : vector<24x100xf32>
    %40 = vector.extract_strided_slice %4 {offsets = [0, 0, 0], sizes = [1, 100, 50], strides = [1, 1, 1]} : vector<2x100x50xf32> to vector<1x100x50xf32>
    %41 = vector.shape_cast %40 : vector<1x100x50xf32> to vector<100x50xf32>
    %cst_45 = arith.constant dense<0.000000e+00> : vector<24x50xf32>
    %42 = tpu.matmul %39, %41, %cst_45 {dimension_numbers = #tpu.dot_dimension_numbers<[1], [0], [0], [1], [0, 0, 1, 1], [], []>} : vector<24x100xf32>, vector<100x50xf32>, vector<24x50xf32> -> vector<24x50xf32>
    %43 = vector.extract_strided_slice %5 {offsets = [0, 0, 0], sizes = [1, 1, 50], strides = [1, 1, 1]} : vector<2x1x50xf32> to vector<1x1x50xf32>
    %44 = vector.shape_cast %43 : vector<1x1x50xf32> to vector<1x50xf32>
    %45 = vector.broadcast %44 : vector<1x50xf32> to vector<24x50xf32>
    %46 = arith.addf %42, %45 : vector<24x50xf32>
    %47 = vector.shape_cast %46 : vector<24x50xf32> to vector<2x12x50xf32>
    %48 = vector.extract_strided_slice %6 {offsets = [0, 0, 0], sizes = [1, 100, 50], strides = [1, 1, 1]} : vector<2x100x50xf32> to vector<1x100x50xf32>
    %49 = vector.shape_cast %48 : vector<1x100x50xf32> to vector<100x50xf32>
    %cst_46 = arith.constant dense<0.000000e+00> : vector<24x50xf32>
    %50 = tpu.matmul %39, %49, %cst_46 {dimension_numbers = #tpu.dot_dimension_numbers<[1], [0], [0], [1], [0, 0, 1, 1], [], []>} : vector<24x100xf32>, vector<100x50xf32>, vector<24x50xf32> -> vector<24x50xf32>
    %51 = vector.extract_strided_slice %7 {offsets = [0, 0, 0], sizes = [1, 1, 50], strides = [1, 1, 1]} : vector<2x1x50xf32> to vector<1x1x50xf32>
    %52 = vector.shape_cast %51 : vector<1x1x50xf32> to vector<1x50xf32>
    %53 = vector.broadcast %52 : vector<1x50xf32> to vector<24x50xf32>
    %54 = arith.addf %50, %53 : vector<24x50xf32>
    %55 = vector.shape_cast %54 : vector<24x50xf32> to vector<2x12x50xf32>
    %56 = vector.extract_strided_slice %8 {offsets = [0, 0, 0], sizes = [1, 100, 50], strides = [1, 1, 1]} : vector<2x100x50xf32> to vector<1x100x50xf32>
    %57 = vector.shape_cast %56 : vector<1x100x50xf32> to vector<100x50xf32>
    %cst_47 = arith.constant dense<0.000000e+00> : vector<24x50xf32>
    %58 = tpu.matmul %39, %57, %cst_47 {dimension_numbers = #tpu.dot_dimension_numbers<[1], [0], [0], [1], [0, 0, 1, 1], [], []>} : vector<24x100xf32>, vector<100x50xf32>, vector<24x50xf32> -> vector<24x50xf32>
    %59 = vector.extract_strided_slice %9 {offsets = [0, 0, 0], sizes = [1, 1, 50], strides = [1, 1, 1]} : vector<2x1x50xf32> to vector<1x1x50xf32>
    %60 = vector.shape_cast %59 : vector<1x1x50xf32> to vector<1x50xf32>
    %61 = vector.broadcast %60 : vector<1x50xf32> to vector<24x50xf32>
    %62 = arith.addf %58, %61 : vector<24x50xf32>
    %63 = vector.shape_cast %62 : vector<24x50xf32> to vector<2x12x50xf32>
    %64 = vector.extract_strided_slice %4 {offsets = [1, 0, 0], sizes = [1, 100, 50], strides = [1, 1, 1]} : vector<2x100x50xf32> to vector<1x100x50xf32>
    %65 = vector.shape_cast %64 : vector<1x100x50xf32> to vector<100x50xf32>
    %cst_48 = arith.constant dense<0.000000e+00> : vector<24x50xf32>
    %66 = tpu.matmul %39, %65, %cst_48 {dimension_numbers = #tpu.dot_dimension_numbers<[1], [0], [0], [1], [0, 0, 1, 1], [], []>} : vector<24x100xf32>, vector<100x50xf32>, vector<24x50xf32> -> vector<24x50xf32>
    %67 = vector.extract_strided_slice %5 {offsets = [1, 0, 0], sizes = [1, 1, 50], strides = [1, 1, 1]} : vector<2x1x50xf32> to vector<1x1x50xf32>
    %68 = vector.shape_cast %67 : vector<1x1x50xf32> to vector<1x50xf32>
    %69 = vector.broadcast %68 : vector<1x50xf32> to vector<24x50xf32>
    %70 = arith.addf %66, %69 : vector<24x50xf32>
    %71 = vector.shape_cast %70 : vector<24x50xf32> to vector<2x12x50xf32>
    %72 = vector.extract_strided_slice %6 {offsets = [1, 0, 0], sizes = [1, 100, 50], strides = [1, 1, 1]} : vector<2x100x50xf32> to vector<1x100x50xf32>
    %73 = vector.shape_cast %72 : vector<1x100x50xf32> to vector<100x50xf32>
    %cst_49 = arith.constant dense<0.000000e+00> : vector<24x50xf32>
    %74 = tpu.matmul %39, %73, %cst_49 {dimension_numbers = #tpu.dot_dimension_numbers<[1], [0], [0], [1], [0, 0, 1, 1], [], []>} : vector<24x100xf32>, vector<100x50xf32>, vector<24x50xf32> -> vector<24x50xf32>
    %75 = vector.extract_strided_slice %7 {offsets = [1, 0, 0], sizes = [1, 1, 50], strides = [1, 1, 1]} : vector<2x1x50xf32> to vector<1x1x50xf32>
    %76 = vector.shape_cast %75 : vector<1x1x50xf32> to vector<1x50xf32>
    %77 = vector.broadcast %76 : vector<1x50xf32> to vector<24x50xf32>
    %78 = arith.addf %74, %77 : vector<24x50xf32>
    %79 = vector.shape_cast %78 : vector<24x50xf32> to vector<2x12x50xf32>
    %80 = vector.extract_strided_slice %8 {offsets = [1, 0, 0], sizes = [1, 100, 50], strides = [1, 1, 1]} : vector<2x100x50xf32> to vector<1x100x50xf32>
    %81 = vector.shape_cast %80 : vector<1x100x50xf32> to vector<100x50xf32>
    %cst_50 = arith.constant dense<0.000000e+00> : vector<24x50xf32>
    %82 = tpu.matmul %39, %81, %cst_50 {dimension_numbers = #tpu.dot_dimension_numbers<[1], [0], [0], [1], [0, 0, 1, 1], [], []>} : vector<24x100xf32>, vector<100x50xf32>, vector<24x50xf32> -> vector<24x50xf32>
    %83 = vector.extract_strided_slice %9 {offsets = [1, 0, 0], sizes = [1, 1, 50], strides = [1, 1, 1]} : vector<2x1x50xf32> to vector<1x1x50xf32>
    %84 = vector.shape_cast %83 : vector<1x1x50xf32> to vector<1x50xf32>
    %85 = vector.broadcast %84 : vector<1x50xf32> to vector<24x50xf32>
    %86 = arith.addf %82, %85 : vector<24x50xf32>
    %87 = vector.shape_cast %86 : vector<24x50xf32> to vector<2x12x50xf32>
    %88 = vector.extract_strided_slice %47 {offsets = [0, 0, 0], sizes = [1, 12, 50], strides = [1, 1, 1]} : vector<2x12x50xf32> to vector<1x12x50xf32>
    %89 = vector.shape_cast %88 : vector<1x12x50xf32> to vector<12x50xf32>
    %90 = vector.extract_strided_slice %55 {offsets = [0, 0, 0], sizes = [1, 12, 50], strides = [1, 1, 1]} : vector<2x12x50xf32> to vector<1x12x50xf32>
    %91 = vector.shape_cast %90 : vector<1x12x50xf32> to vector<12x50xf32>
    %cst_51 = arith.constant dense<0.000000e+00> : vector<12x12xf32>
    %92 = tpu.matmul %89, %91, %cst_51 {dimension_numbers = #tpu.dot_dimension_numbers<[1], [1], [0], [0], [0, 0, 1, 0], [], []>} : vector<12x50xf32>, vector<12x50xf32>, vector<12x12xf32> -> vector<12x12xf32>
    %cst_52 = arith.constant 0.141421363 : f32
    %93 = vector.broadcast %cst_52 : f32 to vector<12x12xf32>
    %94 = arith.mulf %92, %93 : vector<12x12xf32>
    %cst_53 = arith.constant dense<0xFF800000> : vector<12xf32>
    %95 = vector.multi_reduction <maximumf>, %94, %cst_53 [1] : vector<12x12xf32> to vector<12xf32>
    %cst_54 = arith.constant 0xFF800000 : f32
    %96 = vector.broadcast %cst_54 : f32 to vector<12xf32>
    %97 = arith.maximumf %96, %95 : vector<12xf32>
    %98 = vector.shape_cast %97 : vector<12xf32> to vector<12x1xf32>
    %99 = vector.broadcast %98 : vector<12x1xf32> to vector<12x12xf32>
    %100 = arith.subf %94, %99 : vector<12x12xf32>
    %101 = math.exp %100 : vector<12x12xf32>
    %cst_55 = arith.constant dense<0.000000e+00> : vector<12xf32>
    %102 = vector.multi_reduction <add>, %101, %cst_55 [1] : vector<12x12xf32> to vector<12xf32>
    %103 = vector.shape_cast %102 : vector<12xf32> to vector<12x1xf32>
    %104 = vector.broadcast %103 : vector<12x1xf32> to vector<12x12xf32>
    %105 = arith.divf %101, %104 : vector<12x12xf32>
    %106 = vector.extract_strided_slice %63 {offsets = [0, 0, 0], sizes = [1, 12, 50], strides = [1, 1, 1]} : vector<2x12x50xf32> to vector<1x12x50xf32>
    %107 = vector.shape_cast %106 : vector<1x12x50xf32> to vector<12x50xf32>
    %cst_56 = arith.constant dense<0.000000e+00> : vector<12x50xf32>
    %108 = tpu.matmul %105, %107, %cst_56 {dimension_numbers = #tpu.dot_dimension_numbers<[1], [0], [0], [1], [0, 0, 1, 1], [], []>} : vector<12x12xf32>, vector<12x50xf32>, vector<12x50xf32> -> vector<12x50xf32>
    %109 = vector.extract_strided_slice %10 {offsets = [0, 0, 0], sizes = [1, 50, 100], strides = [1, 1, 1]} : vector<2x50x100xf32> to vector<1x50x100xf32>
    %110 = vector.shape_cast %109 : vector<1x50x100xf32> to vector<50x100xf32>
    %cst_57 = arith.constant dense<0.000000e+00> : vector<12x100xf32>
    %111 = tpu.matmul %108, %110, %cst_57 {dimension_numbers = #tpu.dot_dimension_numbers<[1], [0], [0], [1], [0, 0, 1, 1], [], []>} : vector<12x50xf32>, vector<50x100xf32>, vector<12x100xf32> -> vector<12x100xf32>
    %112 = vector.extract_strided_slice %71 {offsets = [0, 0, 0], sizes = [1, 12, 50], strides = [1, 1, 1]} : vector<2x12x50xf32> to vector<1x12x50xf32>
    %113 = vector.shape_cast %112 : vector<1x12x50xf32> to vector<12x50xf32>
    %114 = vector.extract_strided_slice %79 {offsets = [0, 0, 0], sizes = [1, 12, 50], strides = [1, 1, 1]} : vector<2x12x50xf32> to vector<1x12x50xf32>
    %115 = vector.shape_cast %114 : vector<1x12x50xf32> to vector<12x50xf32>
    %cst_58 = arith.constant dense<0.000000e+00> : vector<12x12xf32>
    %116 = tpu.matmul %113, %115, %cst_58 {dimension_numbers = #tpu.dot_dimension_numbers<[1], [1], [0], [0], [0, 0, 1, 0], [], []>} : vector<12x50xf32>, vector<12x50xf32>, vector<12x12xf32> -> vector<12x12xf32>
    %cst_59 = arith.constant 0.141421363 : f32
    %117 = vector.broadcast %cst_59 : f32 to vector<12x12xf32>
    %118 = arith.mulf %116, %117 : vector<12x12xf32>
    %cst_60 = arith.constant dense<0xFF800000> : vector<12xf32>
    %119 = vector.multi_reduction <maximumf>, %118, %cst_60 [1] : vector<12x12xf32> to vector<12xf32>
    %cst_61 = arith.constant 0xFF800000 : f32
    %120 = vector.broadcast %cst_61 : f32 to vector<12xf32>
    %121 = arith.maximumf %120, %119 : vector<12xf32>
    %122 = vector.shape_cast %121 : vector<12xf32> to vector<12x1xf32>
    %123 = vector.broadcast %122 : vector<12x1xf32> to vector<12x12xf32>
    %124 = arith.subf %118, %123 : vector<12x12xf32>
    %125 = math.exp %124 : vector<12x12xf32>
    %cst_62 = arith.constant dense<0.000000e+00> : vector<12xf32>
    %126 = vector.multi_reduction <add>, %125, %cst_62 [1] : vector<12x12xf32> to vector<12xf32>
    %127 = vector.shape_cast %126 : vector<12xf32> to vector<12x1xf32>
    %128 = vector.broadcast %127 : vector<12x1xf32> to vector<12x12xf32>
    %129 = arith.divf %125, %128 : vector<12x12xf32>
    %130 = vector.extract_strided_slice %87 {offsets = [0, 0, 0], sizes = [1, 12, 50], strides = [1, 1, 1]} : vector<2x12x50xf32> to vector<1x12x50xf32>
    %131 = vector.shape_cast %130 : vector<1x12x50xf32> to vector<12x50xf32>
    %cst_63 = arith.constant dense<0.000000e+00> : vector<12x50xf32>
    %132 = tpu.matmul %129, %131, %cst_63 {dimension_numbers = #tpu.dot_dimension_numbers<[1], [0], [0], [1], [0, 0, 1, 1], [], []>} : vector<12x12xf32>, vector<12x50xf32>, vector<12x50xf32> -> vector<12x50xf32>
    %133 = vector.extract_strided_slice %10 {offsets = [1, 0, 0], sizes = [1, 50, 100], strides = [1, 1, 1]} : vector<2x50x100xf32> to vector<1x50x100xf32>
    %134 = vector.shape_cast %133 : vector<1x50x100xf32> to vector<50x100xf32>
    %cst_64 = arith.constant dense<0.000000e+00> : vector<12x100xf32>
    %135 = tpu.matmul %132, %134, %cst_64 {dimension_numbers = #tpu.dot_dimension_numbers<[1], [0], [0], [1], [0, 0, 1, 1], [], []>} : vector<12x50xf32>, vector<50x100xf32>, vector<12x100xf32> -> vector<12x100xf32>
    %136 = arith.addf %111, %135 : vector<12x100xf32>
    %137 = vector.broadcast %11 : vector<1x100xf32> to vector<12x100xf32>
    %138 = arith.addf %136, %137 : vector<12x100xf32>
    %139 = vector.extract_strided_slice %47 {offsets = [1, 0, 0], sizes = [1, 12, 50], strides = [1, 1, 1]} : vector<2x12x50xf32> to vector<1x12x50xf32>
    %140 = vector.shape_cast %139 : vector<1x12x50xf32> to vector<12x50xf32>
    %141 = vector.extract_strided_slice %55 {offsets = [1, 0, 0], sizes = [1, 12, 50], strides = [1, 1, 1]} : vector<2x12x50xf32> to vector<1x12x50xf32>
    %142 = vector.shape_cast %141 : vector<1x12x50xf32> to vector<12x50xf32>
    %cst_65 = arith.constant dense<0.000000e+00> : vector<12x12xf32>
    %143 = tpu.matmul %140, %142, %cst_65 {dimension_numbers = #tpu.dot_dimension_numbers<[1], [1], [0], [0], [0, 0, 1, 0], [], []>} : vector<12x50xf32>, vector<12x50xf32>, vector<12x12xf32> -> vector<12x12xf32>
    %cst_66 = arith.constant 0.141421363 : f32
    %144 = vector.broadcast %cst_66 : f32 to vector<12x12xf32>
    %145 = arith.mulf %143, %144 : vector<12x12xf32>
    %cst_67 = arith.constant dense<0xFF800000> : vector<12xf32>
    %146 = vector.multi_reduction <maximumf>, %145, %cst_67 [1] : vector<12x12xf32> to vector<12xf32>
    %cst_68 = arith.constant 0xFF800000 : f32
    %147 = vector.broadcast %cst_68 : f32 to vector<12xf32>
    %148 = arith.maximumf %147, %146 : vector<12xf32>
    %149 = vector.shape_cast %148 : vector<12xf32> to vector<12x1xf32>
    %150 = vector.broadcast %149 : vector<12x1xf32> to vector<12x12xf32>
    %151 = arith.subf %145, %150 : vector<12x12xf32>
    %152 = math.exp %151 : vector<12x12xf32>
    %cst_69 = arith.constant dense<0.000000e+00> : vector<12xf32>
    %153 = vector.multi_reduction <add>, %152, %cst_69 [1] : vector<12x12xf32> to vector<12xf32>
    %154 = vector.shape_cast %153 : vector<12xf32> to vector<12x1xf32>
    %155 = vector.broadcast %154 : vector<12x1xf32> to vector<12x12xf32>
    %156 = arith.divf %152, %155 : vector<12x12xf32>
    %157 = vector.extract_strided_slice %63 {offsets = [1, 0, 0], sizes = [1, 12, 50], strides = [1, 1, 1]} : vector<2x12x50xf32> to vector<1x12x50xf32>
    %158 = vector.shape_cast %157 : vector<1x12x50xf32> to vector<12x50xf32>
    %cst_70 = arith.constant dense<0.000000e+00> : vector<12x50xf32>
    %159 = tpu.matmul %156, %158, %cst_70 {dimension_numbers = #tpu.dot_dimension_numbers<[1], [0], [0], [1], [0, 0, 1, 1], [], []>} : vector<12x12xf32>, vector<12x50xf32>, vector<12x50xf32> -> vector<12x50xf32>
    %160 = vector.extract_strided_slice %10 {offsets = [0, 0, 0], sizes = [1, 50, 100], strides = [1, 1, 1]} : vector<2x50x100xf32> to vector<1x50x100xf32>
    %161 = vector.shape_cast %160 : vector<1x50x100xf32> to vector<50x100xf32>
    %cst_71 = arith.constant dense<0.000000e+00> : vector<12x100xf32>
    %162 = tpu.matmul %159, %161, %cst_71 {dimension_numbers = #tpu.dot_dimension_numbers<[1], [0], [0], [1], [0, 0, 1, 1], [], []>} : vector<12x50xf32>, vector<50x100xf32>, vector<12x100xf32> -> vector<12x100xf32>
    %163 = vector.extract_strided_slice %71 {offsets = [1, 0, 0], sizes = [1, 12, 50], strides = [1, 1, 1]} : vector<2x12x50xf32> to vector<1x12x50xf32>
    %164 = vector.shape_cast %163 : vector<1x12x50xf32> to vector<12x50xf32>
    %165 = vector.extract_strided_slice %79 {offsets = [1, 0, 0], sizes = [1, 12, 50], strides = [1, 1, 1]} : vector<2x12x50xf32> to vector<1x12x50xf32>
    %166 = vector.shape_cast %165 : vector<1x12x50xf32> to vector<12x50xf32>
    %cst_72 = arith.constant dense<0.000000e+00> : vector<12x12xf32>
    %167 = tpu.matmul %164, %166, %cst_72 {dimension_numbers = #tpu.dot_dimension_numbers<[1], [1], [0], [0], [0, 0, 1, 0], [], []>} : vector<12x50xf32>, vector<12x50xf32>, vector<12x12xf32> -> vector<12x12xf32>
    %cst_73 = arith.constant 0.141421363 : f32
    %168 = vector.broadcast %cst_73 : f32 to vector<12x12xf32>
    %169 = arith.mulf %167, %168 : vector<12x12xf32>
    %cst_74 = arith.constant dense<0xFF800000> : vector<12xf32>
    %170 = vector.multi_reduction <maximumf>, %169, %cst_74 [1] : vector<12x12xf32> to vector<12xf32>
    %cst_75 = arith.constant 0xFF800000 : f32
    %171 = vector.broadcast %cst_75 : f32 to vector<12xf32>
    %172 = arith.maximumf %171, %170 : vector<12xf32>
    %173 = vector.shape_cast %172 : vector<12xf32> to vector<12x1xf32>
    %174 = vector.broadcast %173 : vector<12x1xf32> to vector<12x12xf32>
    %175 = arith.subf %169, %174 : vector<12x12xf32>
    %176 = math.exp %175 : vector<12x12xf32>
    %cst_76 = arith.constant dense<0.000000e+00> : vector<12xf32>
    %177 = vector.multi_reduction <add>, %176, %cst_76 [1] : vector<12x12xf32> to vector<12xf32>
    %178 = vector.shape_cast %177 : vector<12xf32> to vector<12x1xf32>
    %179 = vector.broadcast %178 : vector<12x1xf32> to vector<12x12xf32>
    %180 = arith.divf %176, %179 : vector<12x12xf32>
    %181 = vector.extract_strided_slice %87 {offsets = [1, 0, 0], sizes = [1, 12, 50], strides = [1, 1, 1]} : vector<2x12x50xf32> to vector<1x12x50xf32>
    %182 = vector.shape_cast %181 : vector<1x12x50xf32> to vector<12x50xf32>
    %cst_77 = arith.constant dense<0.000000e+00> : vector<12x50xf32>
    %183 = tpu.matmul %180, %182, %cst_77 {dimension_numbers = #tpu.dot_dimension_numbers<[1], [0], [0], [1], [0, 0, 1, 1], [], []>} : vector<12x12xf32>, vector<12x50xf32>, vector<12x50xf32> -> vector<12x50xf32>
    %184 = vector.extract_strided_slice %10 {offsets = [1, 0, 0], sizes = [1, 50, 100], strides = [1, 1, 1]} : vector<2x50x100xf32> to vector<1x50x100xf32>
    %185 = vector.shape_cast %184 : vector<1x50x100xf32> to vector<50x100xf32>
    %cst_78 = arith.constant dense<0.000000e+00> : vector<12x100xf32>
    %186 = tpu.matmul %183, %185, %cst_78 {dimension_numbers = #tpu.dot_dimension_numbers<[1], [0], [0], [1], [0, 0, 1, 1], [], []>} : vector<12x50xf32>, vector<50x100xf32>, vector<12x100xf32> -> vector<12x100xf32>
    %187 = arith.addf %162, %186 : vector<12x100xf32>
    %188 = vector.broadcast %11 : vector<1x100xf32> to vector<12x100xf32>
    %189 = arith.addf %187, %188 : vector<12x100xf32>
    %190 = tpu.concatenate %138, %189 in 0 : vector<12x100xf32>, vector<12x100xf32> -> vector<24x100xf32>
    %191 = arith.addf %1, %190 : vector<24x100xf32>
    %cst_79 = arith.constant dense<0.000000e+00> : vector<24xf32>
    %192 = vector.multi_reduction <add>, %191, %cst_79 [1] : vector<24x100xf32> to vector<24xf32>
    %193 = vector.shape_cast %192 : vector<24xf32> to vector<24x1xf32>
    %cst_80 = arith.constant 1.000000e+02 : f32
    %194 = vector.broadcast %cst_80 : f32 to vector<24x1xf32>
    %195 = arith.divf %193, %194 : vector<24x1xf32>
    %196 = vector.broadcast %195 : vector<24x1xf32> to vector<24x100xf32>
    %197 = arith.subf %191, %196 : vector<24x100xf32>
    %198 = arith.mulf %197, %197 : vector<24x100xf32>
    %cst_81 = arith.constant dense<0.000000e+00> : vector<24xf32>
    %199 = vector.multi_reduction <add>, %198, %cst_81 [1] : vector<24x100xf32> to vector<24xf32>
    %200 = vector.shape_cast %199 : vector<24xf32> to vector<24x1xf32>
    %cst_82 = arith.constant 9.900000e+01 : f32
    %201 = vector.broadcast %cst_82 : f32 to vector<24x1xf32>
    %202 = arith.divf %200, %201 : vector<24x1xf32>
    %203 = math.sqrt %202 : vector<24x1xf32>
    %204 = vector.broadcast %195 : vector<24x1xf32> to vector<24x100xf32>
    %205 = arith.subf %191, %204 : vector<24x100xf32>
    %206 = vector.broadcast %12 : vector<1x100xf32> to vector<24x100xf32>
    %207 = arith.mulf %206, %205 : vector<24x100xf32>
    %cst_83 = arith.constant 9.99999997E-7 : f32
    %208 = vector.broadcast %cst_83 : f32 to vector<24x1xf32>
    %209 = arith.addf %203, %208 : vector<24x1xf32>
    %210 = vector.broadcast %209 : vector<24x1xf32> to vector<24x100xf32>
    %211 = arith.divf %207, %210 : vector<24x100xf32>
    %212 = vector.broadcast %13 : vector<1x100xf32> to vector<24x100xf32>
    %213 = arith.addf %211, %212 : vector<24x100xf32>
    %cst_84 = arith.constant dense<0.000000e+00> : vector<24x100xf32>
    %214 = tpu.matmul %213, %14, %cst_84 {dimension_numbers = #tpu.dot_dimension_numbers<[1], [0], [0], [1], [0, 0, 1, 1], [], []>} : vector<24x100xf32>, vector<100x100xf32>, vector<24x100xf32> -> vector<24x100xf32>
    %215 = vector.broadcast %15 : vector<1x100xf32> to vector<24x100xf32>
    %216 = arith.addf %214, %215 : vector<24x100xf32>
    %cst_85 = arith.constant 0.000000e+00 : f32
    %217 = vector.broadcast %cst_85 : f32 to vector<24x100xf32>
    %218 = arith.maximumf %216, %217 : vector<24x100xf32>
    %cst_86 = arith.constant dense<0.000000e+00> : vector<24x100xf32>
    %219 = tpu.matmul %218, %16, %cst_86 {dimension_numbers = #tpu.dot_dimension_numbers<[1], [0], [0], [1], [0, 0, 1, 1], [], []>} : vector<24x100xf32>, vector<100x100xf32>, vector<24x100xf32> -> vector<24x100xf32>
    %220 = arith.addf %191, %219 : vector<24x100xf32>
    %221 = vector.broadcast %17 : vector<1x100xf32> to vector<24x100xf32>
    %222 = arith.addf %220, %221 : vector<24x100xf32>
    %c0_87 = arith.constant 0 : index
    %c0_88 = arith.constant 0 : index
    %223 = vector.load %arg18[%c0_87, %c0_88] : memref<1x100xf32, #tpu.memory_space<vmem>>, vector<1x100xf32>
    %c0_89 = arith.constant 0 : index
    %c0_90 = arith.constant 0 : index
    %224 = vector.load %arg19[%c0_89, %c0_90] : memref<1x100xf32, #tpu.memory_space<vmem>>, vector<1x100xf32>
    %cst_91 = arith.constant dense<0.000000e+00> : vector<24xf32>
    %225 = vector.multi_reduction <add>, %222, %cst_91 [1] : vector<24x100xf32> to vector<24xf32>
    %226 = vector.shape_cast %225 : vector<24xf32> to vector<24x1xf32>
    %cst_92 = arith.constant 1.000000e+02 : f32
    %227 = vector.broadcast %cst_92 : f32 to vector<24x1xf32>
    %228 = arith.divf %226, %227 : vector<24x1xf32>
    %229 = vector.broadcast %228 : vector<24x1xf32> to vector<24x100xf32>
    %230 = arith.subf %222, %229 : vector<24x100xf32>
    %231 = arith.mulf %230, %230 : vector<24x100xf32>
    %cst_93 = arith.constant dense<0.000000e+00> : vector<24xf32>
    %232 = vector.multi_reduction <add>, %231, %cst_93 [1] : vector<24x100xf32> to vector<24xf32>
    %233 = vector.shape_cast %232 : vector<24xf32> to vector<24x1xf32>
    %cst_94 = arith.constant 9.900000e+01 : f32
    %234 = vector.broadcast %cst_94 : f32 to vector<24x1xf32>
    %235 = arith.divf %233, %234 : vector<24x1xf32>
    %236 = math.sqrt %235 : vector<24x1xf32>
    %237 = vector.broadcast %228 : vector<24x1xf32> to vector<24x100xf32>
    %238 = arith.subf %222, %237 : vector<24x100xf32>
    %239 = vector.broadcast %223 : vector<1x100xf32> to vector<24x100xf32>
    %240 = arith.mulf %239, %238 : vector<24x100xf32>
    %cst_95 = arith.constant 9.99999997E-7 : f32
    %241 = vector.broadcast %cst_95 : f32 to vector<24x1xf32>
    %242 = arith.addf %236, %241 : vector<24x1xf32>
    %243 = vector.broadcast %242 : vector<24x1xf32> to vector<24x100xf32>
    %244 = arith.divf %240, %243 : vector<24x100xf32>
    %245 = vector.broadcast %224 : vector<1x100xf32> to vector<24x100xf32>
    %246 = arith.addf %244, %245 : vector<24x100xf32>
    %247 = vector.shape_cast %246 : vector<24x100xf32> to vector<2x12x100xf32>
    %c0_96 = arith.constant 0 : index
    %248 = memref.load %arg20[%c0_96] : memref<2xf32, #tpu.memory_space<smem>>
    %249 = vector.broadcast %248 : f32 to vector<2x12x100xf32>
    %250 = arith.mulf %247, %249 : vector<2x12x100xf32>
    %c0_97 = arith.constant 0 : index
    %251 = memref.load %arg21[%c0_97] : memref<2xf32, #tpu.memory_space<smem>>
    %252 = vector.broadcast %251 : f32 to vector<2x12x100xf32>
    %253 = arith.addf %250, %252 : vector<2x12x100xf32>
    %254 = math.tanh %253 : vector<2x12x100xf32>
    %c0_98 = arith.constant 0 : index
    %c0_99 = arith.constant 0 : index
    %c0_100 = arith.constant 0 : index
    %c0_101 = arith.constant 0 : index
    %255 = vector.load %arg22[%c0_98, %c0_99, %c0_100, %c0_101] : memref<2x2x12x100xf32, #tpu.memory_space<vmem>>, vector<1x2x12x100xf32>
    %256 = vector.shape_cast %255 : vector<1x2x12x100xf32> to vector<2x12x100xf32>
    %257 = vector.shape_cast %254 : vector<2x12x100xf32> to vector<1x2x12x100xf32>
    tpu.vector_store %arg22[%c0_98, %c0_99, %c0_100, %c0_101], %257 {strides = array<i32>} : memref<2x2x12x100xf32, #tpu.memory_space<vmem>>, vector<1x2x12x100xf32>,
    %c1 = arith.constant 1 : index
    %258 = memref.load %arg20[%c1] : memref<2xf32, #tpu.memory_space<smem>>
    %259 = vector.broadcast %258 : f32 to vector<2x12x100xf32>
    %260 = arith.mulf %247, %259 : vector<2x12x100xf32>
    %c1_102 = arith.constant 1 : index
    %261 = memref.load %arg21[%c1_102] : memref<2xf32, #tpu.memory_space<smem>>
    %262 = vector.broadcast %261 : f32 to vector<2x12x100xf32>
    %263 = arith.addf %260, %262 : vector<2x12x100xf32>
    %264 = math.tanh %263 : vector<2x12x100xf32>
    %c1_103 = arith.constant 1 : index
    %c0_104 = arith.constant 0 : index
    %c0_105 = arith.constant 0 : index
    %c0_106 = arith.constant 0 : index
    %265 = vector.load %arg22[%c1_103, %c0_104, %c0_105, %c0_106] : memref<2x2x12x100xf32, #tpu.memory_space<vmem>>, vector<1x2x12x100xf32>
    %266 = vector.shape_cast %265 : vector<1x2x12x100xf32> to vector<2x12x100xf32>
    %267 = vector.shape_cast %264 : vector<2x12x100xf32> to vector<1x2x12x100xf32>
    tpu.vector_store %arg22[%c1_103, %c0_104, %c0_105, %c0_106], %267 {strides = array<i32>} : memref<2x2x12x100xf32, #tpu.memory_space<vmem>>, vector<1x2x12x100xf32>,
    return
  }
  func.func @transform_0(%arg0: i32) -> (i32, i32, i32) {
    %c0_i32 = arith.constant 0 : i32
    %c0_i32_0 = arith.constant 0 : i32
    %c0_i32_1 = arith.constant 0 : i32
    %c0_i32_2 = arith.constant 0 : i32
    return %c0_i32, %c0_i32_0, %c0_i32_1 : i32, i32, i32
  }
  func.func @transform_1(%arg0: i32) -> (i32, i32) {
    %c0_i32 = arith.constant 0 : i32
    %c0_i32_0 = arith.constant 0 : i32
    %c0_i32_1 = arith.constant 0 : i32
    return %c0_i32, %c0_i32_0 : i32, i32
  }
  func.func @transform_2(%arg0: i32) -> (i32, i32) {
    %c0_i32 = arith.constant 0 : i32
    %c0_i32_0 = arith.constant 0 : i32
    %c0_i32_1 = arith.constant 0 : i32
    return %c0_i32, %c0_i32_0 : i32, i32
  }
  func.func @transform_3(%arg0: i32) -> (i32, i32, i32) {
    %c0_i32 = arith.constant 0 : i32
    %c0_i32_0 = arith.constant 0 : i32
    %c0_i32_1 = arith.constant 0 : i32
    %c0_i32_2 = arith.constant 0 : i32
    return %c0_i32, %c0_i32_0, %c0_i32_1 : i32, i32, i32
  }
  func.func @transform_4(%arg0: i32) -> (i32, i32, i32) {
    %c0_i32 = arith.constant 0 : i32
    %c0_i32_0 = arith.constant 0 : i32
    %c0_i32_1 = arith.constant 0 : i32
    %c0_i32_2 = arith.constant 0 : i32
    return %c0_i32, %c0_i32_0, %c0_i32_1 : i32, i32, i32
  }
  func.func @transform_5(%arg0: i32) -> (i32, i32, i32) {
    %c0_i32 = arith.constant 0 : i32
    %c0_i32_0 = arith.constant 0 : i32
    %c0_i32_1 = arith.constant 0 : i32
    %c0_i32_2 = arith.constant 0 : i32
    return %c0_i32, %c0_i32_0, %c0_i32_1 : i32, i32, i32
  }
  func.func @transform_6(%arg0: i32) -> (i32, i32, i32) {
    %c0_i32 = arith.constant 0 : i32
    %c0_i32_0 = arith.constant 0 : i32
    %c0_i32_1 = arith.constant 0 : i32
    %c0_i32_2 = arith.constant 0 : i32
    return %c0_i32, %c0_i32_0, %c0_i32_1 : i32, i32, i32
  }
  func.func @transform_7(%arg0: i32) -> (i32, i32, i32) {
    %c0_i32 = arith.constant 0 : i32
    %c0_i32_0 = arith.constant 0 : i32
    %c0_i32_1 = arith.constant 0 : i32
    %c0_i32_2 = arith.constant 0 : i32
    return %c0_i32, %c0_i32_0, %c0_i32_1 : i32, i32, i32
  }
  func.func @transform_8(%arg0: i32) -> (i32, i32, i32) {
    %c0_i32 = arith.constant 0 : i32
    %c0_i32_0 = arith.constant 0 : i32
    %c0_i32_1 = arith.constant 0 : i32
    %c0_i32_2 = arith.constant 0 : i32
    return %c0_i32, %c0_i32_0, %c0_i32_1 : i32, i32, i32
  }
  func.func @transform_9(%arg0: i32) -> (i32, i32, i32) {
    %c0_i32 = arith.constant 0 : i32
    %c0_i32_0 = arith.constant 0 : i32
    %c0_i32_1 = arith.constant 0 : i32
    %c0_i32_2 = arith.constant 0 : i32
    return %c0_i32, %c0_i32_0, %c0_i32_1 : i32, i32, i32
  }
  func.func @transform_10(%arg0: i32) -> (i32, i32) {
    %c0_i32 = arith.constant 0 : i32
    %c0_i32_0 = arith.constant 0 : i32
    %c0_i32_1 = arith.constant 0 : i32
    return %c0_i32, %c0_i32_0 : i32, i32
  }
  func.func @transform_11(%arg0: i32) -> (i32, i32) {
    %c0_i32 = arith.constant 0 : i32
    %c0_i32_0 = arith.constant 0 : i32
    %c0_i32_1 = arith.constant 0 : i32
    return %c0_i32, %c0_i32_0 : i32, i32
  }
  func.func @transform_12(%arg0: i32) -> (i32, i32) {
    %c0_i32 = arith.constant 0 : i32
    %c0_i32_0 = arith.constant 0 : i32
    %c0_i32_1 = arith.constant 0 : i32
    return %c0_i32, %c0_i32_0 : i32, i32
  }
  func.func @transform_13(%arg0: i32) -> (i32, i32) {
    %c0_i32 = arith.constant 0 : i32
    %c0_i32_0 = arith.constant 0 : i32
    %c0_i32_1 = arith.constant 0 : i32
    return %c0_i32, %c0_i32_0 : i32, i32
  }
  func.func @transform_14(%arg0: i32) -> (i32, i32) {
    %c0_i32 = arith.constant 0 : i32
    %c0_i32_0 = arith.constant 0 : i32
    %c0_i32_1 = arith.constant 0 : i32
    return %c0_i32, %c0_i32_0 : i32, i32
  }
  func.func @transform_15(%arg0: i32) -> (i32, i32) {
    %c0_i32 = arith.constant 0 : i32
    %c0_i32_0 = arith.constant 0 : i32
    %c0_i32_1 = arith.constant 0 : i32
    return %c0_i32, %c0_i32_0 : i32, i32
  }
  func.func @transform_16(%arg0: i32) -> (i32, i32) {
    %c0_i32 = arith.constant 0 : i32
    %c0_i32_0 = arith.constant 0 : i32
    %c0_i32_1 = arith.constant 0 : i32
    return %c0_i32, %c0_i32_0 : i32, i32
  }
  func.func @transform_17(%arg0: i32) -> (i32, i32) {
    %c0_i32 = arith.constant 0 : i32
    %c0_i32_0 = arith.constant 0 : i32
    %c0_i32_1 = arith.constant 0 : i32
    return %c0_i32, %c0_i32_0 : i32, i32
  }
  func.func @transform_18(%arg0: i32) -> (i32, i32) {
    %c0_i32 = arith.constant 0 : i32
    %c0_i32_0 = arith.constant 0 : i32
    %c0_i32_1 = arith.constant 0 : i32
    return %c0_i32, %c0_i32_0 : i32, i32
  }
  func.func @transform_19(%arg0: i32) -> i32 {
    %c0_i32 = arith.constant 0 : i32
    %c0_i32_0 = arith.constant 0 : i32
    return %c0_i32 : i32
  }
  func.func @transform_20(%arg0: i32) -> i32 {
    %c0_i32 = arith.constant 0 : i32
    %c0_i32_0 = arith.constant 0 : i32
    return %c0_i32 : i32
  }
  func.func @transform_21(%arg0: i32) -> (i32, i32, i32, i32) {
    %c0_i32 = arith.constant 0 : i32
    %c0_i32_0 = arith.constant 0 : i32
    %c0_i32_1 = arith.constant 0 : i32
    %c0_i32_2 = arith.constant 0 : i32
    %c0_i32_3 = arith.constant 0 : i32
    return %c0_i32, %c0_i32_0, %c0_i32_1, %c0_i32_2 : i32, i32, i32, i32
  }
}

</mosaic_0001>

<bundles_post_ra>
// kernel: _lambda_.2
= control target key start
LH: loop header
LB: loop body
LE: loop exit
PB: predicated region body
PF: predicated region fallthrough
CT: control target
= control target key end

     0   :  { %s3789_s0 = inlined_call_operand.vmem [shape: f32[2,12,4,100], index: 0, kind: input, shape index: {}]   ;;  %s3790_s1 = inlined_call_operand.vmem [shape: f32[2,12,100,100], index: 1, kind: input, shape index: {}]   ;;  %s3791_s2 = inlined_call_operand.vmem [shape: f32[8,4], index: 2, kind: input, shape index: {}]   ;;  %s3792_s3 = inlined_call_operand.vmem [shape: f32[8,1], index: 3, kind: input, shape index: {}]   ;;  %s3793_s4 = inlined_call_operand.vmem [shape: f32[1,100], index: 4, kind: input, shape index: {}]   ;;  %s3794_s5 = inlined_call_operand.vmem [shape: f32[1,100], index: 5, kind: input, shape index: {}]   ;;  %s3795_s6 = inlined_call_operand.vmem [shape: f32[4,8], index: 6, kind: input, shape index: {}]   ;;  %s3796_s7 = inlined_call_operand.vmem [shape: f32[4,1], index: 7, kind: input, shape index: {}]   ;;  %s3797_s8 = inlined_call_operand.vmem [shape: f32[1,100], index: 8, kind: input, shape index: {}]   ;;  %s3798_s9 = inlined_call_operand.vmem [shape: f32[1,100], index: 9, kind: input, shape index: {}]   ;;  %s3799_s10 = inlined_call_operand.vmem [shape: f32[2,4], index: 10, kind: input, shape index: {}]   ;;  %s3800_s11 = inlined_call_operand.vmem [shape: f32[2,1], index: 11, kind: input, shape index: {}]   ;;  %s3801_s12 = inlined_call_operand.vmem [shape: f32[1,100], index: 12, kind: input, shape index: {}]   ;;  %s3802_s13 = inlined_call_operand.vmem [shape: f32[1,100], index: 13, kind: input, shape index: {}]   ;;  %s3803_s14 = inlined_call_operand.vmem [shape: f32[1,2], index: 14, kind: input, shape index: {}]   ;;  %s3804_s15 = inlined_call_operand.<no memory space> [shape: f32[1,1], index: 15, kind: input, shape index: {}]   ;;  %s3805_s16 = inlined_call_operand.vmem [shape: f32[1,100], index: 16, kind: input, shape index: {}]   ;;  %s3806_s17 = inlined_call_operand.vmem [shape: f32[1,100], index: 17, kind: input, shape index: {}]   ;;  %s3807_s18 = inlined_call_operand.vmem [shape: f32[12,2,100], index: 18, kind: output, shape index: {}]  }
   0x1   :  { %3810 = sst [smem:[#allocation7_spill]] %s3789_s0  ;;  %v23_v0 = vstv %s3804_s15 }
   0x2   :  { %3811 = sst [smem:[#allocation8_spill]] %s3790_s1  ;;  %24 = vst [vmem:[#allocation2] sm:$0x1] %v23_v0 }
   0x3   :  { %3812 = sst [smem:[#allocation9_spill]] %s3791_s2 }
   0x4   :  { %3813 = sst [smem:[#allocation10_spill]] %s3806_s17 }
   0x5   :  { %3814 = sst [smem:[#allocation11_spill]] %s3807_s18 }
   0x6   :  { %s3274_s29 = smov 0   ;;  %s3276_s30 = smov 0  }
   0x7   :  { %s3278_s0 = smov 0  }
   0x8 LB: > { %s3291_s19 = sadd.s32 1, %s3170_s0   ;;  %s37_s20 = sadd.s32 1, %s3166_s30  ;;  %s3170_s0 = sphi %s3278_s0, %s3827_s0   ;;  %s3166_s30 = sphi %s3276_s30, %s3830_s30   ;;  %s3162_s29 = sphi %s3274_s29, %s3829_s29  }
   0x9   : > { %3815 = sst [smem:[#allocation5_spill]] %s3291_s19  ;;  %s34_s1 = ssub.s32 %s3170_s0, %s3291_s19 }
   0xa   : > { %p35_p0 = scmp.eq.s32.totalorder %s34_s1, 0  ;;  %p44_p1 = scmp.ne.s32.totalorder %s3166_s30, %s3162_s29 }
   0xb   : > { %p45_p2 = scmp.eq.s32.totalorder %s3170_s0, 0  ;;  %p2358_p4 = scmp.ge.s32.totalorder %s3170_s0, 12 }
   0xc   : > { %s3300_s21 = scalar_select %p35_p0, %s3166_s30, %s37_s20  }
   0xd   : > { %p3302_p3 = por %p45_p2, %p44_p1  ;;  %506 = sbr.rel (%p2358_p4) target bundleno = 53 (0x35), region = 80 }
   0xe   : > { %3816 = sst [smem:[#allocation6_spill]] %s3300_s21 }
  0x14   : > { %509 = sbr.rel (!%p3302_p3) target bundleno = 31 (0x1f), region = 84  ;;  %s511_s2 = sand.u32 (%p3302_p3), 1, %s3166_s30  }
  0x15   : > { %s2360_s23 = sshll.u32 (%p3302_p3), %s3170_s0, 2  ;;  %s2359_s24 = sshll.u32 (%p3302_p3), %s511_s2, 3 }
  0x16   : > { %s3818_s27 = sld [smem:[#allocation7_spill]] (%p3302_p3)  ;;  %s513_s1 = scalar_lea.vmem (%p3302_p3), [#allocation3], %s2359_s24 }
  0x1c   : > { %s515_s28 = scalar_lea.vmem %s3818_s27, %s2360_s23 }
  0x1d   : > { %v531_v1 = vld [vmem:[%s515_s28] sm:$0xf]  ;;  %v533_v2 = vld [vmem:[%s515_s28 + $0x30] sm:$0xf] }
  0x1e   : > { %532 = vst [vmem:[%s513_s1] sm:$0xf] %v531_v1  ;;  %534 = vst [vmem:[%s513_s1 + $0x4] sm:$0xf] %v533_v2 }
  0x1f PF: > { %561 = sbr.rel (!%p3302_p3) target bundleno = 53 (0x35), region = 125  ;;  %s563_s20 = sand.u32 (%p3302_p3), 1, %s3166_s30  }
  0x20   : > { %s3108_s15 = smul.u32 (%p3302_p3), 104, %s3170_s0  ;;  %s3819_s18 = sld [smem:[#allocation8_spill]] (%p3302_p3) }
  0x21   : > { %s3107_s21 = smul.u32 (%p3302_p3), 208, %s563_s20 }
  0x23   : > { %s3326_s22 = scalar_lea.vmem (%p3302_p3), [#allocation4], %s3107_s21 }
  0x26   : > { %s3321_s17 = scalar_lea.vmem %s3819_s18, %s3108_s15 }
  0x27   : > { %v646_v3 = vld [vmem:[%s3321_s17] sm:$0xff]  ;;  %v648_v4 = vld [vmem:[%s3321_s17 + $0x8] sm:$0xff]  ;;  %v650_v5 = vld [vmem:[%s3321_s17 + $0x10] sm:$0xff] }
  0x28   : > { %647 = vst [vmem:[%s3326_s22] sm:$0xff] %v646_v3  ;;  %649 = vst [vmem:[%s3326_s22 + $0x8] sm:$0xff] %v648_v4  ;;  %v652_v6 = vld [vmem:[%s3321_s17 + $0x18] sm:$0xff]  ;;  %v654_v7 = vld [vmem:[%s3321_s17 + $0x20] sm:$0xff] }
  0x29   : > { %651 = vst [vmem:[%s3326_s22 + $0x10] sm:$0xff] %v650_v5  ;;  %v656_v8 = vld [vmem:[%s3321_s17 + $0x28] sm:$0xff]  ;;  %653 = vst [vmem:[%s3326_s22 + $0x18] sm:$0xff] %v652_v6  ;;  %v658_v9 = vld [vmem:[%s3321_s17 + $0x30] sm:$0xff] }
  0x2a   : > { %655 = vst [vmem:[%s3326_s22 + $0x20] sm:$0xff] %v654_v7  ;;  %657 = vst [vmem:[%s3326_s22 + $0x28] sm:$0xff] %v656_v8  ;;  %v660_v10 = vld [vmem:[%s3321_s17 + $0x38] sm:$0xff]  ;;  %v662_v11 = vld [vmem:[%s3321_s17 + $0x40] sm:$0xff] }
  0x2b   : > { %659 = vst [vmem:[%s3326_s22 + $0x30] sm:$0xff] %v658_v9  ;;  %661 = vst [vmem:[%s3326_s22 + $0x38] sm:$0xff] %v660_v10  ;;  %v664_v12 = vld [vmem:[%s3321_s17 + $0x48] sm:$0xff]  ;;  %v666_v13 = vld [vmem:[%s3321_s17 + $0x50] sm:$0xff] }
  0x2c   : > { %663 = vst [vmem:[%s3326_s22 + $0x40] sm:$0xff] %v662_v11  ;;  %v668_v14 = vld [vmem:[%s3321_s17 + $0x58] sm:$0xff]  ;;  %665 = vst [vmem:[%s3326_s22 + $0x48] sm:$0xff] %v664_v12  ;;  %v670_v15 = vld [vmem:[%s3321_s17 + $0x60] sm:$0xff] }
  0x2d   : > { %667 = vst [vmem:[%s3326_s22 + $0x50] sm:$0xff] %v666_v13  ;;  %669 = vst [vmem:[%s3326_s22 + $0x58] sm:$0xff] %v668_v14  ;;  %v672_v16 = vld [vmem:[%s3321_s17 + $0x4e0] sm:$0xff]  ;;  %v674_v17 = vld [vmem:[%s3321_s17 + $0x4e8] sm:$0xff] }
  0x2e   : > { %671 = vst [vmem:[%s3326_s22 + $0x60] sm:$0xff] %v670_v15  ;;  %673 = vst [vmem:[%s3326_s22 + $0x68] sm:$0xff] %v672_v16  ;;  %v676_v18 = vld [vmem:[%s3321_s17 + $0x4f0] sm:$0xff]  ;;  %v678_v19 = vld [vmem:[%s3321_s17 + $0x4f8] sm:$0xff] }
  0x2f   : > { %675 = vst [vmem:[%s3326_s22 + $0x70] sm:$0xff] %v674_v17  ;;  %v680_v20 = vld [vmem:[%s3321_s17 + $0x500] sm:$0xff]  ;;  %677 = vst [vmem:[%s3326_s22 + $0x78] sm:$0xff] %v676_v18  ;;  %v682_v21 = vld [vmem:[%s3321_s17 + $0x508] sm:$0xff] }
  0x30   : > { %679 = vst [vmem:[%s3326_s22 + $0x80] sm:$0xff] %v678_v19  ;;  %681 = vst [vmem:[%s3326_s22 + $0x88] sm:$0xff] %v680_v20  ;;  %v684_v22 = vld [vmem:[%s3321_s17 + $0x510] sm:$0xff]  ;;  %v686_v23 = vld [vmem:[%s3321_s17 + $0x518] sm:$0xff] }
  0x31   : > { %683 = vst [vmem:[%s3326_s22 + $0x90] sm:$0xff] %v682_v21  ;;  %685 = vst [vmem:[%s3326_s22 + $0x98] sm:$0xff] %v684_v22  ;;  %v688_v24 = vld [vmem:[%s3321_s17 + $0x520] sm:$0xff]  ;;  %v690_v25 = vld [vmem:[%s3321_s17 + $0x528] sm:$0xff] }
  0x32   : > { %687 = vst [vmem:[%s3326_s22 + $0xa0] sm:$0xff] %v686_v23  ;;  %v692_v26 = vld [vmem:[%s3321_s17 + $0x530] sm:$0xff]  ;;  %689 = vst [vmem:[%s3326_s22 + $0xa8] sm:$0xff] %v688_v24  ;;  %v694_v27 = vld [vmem:[%s3321_s17 + $0x538] sm:$0xff] }
  0x33   : > { %691 = vst [vmem:[%s3326_s22 + $0xb0] sm:$0xff] %v690_v25  ;;  %693 = vst [vmem:[%s3326_s22 + $0xb8] sm:$0xff] %v692_v26  ;;  %v696_v28 = vld [vmem:[%s3321_s17 + $0x540] sm:$0xff] }
  0x34   : > { %695 = vst [vmem:[%s3326_s22 + $0xc0] sm:$0xff] %v694_v27  ;;  %697 = vst [vmem:[%s3326_s22 + $0xc8] sm:$0xff] %v696_v28 }
  0x35 PF: > { %p2362_p5 = scmp.ge.s32.totalorder %s3170_s0, 1  ;;  %p702_p6 = scmp.lt.s32.totalorder %s3170_s0, 13 }
  0x37   : > { %p703_p7 = pnand %p2362_p5, %p702_p6 }
  0x38   : > { %s709_s18 = sand.u32 (!%p703_p7), 1, %s3162_s29   ;;  %v3172_v29 = vmov (!%p703_p7), 0.0   ;;  %vm814_vm0 = vcmask (!%p703_p7), 1043456   ;;  %vm3173_vm1 = vmmov (!%p703_p7), 0   ;;  %s3820_s23 = sld [smem:[#allocation9_spill]] (!%p703_p7)  ;;  %vm810_vm2 = vcmask (!%p703_p7), 31744  }
  0x39   : > { %706 = sbr.rel (%p703_p7) target bundleno = 2008 (0x7d8), region = 163  ;;  %2643 = vmatprep.subr.mxu1 (!%p703_p7), %v3172_v29  ;;  %2677 = vmatprep.subr.mxu0 (!%p703_p7), %v3172_v29  ;;  %s2363_s15 = sshll.u32 (!%p703_p7), %s709_s18, 3  ;;  %vm893_vm3 = vcmask (!%p703_p7), 818176   ;;  %v3174_v37 = vmov (!%p703_p7), 0.0|0.0   ;;  %v807_v9 = vld [vmem:[%s3792_s3] sm:$0xff] (!%p703_p7)  ;;  %v3175_v10 = vmov (!%p703_p7), 0  }
  0x3a   : > { %s3109_s19 = smul.u32 (!%p703_p7), 208, %s709_s18  ;;  %2645 = vmatprep.mubr.msk.f32.mxu1 (!%p703_p7), %vm3173_vm1, %v3172_v29  ;;  %2679 = vmatprep.mubr.msk.f32.mxu0 (!%p703_p7), %vm3173_vm1, %v3172_v29  ;;  %s711_s29 = scalar_lea.vmem (!%p703_p7), [#allocation3], %s2363_s15  ;;  %vm3411_vm4 = vmpackc.low (!%p703_p7), %vm893_vm3, %vm893_vm3  ;;  %v1239_v11 = vld [vmem:[%s3796_s7] sm:$0xf] (!%p703_p7)  ;;  %vm1242_vm5 = vcmask (!%p703_p7), 64512   ;;  %vm1885_vm6 = vcmask (!%p703_p7), 1041408  }
  0x3b   : > { %v803_v31 = vld [vmem:[%s711_s29] sm:$0xf] (!%p703_p7)  ;;  %v2378_v32 = vld [vmem:[%s711_s29 + $0x4] sm:$0xf] (!%p703_p7)  ;;  %3138 = vset.pattern.permute.xlu0 (!%p703_p7), %v3175_v10  ;;  %3139 = vset.pattern.permute.xlu1 (!%p703_p7), %v3175_v10  ;;  %vm1887_vm7 = vcmask (!%p703_p7), 814080   ;;  %vm1929_vm8 = vcmask (!%p703_p7), 15360  }
  0x3c   : > { %2644 = vmatpush3.msk.msra.mxu1 (!%p703_p7), %vm814_vm0, %v803_v31  ;;  %2678 = vmatpush3.msk.msra.mxu0 (!%p703_p7), %vm814_vm0, %v2378_v32  ;;  %s3391_s24 = scalar_lea.vmem (!%p703_p7), [#allocation4], %s3109_s19  ;;  %vm2237_vm9 = vcmask (!%p703_p7), 1040384   ;;  %vm2239_vm10 = vcmask (!%p703_p7), 812032   ;;  %s3823_s18 = sadd.s32 (!%p703_p7), 4294967295, %s3170_s0  }
  0x3d   : > { %v776_v33 = vld [vmem:[%s3391_s24] sm:$0xff] (!%p703_p7)  ;;  %v777_v34 = vld [vmem:[%s3391_s24 + $0x8] sm:$0xff] (!%p703_p7)  ;;  %v2366_v36 = vld [vmem:[%s3391_s24 + $0x70] sm:$0xff] (!%p703_p7)  ;;  %2915 = vmatprep.subr.bf16.mxu1 (!%p703_p7), %v3174_v37  ;;  %2939 = vmatprep.subr.bf16.mxu0 (!%p703_p7), %v3174_v37  ;;  %p772_p8 = scmp.lt.s32.totalorder (!%p703_p7), %s3823_s18, 11  ;;  %s3824_s15 = smov (!%p703_p7), %s3823_s18 }
  0x3e   : > { %v806_v30 = vld [vmem:[%s3820_s23] sm:$0xff] (!%p703_p7)  ;;  %v3401_v38 = vpack.c.bf16 (!%p703_p7), %v777_v34, %v776_v33  ;;  %v3507_v8 = vld [vmem:[%s3391_s24 + $0xc8] sm:$0xf] (!%p703_p7)  ;;  %890 = vperm.xlu0 (!%p703_p7), %3138, %v807_v9   ;;  %s3825_s29 = sld [smem:[#allocation10_spill]] (!%p703_p7)  ;;  %s3826_s27 = sld [smem:[#allocation11_spill]] (!%p703_p7) }
  0x3f   : > { %v2365_v35 = vld [vmem:[%s3391_s24 + $0x68] sm:$0xff] (!%p703_p7)  ;;  %2646 = vmatmul.mubr.msk.f32.vlgmr.msra.gmra.mrb[0].mxu1 (!%p703_p7), %vm810_vm2, %v806_v30  ;;  %2680 = vmatmul.mubr.msk.f32.vlgmr.msra.gmra.mrb[0].mxu0 (!%p703_p7), %vm810_vm2, %v806_v30  ;;  %v778_v41 = vld [vmem:[%s3391_s24 + $0x10] sm:$0xff] (!%p703_p7)  ;;  %v779_v42 = vld [vmem:[%s3391_s24 + $0x18] sm:$0xff] (!%p703_p7) }
  0x40   : > { %v3403_v39 = vpack.c.bf16 %v2366_v36, %v2365_v35  ;;  %2674 = vmatprep.mubr.msk.f32.mxu1 %vm3173_vm1, %v3172_v29  ;;  %2708 = vmatprep.mubr.msk.f32.mxu0 %vm3173_vm1, %v3172_v29  ;;  %v2367_v43 = vld [vmem:[%s3391_s24 + $0x78] sm:$0xff]  ;;  %v2368_v44 = vld [vmem:[%s3391_s24 + $0x80] sm:$0xff]  ;;  %v3427_v45 = vpack.c.bf16 %v779_v42, %v778_v41  ;;  %v781_v48 = vld [vmem:[%s3391_s24 + $0x28] sm:$0xff]  ;;  %s3832_s15 = smov (!%p772_p8, %s3824_s15), 11 }
  0x41   : > { %v3429_v46 = vpack.c.bf16 %v2368_v44, %v2367_v43  ;;  %v780_v47 = vld [vmem:[%s3391_s24 + $0x20] sm:$0xff]  ;;  %v2369_v49 = vld [vmem:[%s3391_s24 + $0x88] sm:$0xff]  ;;  %v2370_v50 = vld [vmem:[%s3391_s24 + $0x90] sm:$0xff] }
  0x42   : > { %v3443_v51 = vpack.c.bf16 %v781_v48, %v780_v47  ;;  %v3445_v52 = vpack.c.bf16 %v2370_v50, %v2369_v49  ;;  %v782_v53 = vld [vmem:[%s3391_s24 + $0x30] sm:$0xff]  ;;  %v783_v54 = vld [vmem:[%s3391_s24 + $0x38] sm:$0xff]  ;;  %v2372_v56 = vld [vmem:[%s3391_s24 + $0xa0] sm:$0xff]  ;;  %1318 = vperm.xlu0 %3138, %v1239_v11  }
  0x43   : > { %2918 = vmatpush3.bf16.xpose.msk.msra.mxu1 %vm3411_vm4, %v3401_v38  ;;  %2942 = vmatpush3.bf16.xpose.msk.msra.mxu0 %vm3411_vm4, %v3403_v39  ;;  %v2371_v55 = vld [vmem:[%s3391_s24 + $0x98] sm:$0xff]  ;;  %v3459_v57 = vpack.c.bf16 %v783_v54, %v782_v53  ;;  %v784_v59 = vld [vmem:[%s3391_s24 + $0x40] sm:$0xff]  ;;  %v785_v60 = vld [vmem:[%s3391_s24 + $0x48] sm:$0xff] }
  0x44   : > { %2919 = vmatprep.subr.bf16.mxu1 %v3174_v37  ;;  %2943 = vmatprep.subr.bf16.mxu0 %v3174_v37  ;;  %v3461_v58 = vpack.c.bf16 %v2372_v56, %v2371_v55  ;;  %v2373_v61 = vld [vmem:[%s3391_s24 + $0xa8] sm:$0xff]  ;;  %v2374_v62 = vld [vmem:[%s3391_s24 + $0xb0] sm:$0xff]  ;;  %v3475_v63 = vpack.c.bf16 %v785_v60, %v784_v59  ;;  %v787_v2 = vld [vmem:[%s3391_s24 + $0x58] sm:$0xff] }
  0x45   : > { %v3477_v0 = vpack.c.bf16 %v2374_v62, %v2373_v61  ;;  %v786_v1 = vld [vmem:[%s3391_s24 + $0x50] sm:$0xff]  ;;  %v2375_v3 = vld [vmem:[%s3391_s24 + $0xb8] sm:$0xff]  ;;  %v2376_v4 = vld [vmem:[%s3391_s24 + $0xc0] sm:$0xff] }
  0x46   : > { %v3491_v5 = vpack.c.bf16 %v787_v2, %v786_v1  ;;  %v3493_v6 = vpack.c.bf16 %v2376_v4, %v2375_v3  ;;  %v3504_v7 = vld [vmem:[%s3391_s24 + $0x60] sm:$0xf]  ;;  %v2411_v60 = vld [vmem:[%s3793_s4] ss:$0 sm:$0xff]  ;;  %s2364_s24 = sshll.u32 %s3832_s15, 1 }
  0x47   : > { %v2412_v1 = vld [vmem:[%s3794_s5] ss:$0 sm:$0xff]  ;;  %s775_s28 = scalar_lea.vmem %s3826_s27, %s2364_s24 }
  0x4b   : > { %2922 = vmatpush3.bf16.xpose.msk.msra.mxu1 %vm3411_vm4, %v3427_v45  ;;  %2946 = vmatpush3.bf16.xpose.msk.msra.mxu0 %vm3411_vm4, %v3429_v46 }
  0x4c   : > { %2923 = vmatprep.subr.bf16.mxu1 %v3174_v37  ;;  %2947 = vmatprep.subr.bf16.mxu0 %v3174_v37 }
  0x53   : > { %2926 = vmatpush3.bf16.xpose.msk.msra.mxu1 %vm3411_vm4, %v3443_v51  ;;  %2950 = vmatpush3.bf16.xpose.msk.msra.mxu0 %vm3411_vm4, %v3445_v52 }
  0x54   : > { %2927 = vmatprep.subr.bf16.mxu1 %v3174_v37  ;;  %2951 = vmatprep.subr.bf16.mxu0 %v3174_v37 }
  0x5b   : > { %2930 = vmatpush3.bf16.xpose.msk.msra.mxu1 %vm3411_vm4, %v3459_v57  ;;  %2954 = vmatpush3.bf16.xpose.msk.msra.mxu0 %vm3411_vm4, %v3461_v58 }
  0x5c   : > { %2931 = vmatprep.subr.bf16.mxu1 %v3174_v37  ;;  %2955 = vmatprep.subr.bf16.mxu0 %v3174_v37 }
  0x63   : > { %2934 = vmatpush3.bf16.xpose.msk.msra.mxu1 %vm3411_vm4, %v3475_v63  ;;  %2958 = vmatpush3.bf16.xpose.msk.msra.mxu0 %vm3411_vm4, %v3477_v0 }
  0x64   : > { %2935 = vmatprep.subr.bf16.mxu1 %v3174_v37  ;;  %2959 = vmatprep.subr.bf16.mxu0 %v3174_v37 }
  0x6b   : > { %2938 = vmatpush3.bf16.xpose.msk.msra.mxu1 %vm3411_vm4, %v3491_v5  ;;  %2962 = vmatpush3.bf16.xpose.msk.msra.mxu0 %vm3411_vm4, %v3493_v6 }
  0x6c   : > { %2672 = vmatprep.subr.mxu1 %v3172_v29  ;;  %2706 = vmatprep.subr.mxu0 %v3172_v29 }
  0x73   : > { %2673 = vmatpush3.xpose.msk.msra.mxu1 %vm893_vm3, %v3504_v7  ;;  %2707 = vmatpush3.xpose.msk.msra.mxu0 %vm893_vm3, %v3507_v8 }
  0x74   : > { %2711 = vmatprep.subr.mxu1 %v3172_v29  ;;  %2745 = vmatprep.subr.mxu0 %v3172_v29 }
  0xbd   : > { %v891_v16 = vpop.permute.xlu0 %890 }
 0x112   : > { %v884_v12 = vpop.f32.mrb[0].mxu1  ;;  %v1075_v13 = vpop.f32.mrb[0].mxu0 }
 0x113   : > { %v2647_v14 = vpop.f32.mrb[1].mxu1  ;;  %2675 = vmatmul.mubr.msk.f32.vlgmr.msra.gmra.mrb[2].mxu1 %vm893_vm3, %v884_v12  ;;  %v2681_v15 = vpop.f32.mrb[1].mxu0  ;;  %2709 = vmatmul.mubr.msk.f32.vlgmr.msra.gmra.mrb[2].mxu0 %vm893_vm3, %v1075_v13  ;;  %v1238_v12 = vld [vmem:[%s3795_s6] sm:$0xf] }
 0x114   : > { %2713 = vmatprep.mubr.msk.f32.mxu1 %vm3173_vm1, %v3172_v29  ;;  %2747 = vmatprep.mubr.msk.f32.mxu0 %vm3173_vm1, %v3172_v29 }
 0x1e6   : > { %v1002_v17 = vpop.f32.mrb[2].mxu1  ;;  %v1187_v18 = vpop.f32.mrb[2].mxu0 }
 0x1e7   : > { %v1003_v19 = vadd.f32 %v1002_v17, %v891_v16  ;;  %v1188_v20 = vadd.f32 %v1187_v18, %v891_v16  ;;  %v2676_v21 = vpop.f32.mrb[3].mxu1  ;;  %v2710_v22 = vpop.f32.mrb[3].mxu0 }
 0x1e8   : > { %v1319_v17 = vpop.permute.xlu0 %1318 }
 0x1e9   : > { %v1191_v23 = vsel %vm893_vm3, %v1003_v19, 0.0  ;;  %v1192_v24 = vsel %vm893_vm3, %v1188_v20, 0.0 }
 0x1ea   : > { %v1193_v25 = vadd.f32 %v1192_v24, %v1191_v23 }
 0x1ec   : > { %v1194_v26 = vrot.slane %v1193_v25, 4 }
 0x1ee   : > { %v1195_v27 = vadd.f32 %v1194_v26, %v1193_v25 }
 0x1f0   : > { %v1196_v28 = vrot.slane %v1195_v27, 2 }
 0x1f2   : > { %v1197_v30 = vadd.f32 %v1196_v28, %v1195_v27 }
 0x1f4   : > { %v1198_v31 = vrot.slane %v1197_v30, 1 }
 0x1f6   : > { %v1199_v32 = vadd.f32 %v1198_v31, %v1197_v30 }
 0x1f8   : > { %v1201_v33 = vmul.f32 0.0625, %v1199_v32 }
 0x1fa   : > { %v1202_v34 = vsub.f32 %v1003_v19, %v1201_v33  ;;  %v1203_v35 = vsub.f32 %v1188_v20, %v1201_v33 }
 0x1fc   : > { %v1204_v36 = vmul.f32 %v1202_v34, %v1202_v34  ;;  %v1205_v41 = vmul.f32 %v1203_v35, %v1203_v35 }
 0x1fe   : > { %v1206_v42 = vsel %vm893_vm3, %v1204_v36, 0.0  ;;  %v1207_v43 = vsel %vm893_vm3, %v1205_v41, 0.0 }
 0x1ff   : > { %v1208_v44 = vadd.f32 %v1207_v43, %v1206_v42 }
 0x201   : > { %v1209_v47 = vrot.slane %v1208_v44, 4 }
 0x203   : > { %v1210_v48 = vadd.f32 %v1209_v47, %v1208_v44 }
 0x205   : > { %v1211_v49 = vrot.slane %v1210_v48, 2 }
 0x207   : > { %v1212_v50 = vadd.f32 %v1211_v49, %v1210_v48 }
 0x209   : > { %v1213_v53 = vrot.slane %v1212_v50, 1 }
 0x20b   : > { %v1214_v54 = vadd.f32 %v1213_v53, %v1212_v50 }
 0x20d   : > { %v1215_v55 = vmul.f32 0.0625, %v1214_v54 }
 0x20f   : > { %v1216_v56 = vadd.f32 1e-05, %v1215_v55  ;;  %v2443_v55 = vld [vmem:[%s3797_s8] ss:$0 sm:$0xff] }
 0x211   : > { %3140 = vrsqrt.f32 %v1216_v56 }
 0x21b   : > { %v3141_v59 = vpop.eup %3140 }
 0x21c   : > { %v1218_v61 = vmul.f32 %v3141_v59, %v1202_v34  ;;  %v1219_v62 = vmul.f32 %v3141_v59, %v1203_v35  ;;  %v2444_v59 = vld [vmem:[%s3798_s9] ss:$0 sm:$0xff] }
 0x21e   : > { %v1226_v2 = vmul.f32 %v2411_v60, %v1218_v61  ;;  %v1227_v3 = vmul.f32 %v2411_v60, %v1219_v62 }
 0x220   : > { %v1234_v4 = vadd.f32 %v2412_v1, %v1226_v2  ;;  %v1235_v9 = vadd.f32 %v2412_v1, %v1227_v3  ;;  %v1578_v1 = vld [vmem:[%s3799_s10] sm:$0x3] }
 0x221   : > { %v1579_v3 = vld [vmem:[%s3800_s11] sm:$0x3] }
 0x222   : > { %v1236_v10 = vmax.f32 %v1234_v4, 0.0  ;;  %v1237_v11 = vmax.f32 %v1235_v9, 0.0  ;;  %1660 = vperm.xlu1 %3139, %v1579_v3   ;;  %v1926_v4 = vld [vmem:[#allocation2] sm:$0x1] }
 0x224   : > { %2712 = vmatpush3.msra.mxu1 %v1236_v10  ;;  %2746 = vmatpush3.msra.mxu0 %v1237_v11 }
 0x225   : > { %2714 = vmatmul.mubr.msk.f32.vlgmr.msra.gmra.mrb[4].mxu1 %vm1242_vm5, %v1238_v12  ;;  %2748 = vmatmul.mubr.msk.f32.vlgmr.msra.gmra.mrb[4].mxu0 %vm1242_vm5, %v1238_v12 }
 0x226   : > { %2963 = vmatprep.subr.bf16.mxu1 %v3174_v37  ;;  %2987 = vmatprep.subr.bf16.mxu0 %v3174_v37 }
 0x227   : > { %2742 = vmatprep.mubr.msk.f32.mxu1 %vm3173_vm1, %v3172_v29  ;;  %2776 = vmatprep.mubr.msk.f32.mxu0 %vm3173_vm1, %v3172_v29 }
 0x228   : > { %2008 = vperm.xlu1 %3139, %v1926_v4  }
 0x22b   : > { %2966 = vmatpush3.bf16.xpose.msk.msra.mxu1 %vm3411_vm4, %v3401_v38  ;;  %2990 = vmatpush3.bf16.xpose.msk.msra.mxu0 %vm3411_vm4, %v3403_v39 }
 0x22c   : > { %2967 = vmatprep.subr.bf16.mxu1 %v3174_v37  ;;  %2991 = vmatprep.subr.bf16.mxu0 %v3174_v37 }
 0x233   : > { %2970 = vmatpush3.bf16.xpose.msk.msra.mxu1 %vm3411_vm4, %v3427_v45  ;;  %2994 = vmatpush3.bf16.xpose.msk.msra.mxu0 %vm3411_vm4, %v3429_v46 }
 0x234   : > { %2971 = vmatprep.subr.bf16.mxu1 %v3174_v37  ;;  %2995 = vmatprep.subr.bf16.mxu0 %v3174_v37 }
 0x23b   : > { %2974 = vmatpush3.bf16.xpose.msk.msra.mxu1 %vm3411_vm4, %v3443_v51  ;;  %2998 = vmatpush3.bf16.xpose.msk.msra.mxu0 %vm3411_vm4, %v3445_v52 }
 0x23c   : > { %2975 = vmatprep.subr.bf16.mxu1 %v3174_v37  ;;  %2999 = vmatprep.subr.bf16.mxu0 %v3174_v37 }
 0x243   : > { %2978 = vmatpush3.bf16.xpose.msk.msra.mxu1 %vm3411_vm4, %v3459_v57  ;;  %3002 = vmatpush3.bf16.xpose.msk.msra.mxu0 %vm3411_vm4, %v3461_v58 }
 0x244   : > { %2979 = vmatprep.subr.bf16.mxu1 %v3174_v37  ;;  %3003 = vmatprep.subr.bf16.mxu0 %v3174_v37 }
 0x24b   : > { %2982 = vmatpush3.bf16.xpose.msk.msra.mxu1 %vm3411_vm4, %v3475_v63  ;;  %3006 = vmatpush3.bf16.xpose.msk.msra.mxu0 %vm3411_vm4, %v3477_v0 }
 0x24c   : > { %2983 = vmatprep.subr.bf16.mxu1 %v3174_v37  ;;  %3007 = vmatprep.subr.bf16.mxu0 %v3174_v37 }
 0x253   : > { %2986 = vmatpush3.bf16.xpose.msk.msra.mxu1 %vm3411_vm4, %v3491_v5  ;;  %3010 = vmatpush3.bf16.xpose.msk.msra.mxu0 %vm3411_vm4, %v3493_v6 }
 0x254   : > { %2740 = vmatprep.subr.mxu1 %v3172_v29  ;;  %2774 = vmatprep.subr.mxu0 %v3172_v29 }
 0x25b   : > { %2741 = vmatpush3.xpose.msk.msra.mxu1 %vm893_vm3, %v3504_v7  ;;  %2775 = vmatpush3.xpose.msk.msra.mxu0 %vm893_vm3, %v3507_v8 }
 0x25c   : > { %2779 = vmatprep.subr.mxu1 %v3172_v29  ;;  %2813 = vmatprep.subr.mxu0 %v3172_v29 }
 0x2f8   : > { %v1312_v13 = vpop.f32.mrb[4].mxu1  ;;  %v1460_v14 = vpop.f32.mrb[4].mxu0 }
 0x2f9   : > { %2743 = vmatmul.mubr.msk.f32.vlgmr.msra.gmra.mrb[6].mxu1 %vm893_vm3, %v1312_v13  ;;  %v2749_v15 = vpop.f32.mrb[5].mxu0  ;;  %2777 = vmatmul.mubr.msk.f32.vlgmr.msra.gmra.mrb[6].mxu0 %vm893_vm3, %v1460_v14  ;;  %v2715_v16 = vpop.f32.mrb[5].mxu1 }
 0x2fa   : > { %2781 = vmatprep.mubr.msk.f32.mxu1 %vm3173_vm1, %v3172_v29  ;;  %2815 = vmatprep.mubr.msk.f32.mxu0 %vm3173_vm1, %v3172_v29  ;;  %v1661_v15 = vpop.permute.xlu1 %1660 }
 0x3cc   : > { %v1390_v18 = vpop.f32.mrb[6].mxu1  ;;  %v1533_v19 = vpop.f32.mrb[6].mxu0 }
 0x3cd   : > { %v1534_v20 = vadd.f32 %v1533_v19, %v1319_v17  ;;  %v2778_v21 = vpop.f32.mrb[7].mxu0  ;;  %v2744_v22 = vpop.f32.mrb[7].mxu1  ;;  %v1391_v23 = vadd.f32 %v1390_v18, %v1319_v17 }
 0x3cf   : > { %v1538_v24 = vrot.slane %v1534_v20, 4 }
 0x3d1   : > { %v1540_v25 = vsel %vm814_vm0, %v1391_v23, %v1538_v24 }
 0x3d2   : > { %v1541_v26 = vsel %vm893_vm3, %v1540_v25, 0.0 }
 0x3d3   : > { %v1542_v27 = vrot.slane %v1541_v26, 4 }
 0x3d5   : > { %v1543_v28 = vadd.f32 %v1542_v27, %v1541_v26 }
 0x3d7   : > { %v1544_v30 = vrot.slane %v1543_v28, 2 }
 0x3d9   : > { %v1545_v31 = vadd.f32 %v1544_v30, %v1543_v28 }
 0x3db   : > { %v1546_v32 = vrot.slane %v1545_v31, 1 }
 0x3dd   : > { %v1547_v33 = vadd.f32 %v1546_v32, %v1545_v31 }
 0x3df   : > { %v1549_v34 = vmul.f32 0.125, %v1547_v33 }
 0x3e1   : > { %v1550_v35 = vsub.f32 %v1540_v25, %v1549_v34 }
 0x3e3   : > { %v1551_v36 = vmul.f32 %v1550_v35, %v1550_v35 }
 0x3e5   : > { %v1552_v41 = vsel %vm893_vm3, %v1551_v36, 0.0 }
 0x3e6   : > { %v1553_v42 = vrot.slane %v1552_v41, 4 }
 0x3e8   : > { %v1554_v43 = vadd.f32 %v1553_v42, %v1552_v41 }
 0x3ea   : > { %v1555_v44 = vrot.slane %v1554_v43, 2 }
 0x3ec   : > { %v1556_v47 = vadd.f32 %v1555_v44, %v1554_v43 }
 0x3ee   : > { %v1557_v48 = vrot.slane %v1556_v47, 1 }
 0x3f0   : > { %v1558_v49 = vadd.f32 %v1557_v48, %v1556_v47 }
 0x3f2   : > { %v1559_v50 = vmul.f32 0.125, %v1558_v49  ;;  %v2477_v49 = vld [vmem:[%s3801_s12] ss:$0 sm:$0xff] }
 0x3f4   : > { %v1560_v53 = vadd.f32 1e-05, %v1559_v50 }
 0x3f6   : > { %3142 = vrsqrt.f32 %v1560_v53  ;;  %v2478_v53 = vld [vmem:[%s3802_s13] ss:$0 sm:$0xff] }
 0x400   : > { %v3143_v54 = vpop.eup %3142 }
 0x401   : > { %v1562_v56 = vmul.f32 %v3143_v54, %v1550_v35 }
 0x403   : > { %v1569_v60 = vmul.f32 %v2443_v55, %v1562_v56 }
 0x405   : > { %v1576_v61 = vadd.f32 %v2444_v59, %v1569_v60  ;;  %v1925_v59 = vld [vmem:[%s3803_s14] sm:$0x1] }
 0x407   : > { %v1577_v62 = vmax.f32 %v1576_v61, 0.0 }
 0x409   : > { %2780 = vmatpush3.msk.msra.mxu1 %vm814_vm0, %v1577_v62  ;;  %v1736_v2 = vrot.slane %v1577_v62, 4 }
 0x40a   : > { %2782 = vmatmul.mubr.msk.f32.vlgmr.msra.gmra.mrb[8].mxu1 %vm810_vm2, %v1578_v1  ;;  %3011 = vmatprep.subr.bf16.mxu1 %v3174_v37 }
 0x40b   : > { %2814 = vmatpush3.msk.msra.mxu0 %vm814_vm0, %v1736_v2  ;;  %2810 = vmatprep.mubr.msk.f32.mxu1 %vm3173_vm1, %v3172_v29 }
 0x40c   : > { %2816 = vmatmul.mubr.msk.f32.vlgmr.msra.gmra.mrb[8].mxu0 %vm810_vm2, %v1578_v1  ;;  %3035 = vmatprep.subr.bf16.mxu0 %v3174_v37 }
 0x40d   : > { %2844 = vmatprep.mubr.msk.f32.mxu0 %vm3173_vm1, %v3172_v29 }
 0x410   : > { %3014 = vmatpush3.bf16.xpose.msk.msra.mxu1 %vm3411_vm4, %v3401_v38 }
 0x411   : > { %3015 = vmatprep.subr.bf16.mxu1 %v3174_v37 }
 0x412   : > { %3038 = vmatpush3.bf16.xpose.msk.msra.mxu0 %vm3411_vm4, %v3403_v39 }
 0x413   : > { %3039 = vmatprep.subr.bf16.mxu0 %v3174_v37 }
 0x418   : > { %3018 = vmatpush3.bf16.xpose.msk.msra.mxu1 %vm3411_vm4, %v3427_v45 }
 0x419   : > { %3019 = vmatprep.subr.bf16.mxu1 %v3174_v37 }
 0x41a   : > { %3042 = vmatpush3.bf16.xpose.msk.msra.mxu0 %vm3411_vm4, %v3429_v46 }
 0x41b   : > { %3043 = vmatprep.subr.bf16.mxu0 %v3174_v37 }
 0x420   : > { %3022 = vmatpush3.bf16.xpose.msk.msra.mxu1 %vm3411_vm4, %v3443_v51 }
 0x421   : > { %3023 = vmatprep.subr.bf16.mxu1 %v3174_v37 }
 0x422   : > { %3046 = vmatpush3.bf16.xpose.msk.msra.mxu0 %vm3411_vm4, %v3445_v52 }
 0x423   : > { %3047 = vmatprep.subr.bf16.mxu0 %v3174_v37 }
 0x428   : > { %3026 = vmatpush3.bf16.xpose.msk.msra.mxu1 %vm3411_vm4, %v3459_v57 }
 0x429   : > { %3027 = vmatprep.subr.bf16.mxu1 %v3174_v37 }
 0x42a   : > { %3050 = vmatpush3.bf16.xpose.msk.msra.mxu0 %vm3411_vm4, %v3461_v58 }
 0x42b   : > { %3051 = vmatprep.subr.bf16.mxu0 %v3174_v37 }
 0x430   : > { %3030 = vmatpush3.bf16.xpose.msk.msra.mxu1 %vm3411_vm4, %v3475_v63 }
 0x431   : > { %3031 = vmatprep.subr.bf16.mxu1 %v3174_v37 }
 0x432   : > { %3054 = vmatpush3.bf16.xpose.msk.msra.mxu0 %vm3411_vm4, %v3477_v0 }
 0x433   : > { %3055 = vmatprep.subr.bf16.mxu0 %v3174_v37 }
 0x438   : > { %3034 = vmatpush3.bf16.xpose.msk.msra.mxu1 %vm3411_vm4, %v3491_v5 }
 0x439   : > { %2808 = vmatprep.subr.mxu1 %v3172_v29 }
 0x43a   : > { %3058 = vmatpush3.bf16.xpose.msk.msra.mxu0 %vm3411_vm4, %v3493_v6 }
 0x43b   : > { %2842 = vmatprep.subr.mxu0 %v3172_v29 }
 0x440   : > { %2809 = vmatpush3.xpose.msk.msra.mxu1 %vm893_vm3, %v3504_v7 }
 0x441   : > { %2847 = vmatprep.subr.mxu1 %v3172_v29 }
 0x442   : > { %2843 = vmatpush3.xpose.msk.msra.mxu0 %vm893_vm3, %v3507_v8 }
 0x443   : > { %2881 = vmatprep.subr.mxu0 %v3172_v29 }
 0x4dd   : > { %v1654_v9 = vpop.f32.mrb[8].mxu1 }
 0x4de   : > { %2811 = vmatmul.mubr.msk.f32.vlgmr.msra.gmra.mrb[10].mxu1 %vm893_vm3, %v1654_v9  ;;  %v2783_v10 = vpop.f32.mrb[9].mxu1 }
 0x4df   : > { %v1805_v11 = vpop.f32.mrb[8].mxu0  ;;  %2849 = vmatprep.mubr.msk.f32.mxu1 %vm3173_vm1, %v3172_v29 }
 0x4e0   : > { %v2817_v12 = vpop.f32.mrb[9].mxu0  ;;  %2845 = vmatmul.mubr.msk.f32.vlgmr.msra.gmra.mrb[10].mxu0 %vm893_vm3, %v1805_v11 }
 0x4e1   : > { %2883 = vmatprep.mubr.msk.f32.mxu0 %vm3173_vm1, %v3172_v29 }
 0x5b1   : > { %v1732_v13 = vpop.f32.mrb[10].mxu1 }
 0x5b2   : > { %v2812_v14 = vpop.f32.mrb[11].mxu1  ;;  %v1733_v19 = vadd.f32 %v1732_v13, %v1661_v15 }
 0x5b3   : > { %v1878_v16 = vpop.f32.mrb[10].mxu0 }
 0x5b4   : > { %v1879_v17 = vadd.f32 %v1878_v16, %v1661_v15  ;;  %v2846_v18 = vpop.f32.mrb[11].mxu0 }
 0x5b6   : > { %v1883_v20 = vrot.slane %v1879_v17, 6 }
 0x5b8   : > { %v1886_v21 = vsel %vm1885_vm6, %v1733_v19, %v1883_v20 }
 0x5b9   : > { %v1888_v22 = vsel %vm1887_vm7, %v1886_v21, 0.0 }
 0x5ba   : > { %v1889_v23 = vrot.slane %v1888_v22, 4 }
 0x5bc   : > { %v1890_v24 = vadd.f32 %v1889_v23, %v1888_v22  ;;  %v2511_v23 = vld [vmem:[%s3805_s16] ss:$0 sm:$0xff] }
 0x5be   : > { %v1891_v25 = vrot.slane %v1890_v24, 2 }
 0x5c0   : > { %v1892_v26 = vadd.f32 %v1891_v25, %v1890_v24  ;;  %v2512_v25 = vld [vmem:[%s3825_s29] ss:$0 sm:$0xff] }
 0x5c2   : > { %v1893_v27 = vrot.slane %v1892_v26, 1 }
 0x5c4   : > { %v1894_v28 = vadd.f32 %v1893_v27, %v1892_v26 }
 0x5c6   : > { %v1896_v30 = vmul.f32 0.25, %v1894_v28 }
 0x5c8   : > { %v1897_v31 = vsub.f32 %v1886_v21, %v1896_v30 }
 0x5ca   : > { %v1898_v32 = vmul.f32 %v1897_v31, %v1897_v31 }
 0x5cc   : > { %v1899_v33 = vsel %vm1887_vm7, %v1898_v32, 0.0 }
 0x5cd   : > { %v1900_v34 = vrot.slane %v1899_v33, 4 }
 0x5cf   : > { %v1901_v35 = vadd.f32 %v1900_v34, %v1899_v33 }
 0x5d1   : > { %v1902_v36 = vrot.slane %v1901_v35, 2 }
 0x5d3   : > { %v1903_v41 = vadd.f32 %v1902_v36, %v1901_v35 }
 0x5d5   : > { %v1904_v42 = vrot.slane %v1903_v41, 1 }
 0x5d7   : > { %v1905_v43 = vadd.f32 %v1904_v42, %v1903_v41 }
 0x5d9   : > { %v1906_v44 = vmul.f32 0.25, %v1905_v43 }
 0x5db   : > { %v1907_v47 = vadd.f32 1e-05, %v1906_v44 }
 0x5dd   : > { %3144 = vrsqrt.f32 %v1907_v47 }
 0x5e7   : > { %v3145_v48 = vpop.eup %3144 }
 0x5e8   : > { %v1909_v50 = vmul.f32 %v3145_v48, %v1897_v31 }
 0x5ea   : > { %v1916_v54 = vmul.f32 %v2477_v49, %v1909_v50 }
 0x5ec   : > { %v1923_v55 = vadd.f32 %v2478_v53, %v1916_v54 }
 0x5ee   : > { %v1924_v56 = vmax.f32 %v1923_v55, 0.0 }
 0x5f0   : > { %2848 = vmatpush3.msk.msra.mxu1 %vm1885_vm6, %v1924_v56  ;;  %v2088_v60 = vrot.slane %v1924_v56, 2 }
 0x5f1   : > { %2850 = vmatmul.mubr.msk.f32.vlgmr.msra.gmra.mrb[12].mxu1 %vm1929_vm8, %v1925_v59  ;;  %3059 = vmatprep.subr.bf16.mxu1 %v3174_v37 }
 0x5f2   : > { %2882 = vmatpush3.msk.msra.mxu0 %vm1885_vm6, %v2088_v60  ;;  %2878 = vmatprep.mubr.msk.f32.mxu1 %vm3173_vm1, %v3172_v29 }
 0x5f3   : > { %2884 = vmatmul.mubr.msk.f32.vlgmr.msra.gmra.mrb[12].mxu0 %vm1929_vm8, %v1925_v59  ;;  %3083 = vmatprep.subr.bf16.mxu0 %v3174_v37 }
 0x5f4   : > { %2912 = vmatprep.mubr.msk.f32.mxu0 %vm3173_vm1, %v3172_v29 }
 0x5f7   : > { %3062 = vmatpush3.bf16.xpose.msk.msra.mxu1 %vm3411_vm4, %v3401_v38 }
 0x5f8   : > { %3063 = vmatprep.subr.bf16.mxu1 %v3174_v37 }
 0x5f9   : > { %3086 = vmatpush3.bf16.xpose.msk.msra.mxu0 %vm3411_vm4, %v3403_v39 }
 0x5fa   : > { %3087 = vmatprep.subr.bf16.mxu0 %v3174_v37 }
 0x5ff   : > { %3066 = vmatpush3.bf16.xpose.msk.msra.mxu1 %vm3411_vm4, %v3427_v45 }
 0x600   : > { %3067 = vmatprep.subr.bf16.mxu1 %v3174_v37 }
 0x601   : > { %3090 = vmatpush3.bf16.xpose.msk.msra.mxu0 %vm3411_vm4, %v3429_v46  ;;  %v2011_v46 = vlaneseq }
 0x602   : > { %3091 = vmatprep.subr.bf16.mxu0 %v3174_v37 }
 0x607   : > { %3070 = vmatpush3.bf16.xpose.msk.msra.mxu1 %vm3411_vm4, %v3443_v51  ;;  %v2012_v51 = vshrl.u32 %v2011_v46, 7 }
 0x608   : > { %3071 = vmatprep.subr.bf16.mxu1 %v3174_v37 }
 0x609   : > { %3094 = vmatpush3.bf16.xpose.msk.msra.mxu0 %vm3411_vm4, %v3445_v52  ;;  %v2013_v40 = vsub.s32 0, %v2012_v51  ;;  %v2009_v52 = vpop.permute.xlu1 %2008 }
 0x60a   : > { %3095 = vmatprep.subr.bf16.mxu0 %v3174_v37 }
 0x60f   : > { %3074 = vmatpush3.bf16.xpose.msk.msra.mxu1 %vm3411_vm4, %v3459_v57 }
 0x610   : > { %3075 = vmatprep.subr.bf16.mxu1 %v3174_v37 }
 0x611   : > { %3098 = vmatpush3.bf16.xpose.msk.msra.mxu0 %vm3411_vm4, %v3461_v58 }
 0x612   : > { %3099 = vmatprep.subr.bf16.mxu0 %v3174_v37 }
 0x617   : > { %3078 = vmatpush3.bf16.xpose.msk.msra.mxu1 %vm3411_vm4, %v3475_v63 }
 0x618   : > { %3079 = vmatprep.subr.bf16.mxu1 %v3174_v37 }
 0x619   : > { %3102 = vmatpush3.bf16.xpose.msk.msra.mxu0 %vm3411_vm4, %v3477_v0 }
 0x61a   : > { %3103 = vmatprep.subr.bf16.mxu0 %v3174_v37 }
 0x61f   : > { %3082 = vmatpush3.bf16.xpose.msk.msra.mxu1 %vm3411_vm4, %v3491_v5 }
 0x620   : > { %2876 = vmatprep.subr.mxu1 %v3172_v29 }
 0x621   : > { %3106 = vmatpush3.bf16.xpose.msk.msra.mxu0 %vm3411_vm4, %v3493_v6 }
 0x622   : > { %2910 = vmatprep.subr.mxu0 %v3172_v29  ;;  %v2014_v29 = vrot.slane %v2009_v52, %v2013_v40 }
 0x627   : > { %2877 = vmatpush3.xpose.msk.msra.mxu1 %vm893_vm3, %v3504_v7 }
 0x629   : > { %2911 = vmatpush3.xpose.msk.msra.mxu0 %vm893_vm3, %v3507_v8 }
 0x6c4   : > { %v2002_v38 = vpop.f32.mrb[12].mxu1 }
 0x6c5   : > { %2879 = vmatmul.mubr.msk.f32.vlgmr.msra.gmra.mrb[14].mxu1 %vm893_vm3, %v2002_v38  ;;  %v2851_v37 = vpop.f32.mrb[13].mxu1 }
 0x6c6   : > { %v2157_v39 = vpop.f32.mrb[12].mxu0 }
 0x6c7   : > { %2913 = vmatmul.mubr.msk.f32.vlgmr.msra.gmra.mrb[14].mxu0 %vm893_vm3, %v2157_v39  ;;  %v2885_v45 = vpop.f32.mrb[13].mxu0 }
 0x798   : > { %v2084_v57 = vpop.f32.mrb[14].mxu1 }
 0x799   : > { %v2880_v58 = vpop.f32.mrb[15].mxu1  ;;  %v2085_v6 = vadd.f32 %v2084_v57, %v2014_v29 }
 0x79a   : > { %v2230_v63 = vpop.f32.mrb[14].mxu0 }
 0x79b   : > { %v2231_v0 = vadd.f32 %v2230_v63, %v2014_v29  ;;  %v2914_v5 = vpop.f32.mrb[15].mxu0 }
 0x79d   : > { %v2235_v7 = vrot.slane %v2231_v0, 7 }
 0x79f   : > { %v2238_v8 = vsel %vm2237_vm9, %v2085_v6, %v2235_v7 }
 0x7a0   : > { %v2240_v61 = vsel %vm2239_vm10, %v2238_v8, 0.0 }
 0x7a1   : > { %v2241_v62 = vrot.slane %v2240_v61, 4 }
 0x7a3   : > { %v2242_v1 = vadd.f32 %v2241_v62, %v2240_v61 }
 0x7a5   : > { %v2243_v2 = vrot.slane %v2242_v1, 2 }
 0x7a7   : > { %v2244_v3 = vadd.f32 %v2243_v2, %v2242_v1 }
 0x7a9   : > { %v2245_v4 = vrot.slane %v2244_v3, 1 }
 0x7ab   : > { %v2246_v9 = vadd.f32 %v2245_v4, %v2244_v3 }
 0x7ad   : > { %v2248_v10 = vmul.f32 0.5, %v2246_v9 }
 0x7af   : > { %v2249_v11 = vsub.f32 %v2238_v8, %v2248_v10 }
 0x7b1   : > { %v2250_v12 = vmul.f32 %v2249_v11, %v2249_v11 }
 0x7b3   : > { %v2251_v13 = vsel %vm2239_vm10, %v2250_v12, 0.0 }
 0x7b4   : > { %v2252_v14 = vrot.slane %v2251_v13, 4 }
 0x7b6   : > { %v2253_v15 = vadd.f32 %v2252_v14, %v2251_v13 }
 0x7b8   : > { %v2254_v16 = vrot.slane %v2253_v15, 2 }
 0x7ba   : > { %v2255_v17 = vadd.f32 %v2254_v16, %v2253_v15 }
 0x7bc   : > { %v2256_v18 = vrot.slane %v2255_v17, 1 }
 0x7be   : > { %v2257_v19 = vadd.f32 %v2256_v18, %v2255_v17 }
 0x7c0   : > { %v2258_v20 = vmul.f32 0.5, %v2257_v19 }
 0x7c2   : > { %v2259_v21 = vadd.f32 1e-05, %v2258_v20 }
 0x7c4   : > { %3146 = vrsqrt.f32 %v2259_v21 }
 0x7ce   : > { %v3147_v22 = vpop.eup %3146 }
 0x7cf   : > { %v2261_v24 = vmul.f32 %v3147_v22, %v2249_v11 }
 0x7d1   : > { %v2268_v26 = vmul.f32 %v2511_v23, %v2261_v24 }
 0x7d3   : > { %v2275_v27 = vadd.f32 %v2512_v25, %v2268_v26 }
 0x7d5   : > { %v2276_v28 = vmax.f32 %v2275_v27, 0.0 }
 0x7d7   : > { %2277 = vst.msk [vmem:[%s775_s28] sm:$0x3] %vm2239_vm10, %v2276_v28 }
 0x7d8 PF: > { %s3827_s0 = sld [smem:[#allocation5_spill]]  ;;  %s3828_s1 = sld [smem:[#allocation6_spill]] }
 0x7d9   : > { %s3829_s29 = smov %s3166_s30 }
 0x7de   : > { %p27_p9 = scmp.ge.s32.totalorder %s3827_s0, 14   ;;  %s3830_s30 = smov %s3828_s1 }
 0x7e0   :  { %29 = sbr.rel (!%p27_p9) target bundleno = 8 (0x8), region = 216 }

// kernel: _lambda_.3
= control target key start
LH: loop header
LB: loop body
LE: loop exit
PB: predicated region body
PF: predicated region fallthrough
CT: control target
= control target key end

     0   :  { %s5004_s0 = inlined_call_operand.vmem [shape: f32[2,12,100], index: 0, kind: input, shape index: {}]   ;;  %s5005_s1 = inlined_call_operand.vmem [shape: f32[1,100], index: 1, kind: input, shape index: {}]   ;;  %s5006_s2 = inlined_call_operand.vmem [shape: f32[1,100], index: 2, kind: input, shape index: {}]   ;;  %s5007_s3 = inlined_call_operand.vmem [shape: f32[2,100,50], index: 3, kind: input, shape index: {}]   ;;  %s5008_s4 = inlined_call_operand.vmem [shape: f32[2,1,50], index: 4, kind: input, shape index: {}]   ;;  %s5009_s5 = inlined_call_operand.vmem [shape: f32[2,100,50], index: 5, kind: input, shape index: {}]   ;;  %s5010_s6 = inlined_call_operand.vmem [shape: f32[2,1,50], index: 6, kind: input, shape index: {}]   ;;  %s5011_s7 = inlined_call_operand.vmem [shape: f32[2,100,50], index: 7, kind: input, shape index: {}]   ;;  %s5012_s8 = inlined_call_operand.vmem [shape: f32[2,1,50], index: 8, kind: input, shape index: {}]   ;;  %s5013_s9 = inlined_call_operand.vmem [shape: f32[2,50,100], index: 9, kind: input, shape index: {}]   ;;  %s5014_s10 = inlined_call_operand.vmem [shape: f32[1,100], index: 10, kind: input, shape index: {}]   ;;  %s5015_s11 = inlined_call_operand.vmem [shape: f32[1,100], index: 11, kind: input, shape index: {}]   ;;  %s5016_s12 = inlined_call_operand.vmem [shape: f32[1,100], index: 12, kind: input, shape index: {}]   ;;  %s5017_s13 = inlined_call_operand.vmem [shape: f32[100,100], index: 13, kind: input, shape index: {}]   ;;  %s5018_s14 = inlined_call_operand.vmem [shape: f32[1,100], index: 14, kind: input, shape index: {}]   ;;  %s5019_s15 = inlined_call_operand.vmem [shape: f32[100,100], index: 15, kind: input, shape index: {}]   ;;  %s5020_s16 = inlined_call_operand.vmem [shape: f32[1,100], index: 16, kind: input, shape index: {}]   ;;  %s5021_s17 = inlined_call_operand.vmem [shape: f32[1,100], index: 17, kind: input, shape index: {}]   ;;  %s5022_s18 = inlined_call_operand.vmem [shape: f32[1,100], index: 18, kind: input, shape index: {}]   ;;  %s5023_s19 = inlined_call_operand.vmem [shape: f32[2], index: 19, kind: input, shape index: {}]   ;;  %s5024_s20 = inlined_call_operand.vmem [shape: f32[2], index: 20, kind: input, shape index: {}]   ;;  %s5025_s21 = inlined_call_operand.vmem [shape: f32[2,2,12,100], index: 21, kind: output, shape index: {}]  }
   0x1   :  { %5030 = sst [smem:[#allocation8_spill]] %s5004_s0 }
   0x2   :  { %5031 = sst [smem:[#allocation9_spill]] %s5005_s1 }
   0x3   :  { %5032 = sst [smem:[#allocation10_spill]] %s5006_s2 }
   0x4   :  { %5033 = sst [smem:[#allocation11_spill]] %s5007_s3 }
   0x5   :  { %5034 = sst [smem:[#allocation12_spill]] %s5008_s4 }
   0x6   :  { %5035 = sst [smem:[#allocation13_spill]] %s5009_s5 }
   0x7   :  { %26 = vsyncpa [#allocation3], 0  ;;  %s72_s26 = sshll.u32 %s5023_s19, 4  ;;  %s73_s26 = int_to_ptr.vmem [resolvable:$true] %s72_s26 }
   0x8   :  { %27 = vsyncpa [#allocation5], 0  ;;  %s82_s28 = sshll.u32 %s5024_s20, 4  ;;  %s3821_s29 = scalar_lea.vmem %s73_s26, 16  ;;  %s83_s28 = int_to_ptr.vmem [resolvable:$true] %s82_s28 }
   0x9   :  { %p3822_p0 = scmp.ne.s32.totalorder %s73_s26, %s3821_s29  ;;  %p3826_p1 = scmp.lt.s32.totalorder %s73_s26, %s73_s26 }
   0xa   :  { %p3827_p2 = scmp.lt.s32.totalorder %s3821_s29, %s3821_s29 }
   0xc   :  { %p3828_p3 = por %p3827_p2, %p3826_p1 }
   0xe   :  { %p3829_p4 = pnand %p3828_p3, %p3822_p0 }
  0x10   :  { %3832 = shalt.err (!%p3829_p4)
}
  0x11   :  { %s3849_s0 = smov [#allocation2]   ;;  %s3833_s4 = scalar_lea.vmem %s83_s28, 16 }
  0x12   :  { %75 = dma.vmem_to_smem %s73_s26, 16, %s3849_s0, [#allocation3]  }
  0x13   :  { %p3834_p5 = scmp.ne.s32.totalorder %s83_s28, %s3833_s4  ;;  %p3838_p6 = scmp.lt.s32.totalorder %s83_s28, %s83_s28 }
  0x14   :  { %p3839_p7 = scmp.lt.s32.totalorder %s3833_s4, %s3833_s4 }
  0x16   :  { %p3840_p8 = por %p3839_p7, %p3838_p6 }
  0x18   :  { %p3841_p9 = pnand %p3840_p8, %p3834_p5 }
  0x1a   :  { %3844 = shalt.err (!%p3841_p9)
}
  0x1b   :  { %s3850_s19 = smov [#allocation4]  }
  0x1c   :  { %85 = dma.vmem_to_smem %s83_s28, 16, %s3850_s19, [#allocation5]  }
  0x1d   :  { %3845 = dma.done.wait [#allocation3], 16  }
  0x1e   :  { %3846 = vsyncadd [#allocation3], 4294967280 }
  0x1f   :  { %3847 = dma.done.wait [#allocation5], 16  }
  0x20   :  { %3848 = vsyncadd [#allocation5], 4294967280 }
  0x21   :  { %92 = sfence }
  0x22   :  { %s5036_s5 = sld [smem:[#allocation8_spill]]  ;;  %vm242_vm0 = vcmask 818176   ;;  %v3851_v12 = vmov 839922192   ;;  %v262_v14 = vlaneseq  ;;  %v3852_v15 = vmov 1985246804  }
  0x23   :  { %v260_v13 = vunpack.c.l.s4 %v3851_v12  ;;  %v267_v16 = vunpack.c.l.s4 %v3852_v15  ;;  %s5037_s3 = sld [smem:[#allocation11_spill]]  ;;  %s5038_s19 = sld [smem:[#allocation13_spill]]  ;;  %v3853_v60 = vmov 0.0|0.0   ;;  %vm3854_vm1 = vmmov 0  }
  0x24   :  { %v263_v18 = vshrl.u32 %v262_v14, 7  ;;  %3470 = vmatprep.subr.bf16.mxu0 %v3853_v60  ;;  %3488 = vmatprep.subr.bf16.mxu1 %v3853_v60  ;;  %vm419_vm2 = vcmask 1043456   ;;  %s5039_s2 = sld [smem:[#allocation9_spill]]  ;;  %s5040_s23 = sld [smem:[#allocation10_spill]]  ;;  %vm986_vm9 = vcmask 408576   ;;  %vm3856_vm11 = vmmov 1  }
  0x25   :  { %v261_v17 = vunpack.c.0.s8 %v260_v13  ;;  %v268_v19 = vunpack.c.0.s8 %v267_v16  ;;  %s5041_s4 = sld [smem:[#allocation12_spill]]  ;;  %vm4423_vm10 = vmpackc.low %vm986_vm9, %vm986_vm9  ;;  %vm1381_vm13 = vcmask 1041408   ;;  %vm1076_vm14 = vcmask 93184  }
  0x26   :  { %vm4448_vm12 = vmpackc.low %vm419_vm2, %vm3856_vm11  ;;  %vm1072_vm15 = vcmask 97280  }
  0x27   :  { %v3994_v20 = vsub.s32 %v261_v17, %v263_v18  ;;  %v3996_v21 = vsub.s32 %v268_v19, %v263_v18 }
  0x28   :  { %v93_v0 = vld [vmem:[%s5036_s5] sm:$0xff]  ;;  %v95_v1 = vld [vmem:[%s5036_s5 + $0x10] sm:$0xff]  ;;  %v96_v2 = vld [vmem:[%s5036_s5 + $0x18] sm:$0xf] }
  0x29   :  { %v3982_v3 = vcombine.high %v93_v0, %v93_v0  ;;  %v3984_v4 = vcombine.high %v95_v1, %v95_v1  ;;  %v94_v5 = vld [vmem:[%s5036_s5 + $0x8] sm:$0xf]  ;;  %v107_v55 = vld [vmem:[%s5037_s3] sm:$0xff]  ;;  %v109_v62 = vld [vmem:[%s5037_s3 + $0x10] sm:$0xff] }
  0x2a   :  { %v237_v8 = vcombine.low %v94_v5, %v95_v1  ;;  %v108_v56 = vld [vmem:[%s5037_s3 + $0x8] sm:$0xff]  ;;  %v135_v57 = vld [vmem:[%s5038_s19] sm:$0xff]  ;;  %v110_v63 = vld [vmem:[%s5037_s3 + $0x18] sm:$0xff] }
  0x2b   :  { %v236_v6 = vcombine.low %v93_v0, %v3982_v3  ;;  %v238_v7 = vcombine.low %v3984_v4, %v96_v2  ;;  %v3471_v58 = vpack.c.bf16 %v108_v56, %v107_v55  ;;  %v136_v59 = vld [vmem:[%s5038_s19 + $0x8] sm:$0xff]  ;;  %v113_v12 = vld [vmem:[%s5037_s3 + $0x30] sm:$0xff]  ;;  %v114_v13 = vld [vmem:[%s5037_s3 + $0x38] sm:$0xff] }
  0x2c   :  { %v246_v11 = vsel %vm242_vm0, %v237_v8, 0.0  ;;  %v3489_v61 = vpack.c.bf16 %v136_v59, %v135_v57  ;;  %v139_v8 = vld [vmem:[%s5038_s19 + $0x20] sm:$0xff]  ;;  %v141_v14 = vld [vmem:[%s5038_s19 + $0x30] sm:$0xff]  ;;  %v3480_v15 = vpack.c.bf16 %v114_v13, %v113_v12  ;;  %v142_v16 = vld [vmem:[%s5038_s19 + $0x38] sm:$0xff] }
  0x2d   :  { %v243_v9 = vsel %vm242_vm0, %v236_v6, 0.0  ;;  %v249_v10 = vsel %vm242_vm0, %v238_v7, 0.0  ;;  %3472 = vmatpush3.bf16.msra.mxu0 %v3471_v58  ;;  %v111_v6 = vld [vmem:[%s5037_s3 + $0x20] sm:$0xff]  ;;  %v112_v7 = vld [vmem:[%s5037_s3 + $0x28] sm:$0xff]  ;;  %v3498_v17 = vpack.c.bf16 %v142_v16, %v141_v14  ;;  %v121_v12 = vld [vmem:[%s5037_s3 + $0x70] sm:$0xff] }
  0x2e   :  { %244 = vadd.xlane.f32.xlu0 %v243_v9  ;;  %250 = vadd.xlane.f32.xlu1 %v249_v10  ;;  %v3477_v9 = vpack.c.bf16 %v112_v7, %v111_v6  ;;  %v140_v10 = vld [vmem:[%s5038_s19 + $0x28] sm:$0xff]  ;;  %v115_v18 = vld [vmem:[%s5037_s3 + $0x40] sm:$0xff]  ;;  %v165_v16 = vld [vmem:[%s5011_s7 + $0x10] sm:$0xff] }
  0x2f   :  { %3490 = vmatpush3.bf16.msra.mxu1 %v3489_v61  ;;  %3473 = vmatprep.subr.bf16.mxu0 %v3853_v60  ;;  %v116_v19 = vld [vmem:[%s5037_s3 + $0x48] sm:$0xff]  ;;  %v2777_v7 = vld [vmem:[%s5039_s2] ss:$0 sm:$0xff] }
  0x30   :  { %3491 = vmatprep.subr.bf16.mxu1 %v3853_v60  ;;  %v2778_v14 = vld [vmem:[%s5040_s23] ss:$0 sm:$0xff] }
  0x32   :  { %247 = vadd.xlane.f32.xlu0 %v246_v11  ;;  %v3495_v11 = vpack.c.bf16 %v140_v10, %v139_v8  ;;  %v163_v8 = vld [vmem:[%s5011_s7] sm:$0xff]  ;;  %v164_v10 = vld [vmem:[%s5011_s7 + $0x8] sm:$0xff] }
  0xbb   :  { %v245_v22 = vpop.xlane.xlu0 %244  ;;  %v251_v23 = vpop.xlane.xlu1 %250 }
  0xbc   :  { %v253_v24 = vmul.f32 0.01, %v245_v22  ;;  %v255_v25 = vmul.f32 0.01, %v251_v23  ;;  %v143_v22 = vld [vmem:[%s5038_s19 + $0x40] sm:$0xff]  ;;  %v3483_v23 = vpack.c.bf16 %v116_v19, %v115_v18  ;;  %v166_v19 = vld [vmem:[%s5011_s7 + $0x18] sm:$0xff] }
  0xbe   :  { %v265_v26 = vrot.slane %v253_v24, %v3994_v20  ;;  %v272_v27 = vrot.slane %v253_v24, %v3996_v21  ;;  %v293_v28 = vrot.slane %v255_v25, %v3994_v20  ;;  %v300_v29 = vrot.slane %v255_v25, %v3996_v21  ;;  %v144_v24 = vld [vmem:[%s5038_s19 + $0x48] sm:$0xff] }
  0xbf   :  { %v248_v30 = vpop.xlane.xlu0 %247  ;;  %v3501_v25 = vpack.c.bf16 %v144_v24, %v143_v22  ;;  %v122_v22 = vld [vmem:[%s5037_s3 + $0x78] sm:$0xff] }
  0xc0   :  { %v4002_v31 = vsub.f32 %v93_v0, %v265_v26  ;;  %v4005_v32 = vsub.f32 %v3982_v3, %v272_v27  ;;  %v4008_v33 = vsub.f32 %v3984_v4, %v293_v28  ;;  %v4010_v34 = vsub.f32 %v96_v2, %v300_v29  ;;  %v137_v0 = vld [vmem:[%s5038_s19 + $0x10] sm:$0xff]  ;;  %v138_v2 = vld [vmem:[%s5038_s19 + $0x18] sm:$0xff] }
  0xc1   :  { %v254_v35 = vmul.f32 0.01, %v248_v30  ;;  %v117_v26 = vld [vmem:[%s5037_s3 + $0x50] sm:$0xff]  ;;  %v118_v27 = vld [vmem:[%s5037_s3 + $0x58] sm:$0xff] }
  0xc2   :  { %v377_v36 = vcombine.low %v4002_v31, %v4005_v32  ;;  %v379_v37 = vcombine.low %v4008_v33, %v4010_v34  ;;  %v313_v38 = vmul.f32 %v4002_v31, %v4002_v31  ;;  %v314_v39 = vmul.f32 %v4005_v32, %v4005_v32  ;;  %v145_v28 = vld [vmem:[%s5038_s19 + $0x50] sm:$0xff]  ;;  %v146_v30 = vld [vmem:[%s5038_s19 + $0x58] sm:$0xff] }
  0xc3   :  { %v279_v40 = vrot.slane %v254_v35, %v3994_v20  ;;  %v286_v41 = vrot.slane %v254_v35, %v3996_v21  ;;  %v317_v42 = vmul.f32 %v4008_v33, %v4008_v33  ;;  %v318_v43 = vmul.f32 %v4010_v34, %v4010_v34 }
  0xc4   :  { %v325_v44 = vcombine.low %v313_v38, %v314_v39  ;;  %v3486_v29 = vpack.c.bf16 %v118_v27, %v117_v26  ;;  %v3855_v35 = vmov 0.0   ;;  %v3504_v38 = vpack.c.bf16 %v146_v30, %v145_v28  ;;  %v119_v39 = vld [vmem:[%s5037_s3 + $0x60] sm:$0xf]  ;;  %v124_v27 = vld [vmem:[%s5037_s3 + $0x88] sm:$0xff]  ;;  %v125_v28 = vld [vmem:[%s5037_s3 + $0x90] sm:$0xff] }
  0xc5   :  { %v4026_v45 = vsub.f32 %v94_v5, %v279_v40  ;;  %v4028_v46 = vsub.f32 %v95_v1, %v286_v41  ;;  %v327_v47 = vcombine.low %v317_v42, %v318_v43  ;;  %v3474_v1 = vpack.c.bf16 %v110_v63, %v109_v62  ;;  %3092 = vmatprep.mubr.msk.f32.mxu0 %vm3854_vm1, %v3855_v35  ;;  %v147_v40 = vld [vmem:[%s5038_s19 + $0x60] sm:$0xf] }
  0xc6   :  { %v331_v48 = vsel %vm242_vm0, %v325_v44, 0.0  ;;  %v3492_v5 = vpack.c.bf16 %v138_v2, %v137_v0  ;;  %3127 = vmatprep.mubr.msk.f32.mxu1 %vm3854_vm1, %v3855_v35  ;;  %v3507_v31 = vpack.c.bf16 %v164_v10, %v163_v8  ;;  %v167_v26 = vld [vmem:[%s5011_s7 + $0x20] sm:$0xff]  ;;  %v3531_v30 = vpack.c.bf16 %v125_v28, %v124_v27  ;;  %v186_v28 = vld [vmem:[%s5011_s7 + $0xb8] sm:$0xff] }
  0xc7   :  { %v378_v49 = vcombine.low %v4026_v45, %v4028_v46  ;;  %332 = vadd.xlane.f32.xlu1 %v331_v48  ;;  %v315_v50 = vmul.f32 %v4026_v45, %v4026_v45  ;;  %v316_v51 = vmul.f32 %v4028_v46, %v4028_v46  ;;  %v337_v52 = vsel %vm242_vm0, %v327_v47, 0.0  ;;  %3475 = vmatpush3.bf16.msra.mxu0 %v3474_v1  ;;  %v151_v8 = vld [vmem:[%s5038_s19 + $0x80] sm:$0xff] }
  0xc8   :  { %3493 = vmatpush3.bf16.msra.mxu1 %v3492_v5  ;;  %3476 = vmatprep.subr.bf16.mxu0 %v3853_v60  ;;  %v385_v45 = vmul.f32 %v2777_v7, %v379_v37  ;;  %v168_v37 = vld [vmem:[%s5011_s7 + $0x28] sm:$0xff]  ;;  %v179_v10 = vld [vmem:[%s5011_s7 + $0x80] sm:$0xff] }
  0xc9   :  { %v326_v53 = vcombine.low %v315_v50, %v316_v51  ;;  %3494 = vmatprep.subr.bf16.mxu1 %v3853_v60  ;;  %v384_v18 = vmul.f32 %v2777_v7, %v378_v49  ;;  %v3510_v49 = vpack.c.bf16 %v166_v19, %v165_v16  ;;  %v182_v19 = vld [vmem:[%s5011_s7 + $0x98] sm:$0xff]  ;;  %v159_v27 = vld [vmem:[%s5038_s19 + $0xc0] sm:$0xff] }
  0xcb   :  { %338 = vadd.xlane.f32.xlu1 %v337_v52  ;;  %v334_v54 = vsel %vm242_vm0, %v326_v53, 0.0  ;;  %3478 = vmatpush3.bf16.msra.mxu0 %v3477_v9  ;;  %v383_v9 = vmul.f32 %v2777_v7, %v377_v36  ;;  %v150_v7 = vld [vmem:[%s5038_s19 + $0x78] sm:$0xff] }
  0xcc   :  { %335 = vadd.xlane.f32.xlu0 %v334_v54  ;;  %3496 = vmatpush3.bf16.msra.mxu1 %v3495_v11  ;;  %v120_v11 = vld [vmem:[%s5037_s3 + $0x68] sm:$0xff] }
  0xcd   :  { %3479 = vmatprep.subr.bf16.mxu0 %v3853_v60  ;;  %3497 = vmatprep.subr.bf16.mxu1 %v3853_v60  ;;  %v3525_v32 = vpack.c.bf16 %v121_v12, %v120_v11  ;;  %v3546_v11 = vpack.c.bf16 %v151_v8, %v150_v7 }
  0xcf   :  { %3481 = vmatpush3.bf16.msra.mxu0 %v3480_v15 }
  0xd0   :  { %3499 = vmatpush3.bf16.msra.mxu1 %v3498_v17  ;;  %3482 = vmatprep.subr.bf16.mxu0 %v3853_v60 }
  0xd1   :  { %3500 = vmatprep.subr.bf16.mxu1 %v3853_v60 }
  0xd3   :  { %3484 = vmatpush3.bf16.msra.mxu0 %v3483_v23  ;;  %v123_v23 = vld [vmem:[%s5037_s3 + $0x80] sm:$0xff] }
  0xd4   :  { %3502 = vmatpush3.bf16.msra.mxu1 %v3501_v25  ;;  %3485 = vmatprep.subr.bf16.mxu0 %v3853_v60  ;;  %v3528_v25 = vpack.c.bf16 %v123_v23, %v122_v22  ;;  %v183_v22 = vld [vmem:[%s5011_s7 + $0xa0] sm:$0xff] }
  0xd5   :  { %3503 = vmatprep.subr.bf16.mxu1 %v3853_v60 }
  0xd7   :  { %3487 = vmatpush3.bf16.msra.mxu0 %v3486_v29  ;;  %v3513_v29 = vpack.c.bf16 %v168_v37, %v167_v26  ;;  %v158_v37 = vld [vmem:[%s5038_s19 + $0xb8] sm:$0xff] }
  0xd8   :  { %3505 = vmatpush3.bf16.msra.mxu1 %v3504_v38  ;;  %3090 = vmatprep.subr.mxu0 %v3855_v35  ;;  %v169_v38 = vld [vmem:[%s5011_s7 + $0x30] sm:$0xff] }
  0xd9   :  { %3125 = vmatprep.subr.mxu1 %v3855_v35 }
  0xdb   :  { %3091 = vmatpush3.msk.msra.mxu0 %vm419_vm2, %v119_v39 }
  0xdc   :  { %3126 = vmatpush3.msk.msra.mxu1 %vm419_vm2, %v147_v40  ;;  %3506 = vmatprep.subr.bf16.mxu0 %v3853_v60  ;;  %v170_v40 = vld [vmem:[%s5011_s7 + $0x38] sm:$0xff] }
  0xdd   :  { %3524 = vmatprep.subr.bf16.mxu1 %v3853_v60 }
 0x154   :  { %v333_v41 = vpop.xlane.xlu1 %332 }
 0x155   :  { %v341_v42 = vmul.f32 0.01010101, %v333_v41  ;;  %v126_v41 = vld [vmem:[%s5037_s3 + $0x98] sm:$0xff] }
 0x157   :  { %3725 = vrsqrt.f32 %v341_v42  ;;  %vm346_vm3 = vcmp.eq.f32.partialorder %v341_v42, inf  ;;  %v349_v52 = vand.u32 2147483648, %v341_v42  ;;  %vm348_vm4 = vcmp.eq.f32.partialorder %v341_v42, 0.0 }
 0x158   :  { %v339_v43 = vpop.xlane.xlu1 %338 }
 0x159   :  { %v343_v44 = vmul.f32 0.01010101, %v339_v43  ;;  %v336_v47 = vpop.xlane.xlu0 %335  ;;  %v3516_v43 = vpack.c.bf16 %v170_v40, %v169_v38  ;;  %v160_v40 = vld [vmem:[%s5038_s19 + $0xc8] sm:$0xf] }
 0x15a   :  { %v342_v48 = vmul.f32 0.01010101, %v336_v47  ;;  %v171_v47 = vld [vmem:[%s5011_s7 + $0x40] sm:$0xff] }
 0x15b   :  { %3727 = vrsqrt.f32 %v343_v44  ;;  %vm360_vm5 = vcmp.eq.f32.partialorder %v343_v44, inf  ;;  %vm362_vm6 = vcmp.eq.f32.partialorder %v343_v44, 0.0  ;;  %v363_v56 = vand.u32 2147483648, %v343_v44 }
 0x15c   :  { %3729 = vrsqrt.f32 %v342_v48  ;;  %vm353_vm7 = vcmp.eq.f32.partialorder %v342_v48, inf  ;;  %v356_v61 = vand.u32 2147483648, %v342_v48  ;;  %vm355_vm8 = vcmp.eq.f32.partialorder %v342_v48, 0.0 }
 0x161   :  { %v3726_v50 = vpop.eup %3725 }
 0x162   :  { %v345_v51 = vmul.f32 %v3726_v50, %v341_v42  ;;  %v128_v50 = vld [vmem:[%s5037_s3 + $0xa8] sm:$0xff] }
 0x164   :  { %v347_v53 = vsel %vm346_vm3, %v341_v42, %v345_v51  ;;  %v127_v42 = vld [vmem:[%s5037_s3 + $0xa0] sm:$0xff]  ;;  %v129_v51 = vld [vmem:[%s5037_s3 + $0xb0] sm:$0xff] }
 0x165   :  { %v3728_v54 = vpop.eup %3727  ;;  %v350_v55 = vsel %vm348_vm4, %v349_v52, %v347_v53  ;;  %v3537_v53 = vpack.c.bf16 %v129_v51, %v128_v50 }
 0x166   :  { %v3730_v57 = vpop.eup %3729  ;;  %v386_v58 = vadd.f32 1e-06, %v350_v55  ;;  %v359_v59 = vmul.f32 %v3728_v54, %v343_v44  ;;  %v173_v54 = vld [vmem:[%s5011_s7 + $0x50] sm:$0xff]  ;;  %v174_v55 = vld [vmem:[%s5011_s7 + $0x58] sm:$0xff] }
 0x167   :  { %v352_v62 = vmul.f32 %v3730_v57, %v342_v48  ;;  %v131_v57 = vld [vmem:[%s5037_s3 + $0xc0] sm:$0xff] }
 0x168   :  { %3731 = vrcp.f32 %v386_v58  ;;  %v361_v63 = vsel %vm360_vm5, %v343_v44, %v359_v59  ;;  %v3534_v44 = vpack.c.bf16 %v127_v42, %v126_v41  ;;  %v3522_v58 = vpack.c.bf16 %v174_v55, %v173_v54  ;;  %v188_v41 = vld [vmem:[%s5011_s7 + $0xc8] sm:$0xf] }
 0x169   :  { %v364_v0 = vsel %vm362_vm6, %v363_v56, %v361_v63  ;;  %v354_v1 = vsel %vm353_vm7, %v342_v48, %v352_v62  ;;  %v172_v48 = vld [vmem:[%s5011_s7 + $0x48] sm:$0xff]  ;;  %v130_v56 = vld [vmem:[%s5037_s3 + $0xb8] sm:$0xff]  ;;  %v149_v62 = vld [vmem:[%s5038_s19 + $0x70] sm:$0xff] }
 0x16a   :  { %v388_v2 = vadd.f32 1e-06, %v364_v0  ;;  %v357_v5 = vsel %vm355_vm8, %v356_v61, %v354_v1  ;;  %v3519_v52 = vpack.c.bf16 %v172_v48, %v171_v47  ;;  %v3540_v59 = vpack.c.bf16 %v131_v57, %v130_v56  ;;  %v148_v61 = vld [vmem:[%s5038_s19 + $0x68] sm:$0xff]  ;;  %v177_v0 = vld [vmem:[%s5011_s7 + $0x70] sm:$0xff]  ;;  %v175_v1 = vld [vmem:[%s5011_s7 + $0x60] sm:$0xf] }
 0x16b   :  { %v387_v6 = vadd.f32 1e-06, %v357_v5  ;;  %v176_v63 = vld [vmem:[%s5011_s7 + $0x68] sm:$0xff]  ;;  %v3543_v5 = vpack.c.bf16 %v149_v62, %v148_v61 }
 0x16c   :  { %3733 = vrcp.f32 %v388_v2  ;;  %v132_v2 = vld [vmem:[%s5037_s3 + $0xc8] sm:$0xf] }
 0x16d   :  { %3735 = vrcp.f32 %v387_v6  ;;  %v3561_v6 = vpack.c.bf16 %v177_v0, %v176_v63 }
 0x172   :  { %v3732_v13 = vpop.eup %3731 }
 0x173   :  { %v390_v15 = vmul.f32 %v3732_v13, %v383_v9  ;;  %v178_v9 = vld [vmem:[%s5011_s7 + $0x78] sm:$0xff]  ;;  %v152_v13 = vld [vmem:[%s5038_s19 + $0x88] sm:$0xff] }
 0x174   :  { %v3564_v12 = vpack.c.bf16 %v179_v10, %v178_v9 }
 0x175   :  { %v4160_v36 = vadd.f32 %v2778_v14, %v390_v15  ;;  %v180_v15 = vld [vmem:[%s5011_s7 + $0x88] sm:$0xff] }
 0x176   :  { %v3734_v17 = vpop.eup %3733 }
 0x177   :  { %v3736_v24 = vpop.eup %3735  ;;  %3093 = vmatmul.mubr.msk.f32.vlgmr.msra.gmra.mrb[0].mxu0 %vm242_vm0, %v4160_v36  ;;  %3128 = vmatmul.mubr.msk.f32.vlgmr.msra.gmra.mrb[0].mxu1 %vm242_vm0, %v4160_v36  ;;  %v394_v34 = vmul.f32 %v3734_v17, %v385_v45  ;;  %v154_v17 = vld [vmem:[%s5038_s19 + $0x98] sm:$0xff]  ;;  %v156_v45 = vld [vmem:[%s5038_s19 + $0xa8] sm:$0xff] }
 0x178   :  { %3508 = vmatpush3.bf16.msra.mxu0 %v3507_v31  ;;  %3526 = vmatpush3.bf16.msra.mxu1 %v3525_v32  ;;  %v392_v46 = vmul.f32 %v3736_v24, %v384_v18  ;;  %v181_v31 = vld [vmem:[%s5011_s7 + $0x90] sm:$0xff]  ;;  %v155_v18 = vld [vmem:[%s5038_s19 + $0xa0] sm:$0xff]  ;;  %v3570_v24 = vpack.c.bf16 %v183_v22, %v182_v19 }
 0x179   :  { %3095 = vmatprep.mubr.msk.f32.mxu0 %vm3854_vm1, %v3855_v35  ;;  %3130 = vmatprep.mubr.msk.f32.mxu1 %vm3854_vm1, %v3855_v35  ;;  %v4215_v39 = vadd.f32 %v2778_v14, %v394_v34  ;;  %v3567_v16 = vpack.c.bf16 %v181_v31, %v180_v15  ;;  %v3552_v23 = vpack.c.bf16 %v155_v18, %v154_v17 }
 0x17a   :  { %3509 = vmatprep.subr.bf16.mxu0 %v3853_v60  ;;  %3527 = vmatprep.subr.bf16.mxu1 %v3853_v60  ;;  %v4193_v33 = vadd.f32 %v2778_v14, %v392_v46  ;;  %v153_v14 = vld [vmem:[%s5038_s19 + $0x90] sm:$0xff] }
 0x17b   :  { %v3549_v32 = vpack.c.bf16 %v153_v14, %v152_v13  ;;  %v157_v46 = vld [vmem:[%s5038_s19 + $0xb0] sm:$0xff]  ;;  %v2789_v13 = vld [vmem:[%s5012_s8] ss:$0 sm:$0xff]  ;;  %v2794_v14 = vld [vmem:[%s5041_s4 + $0x1] ss:$0 sm:$0xff] }
 0x17c   :  { %3096 = vmatmul.mubr.msk.f32.gmra.mrb[2].mxu0 %vm242_vm0, %v4193_v33  ;;  %3131 = vmatmul.mubr.msk.f32.gmra.mrb[2].mxu1 %vm242_vm0, %v4193_v33  ;;  %v3555_v26 = vpack.c.bf16 %v157_v46, %v156_v45 }
 0x17d   :  { %3511 = vmatpush3.bf16.msra.mxu0 %v3510_v49  ;;  %3529 = vmatpush3.bf16.msra.mxu1 %v3528_v25  ;;  %v184_v49 = vld [vmem:[%s5011_s7 + $0xa8] sm:$0xff]  ;;  %v185_v25 = vld [vmem:[%s5011_s7 + $0xb0] sm:$0xff] }
 0x17e   :  { %3098 = vmatprep.mubr.msk.f32.mxu0 %vm3854_vm1, %v3855_v35  ;;  %3133 = vmatprep.mubr.msk.f32.mxu1 %vm3854_vm1, %v3855_v35  ;;  %v3573_v34 = vpack.c.bf16 %v185_v25, %v184_v49 }
 0x17f   :  { %3512 = vmatprep.subr.bf16.mxu0 %v3853_v60  ;;  %3530 = vmatprep.subr.bf16.mxu1 %v3853_v60 }
 0x180   :  { %3099 = vmatmul.mubr.msk.f32.gmra.mrb[4].mxu0 %vm242_vm0, %v4215_v39  ;;  %3134 = vmatmul.mubr.msk.f32.gmra.mrb[4].mxu1 %vm242_vm0, %v4215_v39 }
 0x181   :  { %3514 = vmatpush3.bf16.msra.mxu0 %v3513_v29  ;;  %3532 = vmatpush3.bf16.msra.mxu1 %v3531_v30  ;;  %v187_v29 = vld [vmem:[%s5011_s7 + $0xc0] sm:$0xff]  ;;  %v3558_v30 = vpack.c.bf16 %v159_v27, %v158_v37  ;;  %s2864_s7 = sld [smem:[#allocation2 + $0x1]] }
 0x182   :  { %3515 = vmatprep.subr.bf16.mxu0 %v3853_v60  ;;  %3533 = vmatprep.subr.bf16.mxu1 %v3853_v60  ;;  %v3576_v38 = vpack.c.bf16 %v187_v29, %v186_v28  ;;  %v4637_v37 = vld [vmem:[%s5014_s10] ss:$0 sm:$0xff] }
 0x183   :  { %3162 = vmatprep.mubr.msk.f32.mxu0 %vm3854_vm1, %v3855_v35  ;;  %3197 = vmatprep.mubr.msk.f32.mxu1 %vm3854_vm1, %v3855_v35 }
 0x185   :  { %3517 = vmatpush3.bf16.msra.mxu0 %v3516_v43  ;;  %3535 = vmatpush3.bf16.msra.mxu1 %v3534_v44 }
 0x186   :  { %3518 = vmatprep.subr.bf16.mxu0 %v3853_v60  ;;  %3536 = vmatprep.subr.bf16.mxu1 %v3853_v60 }
 0x189   :  { %3520 = vmatpush3.bf16.msra.mxu0 %v3519_v52  ;;  %3538 = vmatpush3.bf16.msra.mxu1 %v3537_v53 }
 0x18a   :  { %3521 = vmatprep.subr.bf16.mxu0 %v3853_v60  ;;  %3539 = vmatprep.subr.bf16.mxu1 %v3853_v60 }
 0x18d   :  { %3523 = vmatpush3.bf16.msra.mxu0 %v3522_v58  ;;  %3541 = vmatpush3.bf16.msra.mxu1 %v3540_v59 }
 0x18e   :  { %3160 = vmatprep.subr.mxu0 %v3855_v35  ;;  %3195 = vmatprep.subr.mxu1 %v3855_v35 }
 0x191   :  { %3161 = vmatpush3.msk.msra.mxu0 %vm419_vm2, %v175_v1  ;;  %3196 = vmatpush3.msk.msra.mxu1 %vm419_vm2, %v132_v2 }
 0x192   :  { %3163 = vmatmul.mubr.msk.f32.vlgmr.msra.gmra.mrb[6].mxu0 %vm242_vm0, %v4160_v36  ;;  %3198 = vmatmul.mubr.msk.f32.vlgmr.msra.gmra.mrb[6].mxu1 %vm242_vm0, %v4160_v36 }
 0x193   :  { %3542 = vmatprep.subr.bf16.mxu0 %v3853_v60  ;;  %3560 = vmatprep.subr.bf16.mxu1 %v3853_v60 }
 0x194   :  { %3544 = vmatpush3.bf16.msra.mxu0 %v3543_v5  ;;  %3562 = vmatpush3.bf16.msra.mxu1 %v3561_v6 }
 0x195   :  { %3165 = vmatprep.mubr.msk.f32.mxu0 %vm3854_vm1, %v3855_v35  ;;  %3200 = vmatprep.mubr.msk.f32.mxu1 %vm3854_vm1, %v3855_v35 }
 0x196   :  { %3166 = vmatmul.mubr.msk.f32.gmra.mrb[8].mxu0 %vm242_vm0, %v4193_v33  ;;  %3201 = vmatmul.mubr.msk.f32.gmra.mrb[8].mxu1 %vm242_vm0, %v4193_v33 }
 0x197   :  { %3545 = vmatprep.subr.bf16.mxu0 %v3853_v60  ;;  %3563 = vmatprep.subr.bf16.mxu1 %v3853_v60 }
 0x198   :  { %3547 = vmatpush3.bf16.msra.mxu0 %v3546_v11  ;;  %3565 = vmatpush3.bf16.msra.mxu1 %v3564_v12 }
 0x199   :  { %3168 = vmatprep.mubr.msk.f32.mxu0 %vm3854_vm1, %v3855_v35  ;;  %3203 = vmatprep.mubr.msk.f32.mxu1 %vm3854_vm1, %v3855_v35 }
 0x19a   :  { %3169 = vmatmul.mubr.msk.f32.gmra.mrb[10].mxu0 %vm242_vm0, %v4215_v39  ;;  %3204 = vmatmul.mubr.msk.f32.gmra.mrb[10].mxu1 %vm242_vm0, %v4215_v39 }
 0x19b   :  { %3548 = vmatprep.subr.bf16.mxu0 %v3853_v60  ;;  %3566 = vmatprep.subr.bf16.mxu1 %v3853_v60 }
 0x19c   :  { %3550 = vmatpush3.bf16.msra.mxu0 %v3549_v32  ;;  %3568 = vmatpush3.bf16.msra.mxu1 %v3567_v16 }
 0x19d   :  { %3551 = vmatprep.subr.bf16.mxu0 %v3853_v60  ;;  %3569 = vmatprep.subr.bf16.mxu1 %v3853_v60 }
 0x19e   :  { %3232 = vmatprep.mubr.msk.f32.mxu0 %vm3854_vm1, %v3855_v35  ;;  %3267 = vmatprep.mubr.msk.f32.mxu1 %vm3854_vm1, %v3855_v35 }
 0x1a0   :  { %3553 = vmatpush3.bf16.msra.mxu0 %v3552_v23  ;;  %3571 = vmatpush3.bf16.msra.mxu1 %v3570_v24 }
 0x1a1   :  { %3554 = vmatprep.subr.bf16.mxu0 %v3853_v60  ;;  %3572 = vmatprep.subr.bf16.mxu1 %v3853_v60 }
 0x1a4   :  { %3556 = vmatpush3.bf16.msra.mxu0 %v3555_v26  ;;  %3574 = vmatpush3.bf16.msra.mxu1 %v3573_v34 }
 0x1a5   :  { %3557 = vmatprep.subr.bf16.mxu0 %v3853_v60  ;;  %3575 = vmatprep.subr.bf16.mxu1 %v3853_v60 }
 0x1a8   :  { %3559 = vmatpush3.bf16.msra.mxu0 %v3558_v30  ;;  %3577 = vmatpush3.bf16.msra.mxu1 %v3576_v38 }
 0x1a9   :  { %3230 = vmatprep.subr.mxu0 %v3855_v35  ;;  %3265 = vmatprep.subr.mxu1 %v3855_v35 }
 0x1ac   :  { %3231 = vmatpush3.msk.msra.mxu0 %vm419_vm2, %v160_v40  ;;  %3266 = vmatpush3.msk.msra.mxu1 %vm419_vm2, %v188_v41 }
 0x1ad   :  { %3233 = vmatmul.mubr.msk.f32.vlgmr.msra.gmra.mrb[12].mxu0 %vm242_vm0, %v4160_v36  ;;  %3268 = vmatmul.mubr.msk.f32.vlgmr.msra.gmra.mrb[12].mxu1 %vm242_vm0, %v4160_v36  ;;  %v2779_v36 = vld [vmem:[%s5041_s4] ss:$0 sm:$0xff] }
 0x1ae   :  { %3235 = vmatprep.mubr.msk.f32.mxu0 %vm3854_vm1, %v3855_v35  ;;  %3270 = vmatprep.mubr.msk.f32.mxu1 %vm3854_vm1, %v3855_v35 }
 0x1b1   :  { %3236 = vmatmul.mubr.msk.f32.gmra.mrb[14].mxu0 %vm242_vm0, %v4193_v33  ;;  %3271 = vmatmul.mubr.msk.f32.gmra.mrb[14].mxu1 %vm242_vm0, %v4193_v33  ;;  %v2784_v33 = vld [vmem:[%s5010_s6] ss:$0 sm:$0xff] }
 0x1b2   :  { %3238 = vmatprep.mubr.msk.f32.mxu0 %vm3854_vm1, %v3855_v35  ;;  %3273 = vmatprep.mubr.msk.f32.mxu1 %vm3854_vm1, %v3855_v35 }
 0x1b5   :  { %3239 = vmatmul.mubr.msk.f32.gmra.mrb[16].mxu0 %vm242_vm0, %v4215_v39  ;;  %3274 = vmatmul.mubr.msk.f32.gmra.mrb[16].mxu1 %vm242_vm0, %v4215_v39 }
 0x24a   :  { %v489_v42 = vpop.f32.mrb[0].mxu0  ;;  %v584_v43 = vpop.f32.mrb[0].mxu1 }
 0x24b   :  { %v490_v44 = vadd.f32 %v2779_v36, %v489_v42  ;;  %v585_v47 = vadd.f32 %v2784_v33, %v584_v43  ;;  %v3094_v48 = vpop.f32.mrb[1].mxu0  ;;  %v3129_v50 = vpop.f32.mrb[1].mxu1 }
 0x24c   :  { %v2799_v48 = vld [vmem:[%s5010_s6 + $0x1] ss:$0 sm:$0xff] }
 0x24d   :  { %v506_v51 = vcombine.high %v490_v44, %v490_v44  ;;  %v601_v52 = vcombine.high %v585_v47, %v585_v47  ;;  %v2804_v50 = vld [vmem:[%s5012_s8 + $0x1] ss:$0 sm:$0xff] }
 0x24f   :  { %v984_v53 = vcombine.low %v490_v44, %v506_v51  ;;  %v985_v54 = vcombine.low %v585_v47, %v601_v52  ;;  %v494_v39 = vpop.f32.mrb[2].mxu0  ;;  %v589_v55 = vpop.f32.mrb[2].mxu1 }
 0x250   :  { %v495_v56 = vadd.f32 %v2779_v36, %v494_v39  ;;  %v590_v57 = vadd.f32 %v2784_v33, %v589_v55  ;;  %v3097_v58 = vpop.f32.mrb[3].mxu0  ;;  %v3132_v59 = vpop.f32.mrb[3].mxu1 }
 0x251   :  { %3280 = vmatprep.mubr.msk.f32.mxu0 %vm986_vm9, %v984_v53 }
 0x252   :  { %v3578_v62 = vpack.c.bf16 %v590_v57, %v985_v54  ;;  %v507_v1 = vcombine.high %v495_v56, %v495_v56  ;;  %v602_v2 = vcombine.high %v590_v57, %v590_v57 }
 0x253   :  { %v499_v63 = vpop.f32.mrb[4].mxu0  ;;  %v594_v0 = vpop.f32.mrb[4].mxu1 }
 0x254   :  { %v4427_v5 = vadd.f32 %v2779_v36, %v499_v63  ;;  %v595_v6 = vadd.f32 %v2784_v33, %v594_v0  ;;  %v3100_v7 = vpop.f32.mrb[5].mxu0  ;;  %v3135_v8 = vpop.f32.mrb[5].mxu1  ;;  %3580 = vmatprep.subr.msk.bf16.mxu0 %vm4423_vm10, %v3578_v62  ;;  %v199_v63 = vld [vmem:[%s5013_s9 + $0x40] sm:$0xff] }
 0x255   :  { %3583 = vmatpush3.bf16.xpose.msk.msra.mxu0 %vm4423_vm10, %v3578_v62  ;;  %v198_v62 = vld [vmem:[%s5013_s9 + $0x38] sm:$0xff] }
 0x256   :  { %v4434_v9 = vcombine.low %v507_v1, %v4427_v5  ;;  %v603_v10 = vcombine.high %v595_v6, %v595_v6  ;;  %v1553_v11 = vcombine.low %v602_v2, %v595_v6 }
 0x258   :  { %v4436_v12 = vpack.c.bf16 %v603_v10, %v1553_v11 }
 0x25c   :  { %3281 = vmatmul.mubr.msk.f32.vlgmr.msra.gmra.mrb[18].mxu0 %vm986_vm9, %v495_v56 }
 0x265   :  { %v679_v15 = vpop.f32.mrb[6].mxu0  ;;  %v774_v31 = vpop.f32.mrb[6].mxu1 }
 0x266   :  { %v680_v32 = vadd.f32 %v2789_v13, %v679_v15  ;;  %v775_v16 = vadd.f32 %v2794_v14, %v774_v31  ;;  %v3164_v17 = vpop.f32.mrb[7].mxu0  ;;  %v3199_v18 = vpop.f32.mrb[7].mxu1 }
 0x268   :  { %v696_v19 = vcombine.high %v680_v32, %v680_v32  ;;  %v791_v22 = vcombine.high %v775_v16, %v775_v16 }
 0x269   :  { %v684_v23 = vpop.f32.mrb[8].mxu0  ;;  %v779_v24 = vpop.f32.mrb[8].mxu1 }
 0x26a   :  { %v1096_v45 = vcombine.low %v680_v32, %v696_v19  ;;  %v1181_v46 = vcombine.low %v775_v16, %v791_v22  ;;  %v685_v49 = vadd.f32 %v2789_v13, %v684_v23  ;;  %v4445_v25 = vadd.f32 %v2794_v14, %v779_v24  ;;  %v3167_v26 = vpop.f32.mrb[9].mxu0  ;;  %v3202_v34 = vpop.f32.mrb[9].mxu1 }
 0x26c   :  { %v3584_v27 = vpack.c.bf16 %v685_v49, %v1096_v45  ;;  %3294 = vmatprep.mubr.msk.f32.mxu0 %vm986_vm9, %v1181_v46  ;;  %v697_v30 = vcombine.high %v685_v49, %v685_v49  ;;  %v792_v38 = vcombine.high %v4445_v25, %v4445_v25  ;;  %v200_v46 = vld [vmem:[%s5013_s9 + $0x48] sm:$0xff]  ;;  %v201_v49 = vld [vmem:[%s5013_s9 + $0x50] sm:$0xff] }
 0x26d   :  { %v689_v28 = vpop.f32.mrb[10].mxu0  ;;  %v784_v29 = vpop.f32.mrb[10].mxu1 }
 0x26e   :  { %v690_v40 = vadd.f32 %v2789_v13, %v689_v28  ;;  %v4455_v41 = vadd.f32 %v2794_v14, %v784_v29  ;;  %v3170_v36 = vpop.f32.mrb[11].mxu0  ;;  %v3205_v33 = vpop.f32.mrb[11].mxu1  ;;  %3586 = vmatprep.subr.msk.bf16.mxu1 %vm4448_vm12, %v3584_v27  ;;  %v4480_v13 = vpack.c.bf16 %v199_v63, %v198_v62  ;;  %v202_v28 = vld [vmem:[%s5013_s9 + $0x58] sm:$0xff]  ;;  %v203_v29 = vld [vmem:[%s5013_s9 + $0x60] sm:$0xff] }
 0x26f   :  { %3589 = vmatpush3.bf16.msk.msra.mxu1 %vm4448_vm12, %v3584_v27  ;;  %v4500_v27 = vpack.c.bf16 %v201_v49, %v200_v46 }
 0x270   :  { %v698_v42 = vcombine.high %v690_v40, %v690_v40  ;;  %v1661_v43 = vcombine.low %v697_v30, %v690_v40  ;;  %v4462_v44 = vcombine.low %v792_v38, %v4455_v41  ;;  %v4512_v30 = vpack.c.bf16 %v203_v29, %v202_v28  ;;  %v4519_v38 = vld [vmem:[%s5013_s9 + $0x68] sm:$0x3] }
 0x272   :  { %v4464_v47 = vpack.c.bf16 %v698_v42, %v1661_v43 }
 0x280   :  { %v869_v51 = vpop.f32.mrb[12].mxu0  ;;  %v964_v52 = vpop.f32.mrb[12].mxu1 }
 0x281   :  { %v870_v53 = vadd.f32 %v2799_v48, %v869_v51  ;;  %v965_v54 = vadd.f32 %v2804_v50, %v964_v52  ;;  %v3234_v39 = vpop.f32.mrb[13].mxu0  ;;  %v3269_v55 = vpop.f32.mrb[13].mxu1 }
 0x283   :  { %v886_v56 = vcombine.high %v870_v53, %v870_v53  ;;  %v981_v57 = vcombine.high %v965_v54, %v965_v54 }
 0x284   :  { %v874_v58 = vpop.f32.mrb[14].mxu0  ;;  %v969_v59 = vpop.f32.mrb[14].mxu1 }
 0x285   :  { %v1182_v0 = vcombine.low %v870_v53, %v886_v56  ;;  %v1290_v1 = vcombine.low %v965_v54, %v981_v57  ;;  %v875_v2 = vadd.f32 %v2799_v48, %v874_v58  ;;  %v970_v6 = vadd.f32 %v2804_v50, %v969_v59  ;;  %v3237_v7 = vpop.f32.mrb[15].mxu0  ;;  %v3272_v8 = vpop.f32.mrb[15].mxu1 }
 0x287   :  { %v3590_v10 = vpack.c.bf16 %v875_v2, %v1182_v0  ;;  %v4478_v11 = vpack.c.bf16 %v970_v6, %v1290_v1  ;;  %v887_v14 = vcombine.high %v875_v2, %v875_v2  ;;  %v982_v32 = vcombine.high %v970_v6, %v970_v6 }
 0x288   :  { %v879_v15 = vpop.f32.mrb[16].mxu0  ;;  %v974_v31 = vpop.f32.mrb[16].mxu1 }
 0x289   :  { %v880_v16 = vadd.f32 %v2799_v48, %v879_v15  ;;  %v975_v17 = vadd.f32 %v2804_v50, %v974_v31  ;;  %v3240_v18 = vpop.f32.mrb[17].mxu0  ;;  %v3275_v19 = vpop.f32.mrb[17].mxu1  ;;  %3592 = vmatprep.subr.msk.bf16.mxu0 %vm4423_vm10, %v3590_v10  ;;  %3598 = vmatprep.subr.msk.bf16.mxu1 %vm4448_vm12, %v4478_v11 }
 0x28a   :  { %3595 = vmatpush3.bf16.xpose.msk.msra.mxu0 %vm4423_vm10, %v3590_v10 }
 0x28b   :  { %v888_v22 = vcombine.high %v880_v16, %v880_v16  ;;  %v1747_v23 = vcombine.low %v887_v14, %v880_v16  ;;  %v983_v24 = vcombine.high %v975_v17, %v975_v17  ;;  %v1855_v45 = vcombine.low %v982_v32, %v975_v17  ;;  %3603 = vmatprep.subr.bf16.mxu0 %v4480_v13 }
 0x28d   :  { %v4496_v26 = vpack.c.bf16 %v888_v22, %v1747_v23  ;;  %v4498_v34 = vpack.c.bf16 %v983_v24, %v1855_v45  ;;  %v191_v22 = vld [vmem:[%s5013_s9] sm:$0xff]  ;;  %v192_v23 = vld [vmem:[%s5013_s9 + $0x8] sm:$0xff] }
 0x28e   :  { %v4543_v49 = vpack.c.bf16 %v192_v23, %v191_v22 }
 0x291   :  { %3295 = vmatmul.mubr.msk.f32.vlgmr.msra.gmra.mrb[20].mxu0 %vm986_vm9, %v4445_v25 }
 0x292   :  { %3605 = vmatpush3.bf16.msra.mxu0 %v4480_v13 }
 0x293   :  { %3607 = vmatprep.subr.bf16.mxu0 %v4500_v27 }
 0x296   :  { %3609 = vmatpush3.bf16.msra.mxu0 %v4500_v27 }
 0x297   :  { %3611 = vmatprep.subr.bf16.mxu0 %v4512_v30 }
 0x29a   :  { %3613 = vmatpush3.bf16.msra.mxu0 %v4512_v30 }
 0x29b   :  { %3316 = vmatprep.subr.msk.mxu0 %vm1381_vm13, %v4519_v38 }
 0x29e   :  { %3317 = vmatpush3.msk.msra.mxu0 %vm1381_vm13, %v4519_v38 }
 0x29f   :  { %3628 = vmatprep.subr.msk.bf16.mxu0 %vm4423_vm10, %v4436_v12 }
 0x32f   :  { %v3282_v25 = vpop.f32.mrb[18].mxu0 }
 0x330   :  { %v1071_v40 = vmul.f32 0.14142136, %v3282_v25  ;;  %v1061_v36 = vpop.f32.mrb[19].mxu0 }
 0x331   :  { %v1070_v33 = vmul.f32 0.14142136, %v1061_v36  ;;  %v194_v36 = vld [vmem:[%s5013_s9 + $0x18] sm:$0xff] }
 0x332   :  { %v1077_v42 = vsel %vm1076_vm14, %v1071_v40, -inf }
 0x333   :  { %1078 = vmax.xlane.f32.xlu1 %v1077_v42  ;;  %v1073_v43 = vsel %vm1072_vm15, %v1070_v33, -inf }
 0x334   :  { %1074 = vmax.xlane.f32.xlu0 %v1073_v43 }
 0x364   :  { %v3296_v48 = vpop.f32.mrb[20].mxu0 }
 0x365   :  { %v1267_v50 = vmul.f32 0.14142136, %v3296_v48  ;;  %v1257_v51 = vpop.f32.mrb[21].mxu0 }
 0x366   :  { %v1266_v52 = vmul.f32 0.14142136, %v1257_v51 }
 0x367   :  { %v1271_v53 = vsel %vm1076_vm14, %v1267_v50, -inf }
 0x368   :  { %1272 = vmax.xlane.f32.xlu1 %v1271_v53  ;;  %v1268_v54 = vsel %vm1072_vm15, %v1266_v52, -inf }
 0x369   :  { %1269 = vmax.xlane.f32.xlu0 %v1268_v54 }
 0x3c0   :  { %v1079_v39 = vpop.xlane.xlu1 %1078 }
 0x3c1   :  { %v1081_v55 = vsub.f32 %v1071_v40, %v1079_v39  ;;  %v1075_v56 = vpop.xlane.xlu0 %1074  ;;  %v193_v40 = vld [vmem:[%s5013_s9 + $0x10] sm:$0xff] }
 0x3c2   :  { %v1080_v57 = vsub.f32 %v1070_v33, %v1075_v56  ;;  %v4557_v48 = vpack.c.bf16 %v194_v36, %v193_v40  ;;  %v508_v56 = vcombine.high %v4427_v5, %v4427_v5 }
 0x3c3   :  { %v1084_v58 = vmul.f32 1.442695, %v1081_v55 }
 0x3c4   :  { %v1082_v59 = vmul.f32 1.442695, %v1080_v57 }
 0x3c5   :  { %3737 = vpow2.f32 %v1084_v58 }
 0x3c6   :  { %3739 = vpow2.f32 %v1082_v59 }
 0x3cf   :  { %v3738_v62 = vpop.eup %3737 }
 0x3d0   :  { %v3740_v63 = vpop.eup %3739  ;;  %v1089_v0 = vsel %vm1076_vm14, %v3738_v62, 0.0 }
 0x3d1   :  { %1090 = vadd.xlane.f32.xlu1 %v1089_v0  ;;  %v1086_v1 = vsel %vm1072_vm15, %v3740_v63, 0.0 }
 0x3d2   :  { %1087 = vadd.xlane.f32.xlu0 %v1086_v1 }
 0x3f5   :  { %v1273_v2 = vpop.xlane.xlu1 %1272 }
 0x3f6   :  { %v1275_v6 = vsub.f32 %v1267_v50, %v1273_v2  ;;  %v1270_v7 = vpop.xlane.xlu0 %1269  ;;  %v196_v50 = vld [vmem:[%s5013_s9 + $0x28] sm:$0xff] }
 0x3f7   :  { %v1274_v8 = vsub.f32 %v1266_v52, %v1270_v7  ;;  %v4577_v52 = vld [vmem:[%s5013_s9 + $0x30] sm:$0x3] }
 0x3f8   :  { %v1278_v10 = vmul.f32 1.442695, %v1275_v6 }
 0x3f9   :  { %v1276_v14 = vmul.f32 1.442695, %v1274_v8 }
 0x3fa   :  { %3741 = vpow2.f32 %v1278_v10 }
 0x3fb   :  { %3743 = vpow2.f32 %v1276_v14 }
 0x404   :  { %v3742_v15 = vpop.eup %3741 }
 0x405   :  { %v3744_v31 = vpop.eup %3743  ;;  %v1283_v32 = vsel %vm1076_vm14, %v3742_v15, 0.0 }
 0x406   :  { %1284 = vadd.xlane.f32.xlu1 %v1283_v32  ;;  %v1280_v16 = vsel %vm1072_vm15, %v3744_v31, 0.0 }
 0x407   :  { %1281 = vadd.xlane.f32.xlu0 %v1280_v16 }
 0x45e   :  { %v1091_v17 = vpop.xlane.xlu1 %1090 }
 0x45f   :  { %3745 = vrcp.f32 %v1091_v17  ;;  %v1088_v18 = vpop.xlane.xlu0 %1087 }
 0x460   :  { %3747 = vrcp.f32 %v1088_v18 }
 0x469   :  { %v3746_v19 = vpop.eup %3745 }
 0x46a   :  { %v3748_v24 = vpop.eup %3747  ;;  %v1095_v46 = vmul.f32 %v3746_v19, %v3738_v62 }
 0x46b   :  { %v1093_v45 = vmul.f32 %v3748_v24, %v3740_v63 }
 0x46d   :  { %3287 = vmatprep.mubr.msk.f32.mxu1 %vm1072_vm15, %v1093_v45 }
 0x46e   :  { %3288 = vmatmul.mubr.msk.f32.vlgmr.msra.gmra.mrb[18].mxu1 %vm1072_vm15, %v1095_v46  ;;  %v793_v46 = vcombine.high %v4455_v41, %v4455_v41 }
 0x46f   :  { %3601 = vmatpush3.bf16.msk.msra.mxu1 %vm4448_vm12, %v4478_v11  ;;  %v195_v11 = vld [vmem:[%s5013_s9 + $0x20] sm:$0xff]  ;;  %s2865_s9 = sld [smem:[#allocation4 + $0x1]] }
 0x470   :  { %3615 = vmatprep.subr.bf16.mxu1 %v4543_v49  ;;  %v4569_v51 = vpack.c.bf16 %v196_v50, %v195_v11 }
 0x493   :  { %v1285_v28 = vpop.xlane.xlu1 %1284 }
 0x494   :  { %3749 = vrcp.f32 %v1285_v28  ;;  %v1282_v29 = vpop.xlane.xlu0 %1281 }
 0x495   :  { %3751 = vrcp.f32 %v1282_v29 }
 0x49e   :  { %v3750_v25 = vpop.eup %3749 }
 0x49f   :  { %v3752_v33 = vpop.eup %3751  ;;  %v1289_v43 = vmul.f32 %v3750_v25, %v3742_v15 }
 0x4a0   :  { %v1287_v42 = vmul.f32 %v3752_v33, %v3744_v31 }
 0x4a2   :  { %3301 = vmatprep.mubr.msk.f32.mxu1 %vm1072_vm15, %v1287_v42 }
 0x4a3   :  { %3302 = vmatmul.mubr.msk.f32.vlgmr.msra.gmra.mrb[20].mxu1 %vm1072_vm15, %v1289_v43 }
 0x4a4   :  { %3617 = vmatpush3.bf16.msra.mxu1 %v4543_v49 }
 0x4a5   :  { %3619 = vmatprep.subr.bf16.mxu1 %v4557_v48 }
 0x4a8   :  { %3621 = vmatpush3.bf16.msra.mxu1 %v4557_v48 }
 0x4a9   :  { %3623 = vmatprep.subr.bf16.mxu1 %v4569_v51 }
 0x4ac   :  { %3625 = vmatpush3.bf16.msra.mxu1 %v4569_v51 }
 0x4ad   :  { %3333 = vmatprep.subr.msk.mxu1 %vm1381_vm13, %v4577_v52 }
 0x4b0   :  { %3334 = vmatpush3.msk.msra.mxu1 %vm1381_vm13, %v4577_v52 }
 0x4b1   :  { %3674 = vmatprep.subr.bf16.mxu1 %v3853_v60 }
 0x541   :  { %v3289_v53 = vpop.f32.mrb[18].mxu1 }
 0x542   :  { %v1172_v54 = vpop.f32.mrb[19].mxu1 }
 0x543   :  { %3335 = vmatprep.mubr.msk.f32.mxu1 %vm986_vm9, %v1172_v54 }
 0x544   :  { %3336 = vmatmul.mubr.msk.f32.vlgmr.msra.gmra.mrb[22].mxu1 %vm986_vm9, %v3289_v53 }
 0x545   :  { %3426 = vmatprep.mubr.msk.f32.mxu1 %vm3854_vm1, %v3855_v35 }
 0x576   :  { %v3303_v39 = vpop.f32.mrb[20].mxu1 }
 0x577   :  { %v1366_v55 = vpop.f32.mrb[21].mxu1 }
 0x578   :  { %3318 = vmatprep.mubr.msk.f32.mxu0 %vm986_vm9, %v1366_v55  ;;  %v3817_v55 = vld [vmem:[%s5036_s5] sm:$0xff] }
 0x579   :  { %3319 = vmatmul.mubr.msk.f32.vlgmr.msra.gmra.mrb[22].mxu0 %vm986_vm9, %v3303_v39 }
 0x57a   :  { %3631 = vmatpush3.bf16.xpose.msk.msra.mxu0 %vm4423_vm10, %v4436_v12  ;;  %3342 = vmatprep.mubr.msk.f32.mxu0 %vm986_vm9, %v4434_v9 }
 0x57b   :  { %3634 = vmatprep.subr.msk.bf16.mxu0 %vm4448_vm12, %v4464_v47 }
 0x581   :  { %3343 = vmatmul.mubr.msk.f32.vlgmr.msra.gmra.mrb[24].mxu0 %vm986_vm9, %v508_v56 }
 0x582   :  { %3637 = vmatpush3.bf16.msk.msra.mxu0 %vm4448_vm12, %v4464_v47 }
 0x583   :  { %3640 = vmatprep.subr.msk.bf16.mxu0 %vm4423_vm10, %v4496_v26 }
 0x617   :  { %v3337_v12 = vpop.f32.mrb[22].mxu1 }
 0x618   :  { %v1535_v57 = vpop.f32.mrb[23].mxu1 }
 0x64c   :  { %v3320_v9 = vpop.f32.mrb[22].mxu0 }
 0x64d   :  { %v4607_v58 = vadd.f32 %v3337_v12, %v3320_v9  ;;  %v1451_v59 = vpop.f32.mrb[23].mxu0 }
 0x64e   :  { %v1536_v62 = vadd.f32 %v1535_v57, %v1451_v59 }
 0x650   :  { %v1550_v50 = vadd.f32 %v4637_v37, %v1536_v62 }
 0x652   :  { %v2114_v53 = vcombine.high %v1550_v50, %v1550_v50  ;;  %v4646_v56 = vadd.f32 %v3817_v55, %v1550_v50 }
 0x654   :  { %v3344_v63 = vpop.f32.mrb[24].mxu0  ;;  %v4641_v54 = vadd.f32 %v2114_v53, %v3982_v3  ;;  %v214_v53 = vld [vmem:[%s5017_s13 + $0x30] sm:$0xff] }
 0x655   :  { %v1638_v0 = vmul.f32 0.14142136, %v3344_v63  ;;  %v1628_v5 = vpop.f32.mrb[25].mxu0 }
 0x656   :  { %v1637_v1 = vmul.f32 0.14142136, %v1628_v5  ;;  %v2132_v59 = vcombine.low %v4646_v56, %v4641_v54 }
 0x657   :  { %v1642_v2 = vsel %vm1076_vm14, %v1638_v0, -inf }
 0x658   :  { %1643 = vmax.xlane.f32.xlu1 %v1642_v2  ;;  %v1639_v47 = vsel %vm1072_vm15, %v1637_v1, -inf  ;;  %v2138_v3 = vsel %vm242_vm0, %v2132_v59, 0.0  ;;  %v218_v59 = vld [vmem:[%s5017_s13 + $0x50] sm:$0xff] }
 0x659   :  { %1640 = vmax.xlane.f32.xlu0 %v1639_v47 }
 0x6e5   :  { %v1644_v6 = vpop.xlane.xlu1 %1643 }
 0x6e6   :  { %v1646_v7 = vsub.f32 %v1638_v0, %v1644_v6  ;;  %v1641_v8 = vpop.xlane.xlu0 %1640 }
 0x6e7   :  { %v1645_v10 = vsub.f32 %v1637_v1, %v1641_v8 }
 0x6e8   :  { %v1649_v14 = vmul.f32 1.442695, %v1646_v7 }
 0x6e9   :  { %v1647_v15 = vmul.f32 1.442695, %v1645_v10 }
 0x6ea   :  { %3753 = vpow2.f32 %v1649_v14 }
 0x6eb   :  { %3755 = vpow2.f32 %v1647_v15 }
 0x6f4   :  { %v3754_v31 = vpop.eup %3753 }
 0x6f5   :  { %v3756_v32 = vpop.eup %3755  ;;  %v1654_v16 = vsel %vm1076_vm14, %v3754_v31, 0.0 }
 0x6f6   :  { %1655 = vadd.xlane.f32.xlu1 %v1654_v16  ;;  %v1651_v17 = vsel %vm1072_vm15, %v3756_v32, 0.0 }
 0x6f7   :  { %1652 = vadd.xlane.f32.xlu0 %v1651_v17 }
 0x783   :  { %v1656_v18 = vpop.xlane.xlu1 %1655 }
 0x784   :  { %3757 = vrcp.f32 %v1656_v18  ;;  %v1653_v19 = vpop.xlane.xlu0 %1652 }
 0x785   :  { %3759 = vrcp.f32 %v1653_v19 }
 0x78e   :  { %v3758_v22 = vpop.eup %3757 }
 0x78f   :  { %v3760_v23 = vpop.eup %3759  ;;  %v1660_v45 = vmul.f32 %v3758_v22, %v3754_v31 }
 0x790   :  { %v1658_v24 = vmul.f32 %v3760_v23, %v3756_v32  ;;  %v3818_v23 = vld [vmem:[%s5036_s5 + $0x8] sm:$0xf] }
 0x792   :  { %3349 = vmatprep.mubr.msk.f32.mxu0 %vm1072_vm15, %v1658_v24 }
 0x793   :  { %3350 = vmatmul.mubr.msk.f32.vlgmr.msra.gmra.mrb[26].mxu0 %vm1072_vm15, %v1660_v45  ;;  %v3819_v45 = vld [vmem:[%s5036_s5 + $0x10] sm:$0xff] }
 0x794   :  { %3643 = vmatpush3.bf16.xpose.msk.msra.mxu0 %vm4423_vm10, %v4496_v26  ;;  %3356 = vmatprep.mubr.msk.f32.mxu0 %vm986_vm9, %v4462_v44 }
 0x795   :  { %3646 = vmatprep.subr.msk.bf16.mxu0 %vm4448_vm12, %v4498_v34 }
 0x79b   :  { %3357 = vmatmul.mubr.msk.f32.vlgmr.msra.gmra.mrb[28].mxu0 %vm986_vm9, %v793_v46 }
 0x79c   :  { %3649 = vmatpush3.bf16.msk.msra.mxu0 %vm4448_vm12, %v4498_v34 }
 0x79d   :  { %3651 = vmatprep.subr.bf16.mxu0 %v4480_v13 }
 0x866   :  { %v4630_v61 = vpop.f32.mrb[26].mxu0 }
 0x867   :  { %v1737_v26 = vpop.f32.mrb[27].mxu0 }
 0x86e   :  { %v3358_v28 = vpop.f32.mrb[28].mxu0 }
 0x86f   :  { %v1832_v44 = vmul.f32 0.14142136, %v3358_v28  ;;  %v1822_v29 = vpop.f32.mrb[29].mxu0 }
 0x870   :  { %v1831_v25 = vmul.f32 0.14142136, %v1822_v29 }
 0x871   :  { %v1836_v40 = vsel %vm1076_vm14, %v1832_v44, -inf }
 0x872   :  { %1837 = vmax.xlane.f32.xlu1 %v1836_v40  ;;  %v1833_v41 = vsel %vm1072_vm15, %v1831_v25, -inf }
 0x873   :  { %1834 = vmax.xlane.f32.xlu0 %v1833_v41  ;;  %v208_v41 = vld [vmem:[%s5017_s13] sm:$0xff] }
 0x8ff   :  { %v1838_v36 = vpop.xlane.xlu1 %1837 }
 0x900   :  { %v1840_v33 = vsub.f32 %v1832_v44, %v1838_v36  ;;  %v1835_v42 = vpop.xlane.xlu0 %1834  ;;  %v209_v36 = vld [vmem:[%s5017_s13 + $0x8] sm:$0xff] }
 0x901   :  { %v1839_v34 = vsub.f32 %v1831_v25, %v1835_v42  ;;  %v210_v42 = vld [vmem:[%s5017_s13 + $0x10] sm:$0xff] }
 0x902   :  { %v1843_v43 = vmul.f32 1.442695, %v1840_v33  ;;  %v3675_v33 = vpack.c.bf16 %v209_v36, %v208_v41  ;;  %v4813_v36 = vld [vmem:[%s5016_s12] ss:$0 sm:$0xff]  ;;  %s2709_s12 = sld [smem:[#allocation4]] }
 0x903   :  { %v1841_v11 = vmul.f32 1.442695, %v1839_v34 }
 0x904   :  { %3761 = vpow2.f32 %v1843_v43  ;;  %3676 = vmatpush3.bf16.msra.mxu1 %v3675_v33  ;;  %v212_v43 = vld [vmem:[%s5017_s13 + $0x20] sm:$0xff] }
 0x905   :  { %3763 = vpow2.f32 %v1841_v11  ;;  %3677 = vmatprep.subr.bf16.mxu1 %v3853_v60  ;;  %v213_v11 = vld [vmem:[%s5017_s13 + $0x28] sm:$0xff] }
 0x906   :  { %v3681_v50 = vpack.c.bf16 %v213_v11, %v212_v43  ;;  %v226_v11 = vld [vmem:[%s5019_s15 + $0x20] sm:$0xff] }
 0x90e   :  { %v3762_v39 = vpop.eup %3761 }
 0x90f   :  { %v3764_v12 = vpop.eup %3763  ;;  %v1848_v57 = vsel %vm1076_vm14, %v3762_v39, 0.0 }
 0x910   :  { %1849 = vadd.xlane.f32.xlu1 %v1848_v57  ;;  %v1845_v9 = vsel %vm1072_vm15, %v3764_v12, 0.0  ;;  %v217_v57 = vld [vmem:[%s5017_s13 + $0x48] sm:$0xff] }
 0x911   :  { %1846 = vadd.xlane.f32.xlu0 %v1845_v9 }
 0x915   :  { %2139 = vadd.xlane.f32.xlu0 %v2138_v3  ;;  %v219_v3 = vld [vmem:[%s5017_s13 + $0x58] sm:$0xff] }
 0x99d   :  { %v1850_v62 = vpop.xlane.xlu1 %1849 }
 0x99e   :  { %3765 = vrcp.f32 %v1850_v62  ;;  %v1847_v63 = vpop.xlane.xlu0 %1846  ;;  %v3690_v62 = vpack.c.bf16 %v219_v3, %v218_v59  ;;  %v232_v3 = vld [vmem:[%s5019_s15 + $0x50] sm:$0xff] }
 0x99f   :  { %3767 = vrcp.f32 %v1847_v63  ;;  %v220_v63 = vld [vmem:[%s5017_s13 + $0x60] sm:$0xf] }
 0x9a2   :  { %v2140_v0 = vpop.xlane.xlu0 %2139 }
 0x9a3   :  { %v2147_v5 = vmul.f32 0.01, %v2140_v0 }
 0x9a5   :  { %v2159_v1 = vrot.slane %v2147_v5, %v3994_v20  ;;  %v2166_v2 = vrot.slane %v2147_v5, %v3996_v21 }
 0x9a7   :  { %v4656_v47 = vsub.f32 %v4646_v56, %v2159_v1  ;;  %v4659_v6 = vsub.f32 %v4641_v54, %v2166_v2 }
 0x9a8   :  { %v3766_v7 = vpop.eup %3765 }
 0x9a9   :  { %v3768_v8 = vpop.eup %3767  ;;  %v2270_v10 = vcombine.low %v4656_v47, %v4659_v6  ;;  %v1854_v15 = vmul.f32 %v3766_v7, %v3762_v39  ;;  %v2207_v19 = vmul.f32 %v4656_v47, %v4656_v47  ;;  %v2208_v22 = vmul.f32 %v4659_v6, %v4659_v6  ;;  %v215_v39 = vld [vmem:[%s5017_s13 + $0x38] sm:$0xff]  ;;  %v222_v47 = vld [vmem:[%s5019_s15] sm:$0xff]  ;;  %v223_v6 = vld [vmem:[%s5019_s15 + $0x8] sm:$0xff] }
 0x9aa   :  { %v1852_v14 = vmul.f32 %v3768_v8, %v3764_v12  ;;  %v3684_v55 = vpack.c.bf16 %v215_v39, %v214_v53  ;;  %v216_v12 = vld [vmem:[%s5017_s13 + $0x40] sm:$0xff]  ;;  %v228_v39 = vld [vmem:[%s5019_s15 + $0x30] sm:$0xff] }
 0x9ab   :  { %v2219_v25 = vcombine.low %v2207_v19, %v2208_v22  ;;  %v3687_v9 = vpack.c.bf16 %v217_v57, %v216_v12  ;;  %v230_v57 = vld [vmem:[%s5019_s15 + $0x40] sm:$0xff] }
 0x9ac   :  { %3363 = vmatprep.mubr.msk.f32.mxu0 %vm1072_vm15, %v1852_v14 }
 0x9ad   :  { %3364 = vmatmul.mubr.msk.f32.vlgmr.msra.gmra.mrb[30].mxu0 %vm1072_vm15, %v1854_v15  ;;  %v2225_v40 = vsel %vm242_vm0, %v2219_v25, 0.0  ;;  %v4804_v25 = vld [vmem:[%s5015_s11] ss:$0 sm:$0xff] }
 0x9ae   :  { %3653 = vmatpush3.bf16.msra.mxu0 %v4480_v13 }
 0x9af   :  { %3655 = vmatprep.subr.bf16.mxu0 %v4500_v27 }
 0x9b2   :  { %3657 = vmatpush3.bf16.msra.mxu0 %v4500_v27 }
 0x9b3   :  { %3659 = vmatprep.subr.bf16.mxu0 %v4512_v30 }
 0x9b6   :  { %3661 = vmatpush3.bf16.msra.mxu0 %v4512_v30 }
 0x9b7   :  { %3378 = vmatprep.subr.msk.mxu0 %vm1381_vm13, %v4519_v38 }
 0x9ba   :  { %3379 = vmatpush3.msk.msra.mxu0 %vm1381_vm13, %v4519_v38 }
 0x9bb   :  { %3663 = vmatprep.subr.bf16.mxu0 %v4543_v49 }
 0xa80   :  { %v3365_v31 = vpop.f32.mrb[30].mxu0 }
 0xa81   :  { %v1931_v32 = vpop.f32.mrb[31].mxu0 }
 0xa82   :  { %3380 = vmatprep.mubr.msk.f32.mxu0 %vm986_vm9, %v1931_v32 }
 0xa83   :  { %3381 = vmatmul.mubr.msk.f32.vlgmr.msra.gmra.mrb[32].mxu0 %vm986_vm9, %v3365_v31 }
 0xa84   :  { %3665 = vmatpush3.bf16.msra.mxu0 %v4543_v49  ;;  %3397 = vmatprep.mubr.msk.f32.mxu0 %vm986_vm9, %v1737_v26 }
 0xa85   :  { %3667 = vmatprep.subr.bf16.mxu0 %v4557_v48 }
 0xa88   :  { %3669 = vmatpush3.bf16.msra.mxu0 %v4557_v48  ;;  %v1551_v48 = vadd.f32 %v4637_v37, %v4607_v58 }
 0xa89   :  { %3671 = vmatprep.subr.bf16.mxu0 %v4569_v51 }
 0xa8c   :  { %3673 = vmatpush3.bf16.msra.mxu0 %v4569_v51 }
 0xa8d   :  { %3395 = vmatprep.subr.msk.mxu0 %vm1381_vm13, %v4577_v52 }
 0xa90   :  { %3396 = vmatpush3.msk.msra.mxu0 %vm1381_vm13, %v4577_v52  ;;  %vm2732_vm13 = vcmask 814080  }
 0xa91   :  { %3398 = vmatmul.mubr.msk.f32.vlgmr.msra.gmra.mrb[32].mxu0 %vm986_vm9, %v4630_v61  ;;  %v3820_v61 = vld [vmem:[%s5036_s5 + $0x18] sm:$0xf] }
 0xb64   :  { %v3399_v13 = vpop.f32.mrb[32].mxu0 }
 0xb65   :  { %v2103_v27 = vadd.f32 %v3399_v13, %v4637_v37  ;;  %v2093_v30 = vpop.f32.mrb[33].mxu0 }
 0xb66   :  { %v2102_v38 = vadd.f32 %v4637_v37, %v2093_v30  ;;  %v211_v37 = vld [vmem:[%s5017_s13 + $0x18] sm:$0xff] }
 0xb67   :  { %v2107_v49 = vrot.slane %v2103_v27, 4  ;;  %v3678_v34 = vpack.c.bf16 %v211_v37, %v210_v42  ;;  %v3693_v37 = vpack.c.bf16 %v223_v6, %v222_v47  ;;  %v2861_v6 = vld [vmem:[%s5020_s16] ss:$0 sm:$0xff]  ;;  %s2701_s16 = sld [smem:[#allocation2]] }
 0xb68   :  { %v2106_v51 = vrot.slane %v2102_v38, 4 }
 0xb69   :  { %3679 = vmatpush3.bf16.msra.mxu1 %v3678_v34  ;;  %v225_v34 = vld [vmem:[%s5019_s15 + $0x18] sm:$0xff] }
 0xb6a   :  { %v2108_v16 = vsel %vm419_vm2, %v2106_v51, %v2107_v49  ;;  %v2111_v17 = vsel %vm419_vm2, %v1551_v48, %v2106_v51  ;;  %3680 = vmatprep.subr.bf16.mxu1 %v3853_v60 }
 0xb6b   :  { %v2115_v18 = vcombine.high %v2111_v17, %v2111_v17  ;;  %v2116_v52 = vcombine.high %v2108_v16, %v2108_v16  ;;  %v4702_v24 = vadd.f32 %v3818_v23, %v2111_v17  ;;  %v4705_v58 = vadd.f32 %v2108_v16, %v3984_v4 }
 0xb6d   :  { %v4710_v46 = vadd.f32 %v3819_v45, %v2115_v18  ;;  %v4715_v26 = vadd.f32 %v3820_v61, %v2116_v52  ;;  %3682 = vmatpush3.bf16.msra.mxu1 %v3681_v50  ;;  %v227_v50 = vld [vmem:[%s5019_s15 + $0x28] sm:$0xff] }
 0xb6e   :  { %3683 = vmatprep.subr.bf16.mxu1 %v3853_v60  ;;  %v3699_v53 = vpack.c.bf16 %v227_v50, %v226_v11  ;;  %v2511_v11 = vcombine.high %v2861_v6, %v2861_v6 }
 0xb6f   :  { %v2133_v28 = vcombine.low %v4702_v24, %v4710_v46  ;;  %v2134_v44 = vcombine.low %v4705_v58, %v4715_v26 }
 0xb71   :  { %v2141_v4 = vsel %vm242_vm0, %v2133_v28, 0.0  ;;  %v2144_v29 = vsel %vm242_vm0, %v2134_v44, 0.0  ;;  %3685 = vmatpush3.bf16.msra.mxu1 %v3684_v55  ;;  %v229_v55 = vld [vmem:[%s5019_s15 + $0x38] sm:$0xff] }
 0xb72   :  { %2142 = vadd.xlane.f32.xlu1 %v2141_v4  ;;  %2145 = vadd.xlane.f32.xlu0 %v2144_v29  ;;  %v3702_v12 = vpack.c.bf16 %v229_v55, %v228_v39 }
 0xb73   :  { %3686 = vmatprep.subr.bf16.mxu1 %v3853_v60 }
 0xb75   :  { %3688 = vmatpush3.bf16.msra.mxu1 %v3687_v9  ;;  %v231_v9 = vld [vmem:[%s5019_s15 + $0x48] sm:$0xff] }
 0xb76   :  { %2226 = vadd.xlane.f32.xlu1 %v2225_v40  ;;  %3689 = vmatprep.subr.bf16.mxu1 %v3853_v60  ;;  %v2276_v40 = vmul.f32 %v4804_v25, %v2270_v10  ;;  %v224_v10 = vld [vmem:[%s5019_s15 + $0x10] sm:$0xff]  ;;  %v3705_v59 = vpack.c.bf16 %v231_v9, %v230_v57 }
 0xb77   :  { %v3696_v43 = vpack.c.bf16 %v225_v34, %v224_v10 }
 0xb79   :  { %3691 = vmatpush3.bf16.msra.mxu1 %v3690_v62  ;;  %v233_v62 = vld [vmem:[%s5019_s15 + $0x58] sm:$0xff] }
 0xb7a   :  { %3424 = vmatprep.subr.mxu1 %v3855_v35 }
 0xb7d   :  { %3425 = vmatpush3.msk.msra.mxu1 %vm419_vm2, %v220_v63  ;;  %v3708_v63 = vpack.c.bf16 %v233_v62, %v232_v3 }
 0xb7e   :  { %3692 = vmatprep.subr.bf16.mxu1 %v3853_v60 }
 0xbff   :  { %v2143_v0 = vpop.xlane.xlu1 %2142  ;;  %v2146_v5 = vpop.xlane.xlu0 %2145 }
 0xc00   :  { %v2148_v1 = vmul.f32 0.01, %v2143_v0  ;;  %v2149_v2 = vmul.f32 0.01, %v2146_v5  ;;  %v234_v0 = vld [vmem:[%s5019_s15 + $0x60] sm:$0xf] }
 0xc02   :  { %v2173_v7 = vrot.slane %v2148_v1, %v3994_v20  ;;  %v2180_v8 = vrot.slane %v2148_v1, %v3996_v21  ;;  %v2187_v14 = vrot.slane %v2149_v2, %v3994_v20  ;;  %v2194_v15 = vrot.slane %v2149_v2, %v3996_v21 }
 0xc03   :  { %v2227_v31 = vpop.xlane.xlu1 %2226 }
 0xc04   :  { %v4776_v32 = vsub.f32 %v4702_v24, %v2173_v7  ;;  %v4779_v13 = vsub.f32 %v4710_v46, %v2180_v8  ;;  %v4782_v27 = vsub.f32 %v4705_v58, %v2187_v14  ;;  %v4785_v30 = vsub.f32 %v4715_v26, %v2194_v15 }
 0xc05   :  { %v2234_v38 = vmul.f32 0.01010101, %v2227_v31 }
 0xc06   :  { %v2271_v49 = vcombine.low %v4776_v32, %v4779_v13  ;;  %v2272_v48 = vcombine.low %v4782_v27, %v4785_v30  ;;  %v2209_v51 = vmul.f32 %v4776_v32, %v4776_v32  ;;  %v2210_v16 = vmul.f32 %v4779_v13, %v4779_v13  ;;  %v2852_v13 = vld [vmem:[%s5018_s14] ss:$0 sm:$0xff] }
 0xc07   :  { %3769 = vrsqrt.f32 %v2234_v38  ;;  %v2211_v18 = vmul.f32 %v4782_v27, %v4782_v27  ;;  %v2212_v52 = vmul.f32 %v4785_v30, %v4785_v30  ;;  %vm2239_vm3 = vcmp.eq.f32.partialorder %v2234_v38, inf }
 0xc08   :  { %v2220_v17 = vcombine.low %v2209_v51, %v2210_v16  ;;  %v2242_v28 = vand.u32 2147483648, %v2234_v38  ;;  %vm2241_vm4 = vcmp.eq.f32.partialorder %v2234_v38, 0.0 }
 0xc09   :  { %v2221_v22 = vcombine.low %v2211_v18, %v2212_v52 }
 0xc0a   :  { %v2228_v19 = vsel %vm242_vm0, %v2220_v17, 0.0 }
 0xc0b   :  { %2229 = vadd.xlane.f32.xlu0 %v2228_v19  ;;  %v2231_v23 = vsel %vm242_vm0, %v2221_v22, 0.0  ;;  %v2277_v22 = vmul.f32 %v4804_v25, %v2271_v49 }
 0xc0c   :  { %2232 = vadd.xlane.f32.xlu1 %v2231_v23 }
 0xc11   :  { %v3770_v45 = vpop.eup %3769 }
 0xc12   :  { %v2238_v61 = vmul.f32 %v3770_v45, %v2234_v38 }
 0xc14   :  { %v2240_v44 = vsel %vm2239_vm3, %v2234_v38, %v2238_v61  ;;  %v2278_v61 = vmul.f32 %v4804_v25, %v2272_v48 }
 0xc15   :  { %v2243_v4 = vsel %vm2241_vm4, %v2242_v28, %v2240_v44 }
 0xc16   :  { %v2279_v29 = vadd.f32 1e-06, %v2243_v4 }
 0xc18   :  { %3771 = vrcp.f32 %v2279_v29 }
 0xc22   :  { %v3772_v41 = vpop.eup %3771 }
 0xc23   :  { %v2283_v33 = vmul.f32 %v3772_v41, %v2276_v40 }
 0xc25   :  { %v2294_v42 = vadd.f32 %v4813_v36, %v2283_v33 }
 0xc27   :  { %3427 = vmatmul.mubr.msk.f32.vlgmr.msra.gmra.mrb[24].mxu1 %vm242_vm0, %v2294_v42 }
 0xc28   :  { %3429 = vmatprep.mubr.msk.f32.mxu1 %vm3854_vm1, %v3855_v35  ;;  %3694 = vmatpush3.bf16.msra.mxu1 %v3693_v37 }
 0xc29   :  { %3695 = vmatprep.subr.bf16.mxu1 %v3853_v60 }
 0xc2c   :  { %3697 = vmatpush3.bf16.msra.mxu1 %v3696_v43 }
 0xc2d   :  { %3698 = vmatprep.subr.bf16.mxu1 %v3853_v60 }
 0xc30   :  { %3700 = vmatpush3.bf16.msra.mxu1 %v3699_v53 }
 0xc31   :  { %3701 = vmatprep.subr.bf16.mxu1 %v3853_v60 }
 0xc34   :  { %3703 = vmatpush3.bf16.msra.mxu1 %v3702_v12 }
 0xc35   :  { %3704 = vmatprep.subr.bf16.mxu1 %v3853_v60 }
 0xc38   :  { %3706 = vmatpush3.bf16.msra.mxu1 %v3705_v59 }
 0xc39   :  { %3707 = vmatprep.subr.bf16.mxu1 %v3853_v60 }
 0xc3c   :  { %3709 = vmatpush3.bf16.msra.mxu1 %v3708_v63 }
 0xc3d   :  { %3459 = vmatprep.subr.mxu1 %v3855_v35 }
 0xc40   :  { %3460 = vmatpush3.msk.msra.mxu1 %vm419_vm2, %v234_v0 }
 0xc98   :  { %v2230_v5 = vpop.xlane.xlu0 %2229 }
 0xc99   :  { %v2235_v60 = vmul.f32 0.01010101, %v2230_v5  ;;  %v2233_v1 = vpop.xlane.xlu1 %2232 }
 0xc9a   :  { %v2236_v2 = vmul.f32 0.01010101, %v2233_v1 }
 0xc9b   :  { %3773 = vrsqrt.f32 %v2235_v60  ;;  %vm2246_vm5 = vcmp.eq.f32.partialorder %v2235_v60, inf  ;;  %v2249_v14 = vand.u32 2147483648, %v2235_v60  ;;  %vm2248_vm6 = vcmp.eq.f32.partialorder %v2235_v60, 0.0 }
 0xc9c   :  { %3775 = vrsqrt.f32 %v2236_v2  ;;  %vm2253_vm7 = vcmp.eq.f32.partialorder %v2236_v2, inf  ;;  %v2256_v16 = vand.u32 2147483648, %v2236_v2  ;;  %vm2255_vm2 = vcmp.eq.f32.partialorder %v2236_v2, 0.0 }
 0xca5   :  { %v3774_v7 = vpop.eup %3773 }
 0xca6   :  { %v2245_v8 = vmul.f32 %v3774_v7, %v2235_v60  ;;  %v3776_v15 = vpop.eup %3775 }
 0xca7   :  { %v2252_v38 = vmul.f32 %v3776_v15, %v2236_v2 }
 0xca8   :  { %v2247_v31 = vsel %vm2246_vm5, %v2235_v60, %v2245_v8 }
 0xca9   :  { %v2250_v51 = vsel %vm2248_vm6, %v2249_v14, %v2247_v31  ;;  %v2254_v18 = vsel %vm2253_vm7, %v2236_v2, %v2252_v38 }
 0xcaa   :  { %v2280_v17 = vadd.f32 1e-06, %v2250_v51  ;;  %v2257_v52 = vsel %vm2255_vm2, %v2256_v16, %v2254_v18 }
 0xcab   :  { %v2281_v19 = vadd.f32 1e-06, %v2257_v52 }
 0xcac   :  { %3777 = vrcp.f32 %v2280_v17 }
 0xcad   :  { %3779 = vrcp.f32 %v2281_v19 }
 0xcb6   :  { %v3778_v23 = vpop.eup %3777 }
 0xcb7   :  { %v2285_v45 = vmul.f32 %v3778_v23, %v2277_v22  ;;  %v3780_v28 = vpop.eup %3779 }
 0xcb8   :  { %v2287_v4 = vmul.f32 %v3780_v28, %v2278_v61 }
 0xcb9   :  { %v2295_v44 = vadd.f32 %v4813_v36, %v2285_v45 }
 0xcba   :  { %v2296_v32 = vadd.f32 %v4813_v36, %v2287_v4 }
 0xcbb   :  { %3430 = vmatmul.mubr.msk.f32.gmra.mrb[26].mxu1 %vm242_vm0, %v2295_v44 }
 0xcbc   :  { %3432 = vmatprep.mubr.msk.f32.mxu1 %vm3854_vm1, %v3855_v35 }
 0xcbf   :  { %3433 = vmatmul.mubr.msk.f32.gmra.mrb[28].mxu1 %vm242_vm0, %v2296_v32 }
 0xcc0   :  { %3461 = vmatprep.mubr.msk.f32.mxu1 %vm3854_vm1, %v3855_v35 }
 0xcfa   :  { %v2381_v27 = vpop.f32.mrb[24].mxu1 }
 0xcfb   :  { %v2382_v30 = vadd.f32 %v2852_v13, %v2381_v27  ;;  %v3428_v49 = vpop.f32.mrb[25].mxu1 }
 0xcfd   :  { %v2395_v48 = vmax.f32 %v2382_v30, 0.0 }
 0xcff   :  { %3462 = vmatmul.mubr.msk.f32.vlgmr.msra.gmra.mrb[30].mxu1 %vm242_vm0, %v2395_v48 }
 0xd00   :  { %3464 = vmatprep.mubr.msk.f32.mxu1 %vm3854_vm1, %v3855_v35 }
 0xd8e   :  { %v2386_v29 = vpop.f32.mrb[26].mxu1 }
 0xd8f   :  { %v2387_v25 = vadd.f32 %v2852_v13, %v2386_v29  ;;  %v3431_v40 = vpop.f32.mrb[27].mxu1 }
 0xd91   :  { %v2396_v41 = vmax.f32 %v2387_v25, 0.0 }
 0xd92   :  { %v2391_v36 = vpop.f32.mrb[28].mxu1 }
 0xd93   :  { %v2392_v33 = vadd.f32 %v2852_v13, %v2391_v36  ;;  %v3434_v42 = vpop.f32.mrb[29].mxu1  ;;  %3465 = vmatmul.mubr.msk.f32.gmra.mrb[32].mxu1 %vm242_vm0, %v2396_v41 }
 0xd94   :  { %3467 = vmatprep.mubr.msk.f32.mxu1 %vm3854_vm1, %v3855_v35 }
 0xd95   :  { %v2397_v47 = vmax.f32 %v2392_v33, 0.0 }
 0xd97   :  { %3468 = vmatmul.mubr.msk.f32.gmra.mrb[34].mxu1 %vm242_vm0, %v2397_v47 }
 0xdd2   :  { %v2476_v10 = vpop.f32.mrb[30].mxu1 }
 0xdd3   :  { %v2493_v37 = vcombine.high %v2476_v10, %v2476_v10  ;;  %v2499_v34 = vadd.f32 %v2476_v10, %v4646_v56  ;;  %v3463_v43 = vpop.f32.mrb[31].mxu1 }
 0xdd5   :  { %v2500_v50 = vadd.f32 %v2493_v37, %v4641_v54  ;;  %v2513_v53 = vadd.f32 %v2861_v6, %v2499_v34 }
 0xdd7   :  { %v2514_v39 = vadd.f32 %v2511_v11, %v2500_v50  ;;  %v2862_v50 = vld [vmem:[%s5021_s17] ss:$0 sm:$0xff] }
 0xdd9   :  { %v2527_v55 = vcombine.low %v2513_v53, %v2514_v39 }
 0xddb   :  { %v2533_v35 = vsel %vm242_vm0, %v2527_v55, 0.0  ;;  %v2863_v55 = vld [vmem:[%s5022_s18] ss:$0 sm:$0xff] }
 0xddc   :  { %2534 = vadd.xlane.f32.xlu0 %v2533_v35 }
 0xe66   :  { %v2481_v12 = vpop.f32.mrb[32].mxu1 }
 0xe67   :  { %v2494_v57 = vcombine.high %v2481_v12, %v2481_v12  ;;  %v2501_v9 = vadd.f32 %v2481_v12, %v4702_v24  ;;  %v3466_v59 = vpop.f32.mrb[33].mxu1  ;;  %v4938_v12 = vstv %s2701_s16 }
 0xe68   :  { %v4942_v59 = vstv %s2709_s12 }
 0xe69   :  { %v2502_v3 = vadd.f32 %v2494_v57, %v4710_v46  ;;  %v2535_v62 = vpop.xlane.xlu0 %2534  ;;  %v2515_v0 = vadd.f32 %v2861_v6, %v2501_v9  ;;  %v4940_v57 = vstv %s2864_s7 }
 0xe6a   :  { %v2542_v63 = vmul.f32 0.01, %v2535_v62  ;;  %v2486_v56 = vpop.f32.mrb[34].mxu1 }
 0xe6b   :  { %v2495_v5 = vcombine.high %v2486_v56, %v2486_v56  ;;  %v2503_v54 = vadd.f32 %v2486_v56, %v4705_v58  ;;  %v3469_v60 = vpop.f32.mrb[35].mxu1  ;;  %v2516_v1 = vadd.f32 %v2511_v11, %v2502_v3  ;;  %v4944_v3 = vstv %s2865_s9 }
 0xe6c   :  { %v2554_v2 = vrot.slane %v2542_v63, %v3994_v20  ;;  %v2561_v7 = vrot.slane %v2542_v63, %v3996_v21 }
 0xe6d   :  { %v2504_v8 = vadd.f32 %v2495_v5, %v4715_v26  ;;  %v2528_v14 = vcombine.low %v2515_v0, %v2516_v1  ;;  %v2517_v31 = vadd.f32 %v2861_v6, %v2503_v54 }
 0xe6e   :  { %v2596_v24 = vsub.f32 %v2513_v53, %v2554_v2  ;;  %v2597_v15 = vsub.f32 %v2514_v39, %v2561_v7 }
 0xe6f   :  { %v2536_v46 = vsel %vm242_vm0, %v2528_v14, 0.0  ;;  %v2518_v38 = vadd.f32 %v2511_v11, %v2504_v8 }
 0xe70   :  { %v2665_v51 = vcombine.low %v2596_v24, %v2597_v15  ;;  %2537 = vadd.xlane.f32.xlu1 %v2536_v46  ;;  %v2602_v16 = vmul.f32 %v2596_v24, %v2596_v24  ;;  %v2603_v17 = vmul.f32 %v2597_v15, %v2597_v15 }
 0xe71   :  { %v2529_v58 = vcombine.low %v2517_v31, %v2518_v38 }
 0xe72   :  { %v2614_v18 = vcombine.low %v2602_v16, %v2603_v17  ;;  %v2671_v53 = vmul.f32 %v2862_v50, %v2665_v51 }
 0xe73   :  { %v2539_v52 = vsel %vm242_vm0, %v2529_v58, 0.0 }
 0xe74   :  { %v2620_v19 = vsel %vm242_vm0, %v2614_v18, 0.0  ;;  %2540 = vadd.xlane.f32.xlu0 %v2539_v52 }
 0xe75   :  { %2621 = vadd.xlane.f32.xlu1 %v2620_v19 }
 0xefd   :  { %v2538_v26 = vpop.xlane.xlu1 %2537 }
 0xefe   :  { %v2543_v22 = vmul.f32 0.01, %v2538_v26 }
 0xf00   :  { %v2568_v23 = vrot.slane %v2543_v22, %v3994_v20  ;;  %v2575_v45 = vrot.slane %v2543_v22, %v3996_v21 }
 0xf01   :  { %v2541_v61 = vpop.xlane.xlu0 %2540 }
 0xf02   :  { %v4908_v28 = vsub.f32 %v2515_v0, %v2568_v23  ;;  %v4910_v44 = vsub.f32 %v2516_v1, %v2575_v45  ;;  %v2622_v4 = vpop.xlane.xlu1 %2621  ;;  %v2544_v32 = vmul.f32 0.01, %v2541_v61 }
 0xf03   :  { %v2629_v13 = vmul.f32 0.01010101, %v2622_v4 }
 0xf04   :  { %v2666_v27 = vcombine.low %v4908_v28, %v4910_v44  ;;  %v2582_v30 = vrot.slane %v2544_v32, %v3994_v20  ;;  %v2589_v49 = vrot.slane %v2544_v32, %v3996_v21  ;;  %v2604_v48 = vmul.f32 %v4908_v28, %v4908_v28 }
 0xf05   :  { %3781 = vrsqrt.f32 %v2629_v13  ;;  %v2605_v40 = vmul.f32 %v4910_v44, %v4910_v44  ;;  %vm2634_vm1 = vcmp.eq.f32.partialorder %v2629_v13, inf  ;;  %v2637_v37 = vand.u32 2147483648, %v2629_v13 }
 0xf06   :  { %v4918_v29 = vsub.f32 %v2517_v31, %v2582_v30  ;;  %v4920_v25 = vsub.f32 %v2518_v38, %v2589_v49  ;;  %vm2636_vm8 = vcmp.eq.f32.partialorder %v2629_v13, 0.0 }
 0xf07   :  { %v2615_v36 = vcombine.low %v2604_v48, %v2605_v40 }
 0xf08   :  { %v2667_v41 = vcombine.low %v4918_v29, %v4920_v25  ;;  %v2606_v20 = vmul.f32 %v4918_v29, %v4918_v29  ;;  %v2607_v21 = vmul.f32 %v4920_v25, %v4920_v25 }
 0xf09   :  { %v2623_v33 = vsel %vm242_vm0, %v2615_v36, 0.0 }
 0xf0a   :  { %v2616_v42 = vcombine.low %v2606_v20, %v2607_v21  ;;  %2624 = vadd.xlane.f32.xlu0 %v2623_v33  ;;  %v2673_v48 = vmul.f32 %v2862_v50, %v2667_v41 }
 0xf0c   :  { %v2626_v47 = vsel %vm242_vm0, %v2616_v42, 0.0 }
 0xf0d   :  { %2627 = vadd.xlane.f32.xlu1 %v2626_v47 }
 0xf0f   :  { %v3782_v6 = vpop.eup %3781 }
 0xf10   :  { %v2633_v10 = vmul.f32 %v3782_v6, %v2629_v13 }
 0xf12   :  { %v2635_v34 = vsel %vm2634_vm1, %v2629_v13, %v2633_v10  ;;  %v2672_v13 = vmul.f32 %v2862_v50, %v2666_v27 }
 0xf13   :  { %v2638_v43 = vsel %vm2636_vm8, %v2637_v37, %v2635_v34 }
 0xf14   :  { %v2674_v11 = vadd.f32 1e-06, %v2638_v43 }
 0xf16   :  { %3783 = vrcp.f32 %v2674_v11 }
 0xf20   :  { %v3784_v39 = vpop.eup %3783 }
 0xf21   :  { %v2678_v35 = vmul.f32 %v3784_v39, %v2671_v53 }
 0xf23   :  { %v2689_v9 = vadd.f32 %v2863_v55, %v2678_v35 }
 0xf25   :  { %v2695_v62 = vcombine.high %v2689_v9, %v2689_v9  ;;  %v2703_v63 = vmul.f32 %v4938_v12, %v2689_v9  ;;  %v2738_v56 = vmul.f32 %v4940_v57, %v2689_v9 }
 0xf27   :  { %v2704_v0 = vmul.f32 %v4938_v12, %v2695_v62  ;;  %v2711_v5 = vadd.f32 %v4942_v59, %v2703_v63  ;;  %v2739_v54 = vmul.f32 %v4940_v57, %v2695_v62  ;;  %v2746_v60 = vadd.f32 %v4944_v3, %v2738_v56 }
 0xf29   :  { %v2712_v1 = vadd.f32 %v4942_v59, %v2704_v0  ;;  %3785 = vtanh.f32 %v2711_v5  ;;  %v2747_v2 = vadd.f32 %v4944_v3, %v2739_v54 }
 0xf2a   :  { %3787 = vtanh.f32 %v2746_v60 }
 0xf2b   :  { %3789 = vtanh.f32 %v2712_v1 }
 0xf2c   :  { %3791 = vtanh.f32 %v2747_v2 }
 0xf33   :  { %v3786_v7 = vpop.eup %3785 }
 0xf34   :  { %v3788_v8 = vpop.eup %3787 }
 0xf35   :  { %v3790_v14 = vpop.eup %3789 }
 0xf36   :  { %v3792_v24 = vpop.eup %3791  ;;  %v2727_v15 = vcombine.low %v3786_v7, %v3790_v14 }
 0xf37   :  { %v2762_v31 = vcombine.low %v3788_v8, %v3792_v24 }
 0xf38   :  { %2731 = vst.msk [vmem:[%s5025_s21] sm:$0xff] %vm242_vm0, %v2727_v15 }
 0xf39   :  { %2866 = vst.msk [vmem:[%s5025_s21 + $0x20] sm:$0xff] %vm242_vm0, %v2762_v31 }
 0xf97   :  { %v2625_v46 = vpop.xlane.xlu0 %2624 }
 0xf98   :  { %v2630_v38 = vmul.f32 0.01010101, %v2625_v46 }
 0xf9a   :  { %v2628_v51 = vpop.xlane.xlu1 %2627  ;;  %3793 = vrsqrt.f32 %v2630_v38  ;;  %vm2641_vm9 = vcmp.eq.f32.partialorder %v2630_v38, inf  ;;  %v2644_v18 = vand.u32 2147483648, %v2630_v38  ;;  %vm2643_vm10 = vcmp.eq.f32.partialorder %v2630_v38, 0.0 }
 0xf9b   :  { %v2631_v16 = vmul.f32 0.01010101, %v2628_v51 }
 0xf9d   :  { %3795 = vrsqrt.f32 %v2631_v16  ;;  %vm2648_vm11 = vcmp.eq.f32.partialorder %v2631_v16, inf  ;;  %v2651_v45 = vand.u32 2147483648, %v2631_v16  ;;  %vm2650_vm12 = vcmp.eq.f32.partialorder %v2631_v16, 0.0 }
 0xfa4   :  { %v3794_v17 = vpop.eup %3793 }
 0xfa5   :  { %v2640_v58 = vmul.f32 %v3794_v17, %v2630_v38 }
 0xfa7   :  { %v3796_v52 = vpop.eup %3795  ;;  %v2642_v19 = vsel %vm2641_vm9, %v2630_v38, %v2640_v58 }
 0xfa8   :  { %v2645_v26 = vsel %vm2643_vm10, %v2644_v18, %v2642_v19  ;;  %v2647_v22 = vmul.f32 %v3796_v52, %v2631_v16 }
 0xfa9   :  { %v2675_v23 = vadd.f32 1e-06, %v2645_v26 }
 0xfaa   :  { %v2649_v61 = vsel %vm2648_vm11, %v2631_v16, %v2647_v22 }
 0xfab   :  { %3797 = vrcp.f32 %v2675_v23  ;;  %v2652_v4 = vsel %vm2650_vm12, %v2651_v45, %v2649_v61 }
 0xfac   :  { %v2676_v32 = vadd.f32 1e-06, %v2652_v4 }
 0xfae   :  { %3799 = vrcp.f32 %v2676_v32 }
 0xfb5   :  { %v3798_v30 = vpop.eup %3797 }
 0xfb6   :  { %v2680_v49 = vmul.f32 %v3798_v30, %v2672_v13 }
 0xfb8   :  { %v3800_v40 = vpop.eup %3799  ;;  %v2690_v36 = vadd.f32 %v2863_v55, %v2680_v49 }
 0xfb9   :  { %v2682_v20 = vmul.f32 %v3800_v40, %v2673_v48 }
 0xfba   :  { %v2696_v21 = vcombine.high %v2690_v36, %v2690_v36  ;;  %v2705_v33 = vmul.f32 %v4938_v12, %v2690_v36  ;;  %v2740_v42 = vmul.f32 %v4940_v57, %v2690_v36 }
 0xfbb   :  { %v2691_v47 = vadd.f32 %v2863_v55, %v2682_v20 }
 0xfbc   :  { %v2706_v6 = vmul.f32 %v4938_v12, %v2696_v21  ;;  %v2713_v28 = vadd.f32 %v4942_v59, %v2705_v33  ;;  %v2741_v44 = vmul.f32 %v4940_v57, %v2696_v21  ;;  %v2748_v27 = vadd.f32 %v4944_v3, %v2740_v42 }
 0xfbd   :  { %v2697_v10 = vcombine.high %v2691_v47, %v2691_v47  ;;  %v2707_v29 = vmul.f32 %v4938_v12, %v2691_v47  ;;  %v2742_v25 = vmul.f32 %v4940_v57, %v2691_v47 }
 0xfbe   :  { %v2714_v41 = vadd.f32 %v4942_v59, %v2706_v6  ;;  %3801 = vtanh.f32 %v2713_v28  ;;  %v2749_v37 = vadd.f32 %v4944_v3, %v2741_v44 }
 0xfbf   :  { %3803 = vtanh.f32 %v2748_v27  ;;  %v2708_v34 = vmul.f32 %v4938_v12, %v2697_v10  ;;  %v2715_v43 = vadd.f32 %v4942_v59, %v2707_v29  ;;  %v2743_v11 = vmul.f32 %v4940_v57, %v2697_v10 }
 0xfc0   :  { %3805 = vtanh.f32 %v2714_v41  ;;  %v2750_v50 = vadd.f32 %v4944_v3, %v2742_v25 }
 0xfc1   :  { %3807 = vtanh.f32 %v2749_v37  ;;  %v2716_v53 = vadd.f32 %v4942_v59, %v2708_v34  ;;  %v2751_v39 = vadd.f32 %v4944_v3, %v2743_v11 }
 0xfc2   :  { %3809 = vtanh.f32 %v2715_v43 }
 0xfc3   :  { %3811 = vtanh.f32 %v2716_v53 }
 0xfc4   :  { %3813 = vtanh.f32 %v2750_v50 }
 0xfc5   :  { %3815 = vtanh.f32 %v2751_v39 }
 0xfc8   :  { %v3802_v55 = vpop.eup %3801 }
 0xfc9   :  { %v3804_v35 = vpop.eup %3803  ;;  %2733 = vst.msk [vmem:[%s5025_s21 + $0x8] sm:$0xf] %vm2732_vm13, %v3802_v55 }
 0xfca   :  { %v3806_v12 = vpop.eup %3805  ;;  %2867 = vst.msk [vmem:[%s5025_s21 + $0x28] sm:$0xf] %vm2732_vm13, %v3804_v35 }
 0xfcb   :  { %v3808_v57 = vpop.eup %3807 }
 0xfcc   :  { %v3810_v9 = vpop.eup %3809 }
 0xfcd   :  { %v3812_v59 = vpop.eup %3811  ;;  %v2728_v3 = vcombine.low %v3806_v12, %v3810_v9 }
 0xfce   :  { %v3814_v62 = vpop.eup %3813  ;;  %2735 = vst.msk [vmem:[%s5025_s21 + $0x18] sm:$0xf] %vm2732_vm13, %v3812_v59 }
 0xfcf   :  { %v3816_v63 = vpop.eup %3815  ;;  %2734 = vst.msk [vmem:[%s5025_s21 + $0x10] sm:$0xff] %vm242_vm0, %v2728_v3  ;;  %v2763_v56 = vcombine.low %v3808_v57, %v3814_v62 }
 0xfd0   :  { %2869 = vst.msk [vmem:[%s5025_s21 + $0x38] sm:$0xf] %vm2732_vm13, %v3816_v63 }
 0xfd1   :  { %2868 = vst.msk [vmem:[%s5025_s21 + $0x30] sm:$0xff] %vm242_vm0, %v2763_v56 }
 0xfd2   :  { %2775 = vsyncpa [#allocation3], 1 }
 0xfd3   :  { %2776 = vsyncpa [#allocation5], 1 }

</bundles_post_ra>
